<compile_context>
chip_gen: v6e
topology: v6e:2x2x1
jax: 0.10.0
libtpu: 0.0.40
codegen_flags: <defaults>
</compile_context>

<pallas_src>
import functools

import jax
import jax.numpy as jnp
from jax import lax
from jax.experimental import pallas as pl
from jax.experimental.pallas import tpu as pltpu


# --------------------- bidirectional GRU (one pallas_call) -------------------
def _bigru_kernel(x_ref, wih_ref, whh_ref, bih_ref, bhh_ref, out_ref, gi_ref):
    # grid axis 0 = direction (0: forward, 1: backward), marked "parallel"
    # TODO(synk): the GRU recurrence is inherently sequential over time; it is
    # expressed as an in-kernel fori_loop, not a data-parallel kernel.
    d = pl.program_id(0)
    B, S, D = x_ref.shape
    H = out_ref.shape[2]

    # ---- hoisted input projection: one (B*S, D) x (D, 3H) matmul ----
    x2 = x_ref[...].reshape(B * S, D).astype(jnp.bfloat16)
    wih = wih_ref[0].astype(jnp.bfloat16)                       # (D, 3H)
    gi_ref[...] = (jnp.dot(x2, wih, preferred_element_type=jnp.float32)
                   + bih_ref[0])                                # (B*S, 3H) f32

    whh = whh_ref[0].astype(jnp.bfloat16)                       # resident (H, 3H)
    bhh = bhh_ref[0]                                            # (1, 3H) f32

    def step(t, h):
        # forward direction reads time t, backward reads S-1-t
        s_t = jnp.where(d == 0, t, S - 1 - t)
        gi_t = jnp.concatenate(
            [gi_ref[pl.ds(b * S + s_t, 1), :] for b in range(B)], axis=0)  # (B,3H)
        gh = jnp.dot(h.astype(jnp.bfloat16), whh,
                     preferred_element_type=jnp.float32) + bhh             # (B,3H)
        r = jax.nn.sigmoid(gi_t[:, :H] + gh[:, :H])
        z = jax.nn.sigmoid(gi_t[:, H:2 * H] + gh[:, H:2 * H])
        n = jnp.tanh(gi_t[:, 2 * H:] + r * gh[:, 2 * H:])
        h_new = (1.0 - z) * n + z * h
        for b in range(B):
            out_ref[b, pl.ds(s_t, 1), :] = h_new[b:b + 1, :]
        return h_new

    lax.fori_loop(0, S, step, jnp.zeros((B, H), jnp.float32), unroll=True)


def bigru_forward(x, wih, whh, bih, bhh):
    B, S, D = x.shape
    H = whh.shape[1]
    return pl.pallas_call(
        _bigru_kernel,
        out_shape=jax.ShapeDtypeStruct((B, S, 2 * H), jnp.float32),
        grid=(2,),
        in_specs=[
            pl.BlockSpec((B, S, D), lambda d: (0, 0, 0)),
            pl.BlockSpec((1, D, 3 * H), lambda d: (d, 0, 0)),
            pl.BlockSpec((1, H, 3 * H), lambda d: (d, 0, 0)),
            pl.BlockSpec((1, 1, 3 * H), lambda d: (d, 0, 0)),
            pl.BlockSpec((1, 1, 3 * H), lambda d: (d, 0, 0)),
        ],
        out_specs=pl.BlockSpec((B, S, H), lambda d: (0, 0, d)),
        scratch_shapes=[pltpu.VMEM((B * S, 3 * H), jnp.float32)],
        compiler_params=pltpu.CompilerParams(dimension_semantics=("parallel",)),
    )(x, wih, whh, bih, bhh)


# ------------- fused attention + filter generation (per batch) ---------------
def _attn_filtergen_kernel(go_ref, q_ref, genw_ref, filt_ref):
    go = go_ref[0]                                              # (S, 2H) f32
    q = q_ref[...]                                              # (1, 2H) f32
    # attention scores on the VPU (multiply + lane reduce), f32
    s = jnp.sum(go * q, axis=-1, keepdims=True)                 # (S, 1)
    m = jnp.max(s, axis=0, keepdims=True)
    e = jnp.exp(s - m)
    denom = jnp.sum(e, axis=0, keepdims=True)
    w = e / denom          # exact divide: keeps the global scale exact vs ref
    ctx = jnp.sum(go * w, axis=0, keepdims=True)                # (1, 2H)
    filt_ref[0] = jnp.dot(ctx.astype(jnp.bfloat16),
                          genw_ref[...].astype(jnp.bfloat16),
                          preferred_element_type=jnp.float32)   # (1, K*D*Fn)


def attn_filtergen(gru_out, q_vec, gen_w_flat):
    B, S, H2 = gru_out.shape
    KDF = gen_w_flat.shape[1]
    out = pl.pallas_call(
        _attn_filtergen_kernel,
        out_shape=jax.ShapeDtypeStruct((B, 1, KDF), jnp.float32),
        grid=(B,),
        in_specs=[
            pl.BlockSpec((1, S, H2), lambda b: (b, 0, 0)),
            pl.BlockSpec((1, H2), lambda b: (0, 0)),
            pl.BlockSpec((H2, KDF), lambda b: (0, 0)),
        ],
        out_specs=pl.BlockSpec((1, 1, KDF), lambda b: (b, 0, 0)),
        compiler_params=pltpu.CompilerParams(dimension_semantics=("parallel",)),
    )(gru_out, q_vec, gen_w_flat)
    return out[:, 0, :]                                         # (B, K*D*Fn)


# --------------------------- adaptive conv + relu ----------------------------
def _adaptive_conv_kernel(x_ref, f_ref, o_ref, *, kernel_size):
    # TODO(synk): fusing this with the filter-generation kernel needs an
    # in-kernel lane->sublane reshape of the generated (1, K*D*Fn) filter row;
    # kept as a separate kernel with a free XLA reshape in between.
    xb = x_ref[0]                                               # (S, D)
    T = o_ref.shape[1]
    # patch matrix (T, K*D) built once via lane concatenation
    patch = jnp.concatenate([xb[k:k + T, :] for k in range(kernel_size)],
                            axis=1)                             # (T, K*D)
    out = jnp.dot(patch.astype(jnp.bfloat16), f_ref[0].astype(jnp.bfloat16),
                  preferred_element_type=jnp.float32)           # (T, Fn)
    o_ref[0] = jnp.maximum(out, 0.0)


def adaptive_conv_relu(x, filters, *, kernel_size):
    B, S, D = x.shape
    KD, Fn = filters.shape[1], filters.shape[2]
    T = S - kernel_size + 1
    return pl.pallas_call(
        functools.partial(_adaptive_conv_kernel, kernel_size=kernel_size),
        out_shape=jax.ShapeDtypeStruct((B, T, Fn), jnp.float32),
        grid=(B,),
        in_specs=[pl.BlockSpec((1, S, D), lambda b: (b, 0, 0)),
                  pl.BlockSpec((1, KD, Fn), lambda b: (b, 0, 0))],
        out_specs=pl.BlockSpec((1, T, Fn), lambda b: (b, 0, 0)),
        compiler_params=pltpu.CompilerParams(dimension_semantics=("parallel",)),
    )(x, filters)


# ------------------------------ full forward ---------------------------------
def adaptive_conv1d_forward(x, params):
    B, S, D = x.shape
    Fn, D_, K, _ = params["generation_weight"].shape            # static shapes
    gru_out = bigru_forward(x, params["wih"], params["whh"],
                            params["bih"], params["bhh"])       # (B, S, 2H)
    filt_flat = attn_filtergen(gru_out, params["q_vector"],
                               params["gen_w_flat"])            # (B, K*D*Fn)
    filters = filt_flat.reshape(B, K * D_, Fn)                  # free reshape
    return adaptive_conv_relu(x, filters, kernel_size=K)        # (B, T, Fn)


# ----------------------- deterministic parameter init ------------------------
def init_params(key, feature_dim, hidden, kernel_size, filter_num):
    keys = jax.random.split(key, 6)
    D, H, K, Fn = feature_dim, hidden, kernel_size, filter_num
    bound = 1.0 / float(H) ** 0.5

    def u(kk, shape):
        return jax.random.uniform(kk, shape, jnp.float32, -bound, bound)

    params = {
        # stacked (forward, backward) GRU weights, pre-transposed to (in, 3H)
        "wih": u(keys[0], (2, D, 3 * H)),
        "whh": u(keys[1], (2, H, 3 * H)),
        "bih": u(keys[2], (2, 1, 3 * H)),
        "bhh": u(keys[3], (2, 1, 3 * H)),
        # q stored lane-dense as (1, 2H)
        "q_vector": jax.random.uniform(keys[4], (1, 2 * H), jnp.float32),
        "generation_weight": (jax.random.normal(
            keys[5], (Fn, D, K, 2 * H), jnp.float32) / jnp.sqrt(2.0 * H)),
    }
    # pre-flatten the generator ONCE at init: (2H, K*D*Fn), column = (k*D+d)*Fn+f
    params["gen_w_flat"] = jnp.transpose(
        params["generation_weight"], (3, 2, 1, 0)).reshape(2 * H, K * D * Fn)
    return params


# ----------------------------- pure-JAX reference ----------------------------
def reference_forward(x, params):
    B, S, D = x.shape
    H = params["whh"].shape[1]
    b16, f32 = jnp.bfloat16, jnp.float32

    def run_dir(idx, reverse):
        wih, whh = params["wih"][idx], params["whh"][idx]
        bih, bhh = params["bih"][idx], params["bhh"][idx]
        gi_all = (jnp.dot(x.reshape(B * S, D).astype(b16), wih.astype(b16),
                          preferred_element_type=f32)
                  + bih).reshape(B, S, 3 * H)
        whh_b = whh.astype(b16)
        order = jnp.arange(S - 1, -1, -1) if reverse else jnp.arange(S)

        def step(h, t):
            gi = gi_all[:, t, :]
            gh = jnp.dot(h.astype(b16), whh_b, preferred_element_type=f32) + bhh
            r = jax.nn.sigmoid(gi[:, :H] + gh[:, :H])
            z = jax.nn.sigmoid(gi[:, H:2 * H] + gh[:, H:2 * H])
            n = jnp.tanh(gi[:, 2 * H:] + r * gh[:, 2 * H:])
            h_new = (1.0 - z) * n + z * h
            return h_new, h_new

        _, hs = jax.lax.scan(step, jnp.zeros((B, H), f32), order)
        hs = jnp.transpose(hs, (1, 0, 2))
        return hs[:, ::-1, :] if reverse else hs

    go = jnp.concatenate([run_dir(0, False), run_dir(1, True)], axis=-1)  # (B,S,2H)
    s = jnp.sum(go * params["q_vector"], axis=-1, keepdims=True)          # (B,S,1)
    w = jax.nn.softmax(s, axis=1)
    ctx = jnp.sum(go * w, axis=1)                                         # (B,2H)
    Fn, D_, K, _ = params["generation_weight"].shape
    filt = jnp.dot(ctx.astype(b16), params["gen_w_flat"].astype(b16),
                   preferred_element_type=f32).reshape(B, K * D_, Fn)
    T = S - K + 1
    patch = jnp.concatenate([x[:, k:k + T, :] for k in range(K)], axis=-1)  # (B,T,K*D)
    out = jnp.einsum("btq,bqf->btf", patch.astype(b16), filt.astype(b16),
                     preferred_element_type=f32)
    return jnp.maximum(out, 0.0)


if __name__ == "__main__":
    B, S, D = 2, 8, 32
    hidden, kernel_size, filter_num = 128, 2, 32

    key = jax.random.PRNGKey(0)
    kx, kp = jax.random.split(key)
    x = jax.random.normal(kx, (B, S, D), jnp.float32)
    params = init_params(kp, D, hidden, kernel_size, filter_num)

    out = jax.jit(adaptive_conv1d_forward)(x, params)
    out = jax.block_until_ready(out)
    assert out.shape == (B, S - kernel_size + 1, filter_num), out.shape

    ref = reference_forward(x, params)
    err = float(jnp.max(jnp.abs(out - ref)))
    assert err < 1e-2, f"max abs error {err}"
    print("KERNEL_OK")
</pallas_src>

<mosaic_0001>
module attributes {stable_mosaic.version = 11 : i64} {
  func.func @_attn_filtergen_kernel(%arg0: i32, %arg1: memref<1x8x256xf32, #tpu.memory_space<vmem>>, %arg2: memref<1x256xf32, #tpu.memory_space<vmem>>, %arg3: memref<256x2048xf32, #tpu.memory_space<vmem>>, %arg4: memref<1x1x2048xf32, #tpu.memory_space<vmem>>) attributes {dimension_semantics = [#tpu.dimension_semantics<parallel>], iteration_bounds = array<i64: 2>, scalar_prefetch = 0 : i64, scratch_operands = 0 : i64, tpu.core_type = #tpu.core_type<tc>, window_params = [{transform_indices = @transform_0, window_bounds = array<i64: 1, 8, 256>}, {pipeline_mode = #tpu.pipeline_mode<synchronous>, transform_indices = @transform_1, window_bounds = array<i64: 1, 256>}, {pipeline_mode = #tpu.pipeline_mode<synchronous>, transform_indices = @transform_2, window_bounds = array<i64: 256, 2048>}, {transform_indices = @transform_3, window_bounds = array<i64: 1, 1, 2048>}]} {
    %c0 = arith.constant 0 : index
    %c0_0 = arith.constant 0 : index
    %c0_1 = arith.constant 0 : index
    %0 = vector.load %arg1[%c0, %c0_0, %c0_1] : memref<1x8x256xf32, #tpu.memory_space<vmem>>, vector<1x8x256xf32>
    %1 = vector.shape_cast %0 : vector<1x8x256xf32> to vector<8x256xf32>
    %c0_2 = arith.constant 0 : index
    %c0_3 = arith.constant 0 : index
    %2 = vector.load %arg2[%c0_2, %c0_3] : memref<1x256xf32, #tpu.memory_space<vmem>>, vector<1x256xf32>
    %3 = vector.broadcast %2 : vector<1x256xf32> to vector<8x256xf32>
    %4 = arith.mulf %1, %3 : vector<8x256xf32>
    %cst = arith.constant dense<0.000000e+00> : vector<8xf32>
    %5 = vector.multi_reduction <add>, %4, %cst [1] : vector<8x256xf32> to vector<8xf32>
    %6 = vector.shape_cast %5 : vector<8xf32> to vector<8x1xf32>
    %cst_4 = arith.constant dense<0xFF800000> : vector<1xf32>
    %7 = vector.multi_reduction <maximumf>, %6, %cst_4 [0] : vector<8x1xf32> to vector<1xf32>
    %8 = vector.shape_cast %7 : vector<1xf32> to vector<1x1xf32>
    %9 = vector.broadcast %8 : vector<1x1xf32> to vector<8x1xf32>
    %10 = arith.subf %6, %9 : vector<8x1xf32>
    %11 = math.exp %10 : vector<8x1xf32>
    %cst_5 = arith.constant dense<0.000000e+00> : vector<1xf32>
    %12 = vector.multi_reduction <add>, %11, %cst_5 [0] : vector<8x1xf32> to vector<1xf32>
    %13 = vector.shape_cast %12 : vector<1xf32> to vector<1x1xf32>
    %14 = vector.broadcast %13 : vector<1x1xf32> to vector<8x1xf32>
    %15 = arith.divf %11, %14 : vector<8x1xf32>
    %16 = vector.broadcast %15 : vector<8x1xf32> to vector<8x256xf32>
    %17 = arith.mulf %1, %16 : vector<8x256xf32>
    %cst_6 = arith.constant dense<0.000000e+00> : vector<256xf32>
    %18 = vector.multi_reduction <add>, %17, %cst_6 [0] : vector<8x256xf32> to vector<256xf32>
    %19 = vector.shape_cast %18 : vector<256xf32> to vector<1x256xf32>
    %20 = arith.truncf %19 : vector<1x256xf32> to vector<1x256xbf16>
    %c0_7 = arith.constant 0 : index
    %c0_8 = arith.constant 0 : index
    %21 = vector.load %arg3[%c0_7, %c0_8] : memref<256x2048xf32, #tpu.memory_space<vmem>>, vector<256x2048xf32>
    %22 = arith.truncf %21 : vector<256x2048xf32> to vector<256x2048xbf16>
    %cst_9 = arith.constant dense<0.000000e+00> : vector<1x2048xf32>
    %23 = tpu.matmul %20, %22, %cst_9 {dimension_numbers = #tpu.dot_dimension_numbers<[1], [0], [0], [1], [0, 0, 1, 1], [], []>} : vector<1x256xbf16>, vector<256x2048xbf16>, vector<1x2048xf32> -> vector<1x2048xf32>
    %c0_10 = arith.constant 0 : index
    %c0_11 = arith.constant 0 : index
    %c0_12 = arith.constant 0 : index
    %24 = vector.load %arg4[%c0_10, %c0_11, %c0_12] : memref<1x1x2048xf32, #tpu.memory_space<vmem>>, vector<1x1x2048xf32>
    %25 = vector.shape_cast %24 : vector<1x1x2048xf32> to vector<1x2048xf32>
    %26 = vector.shape_cast %23 : vector<1x2048xf32> to vector<1x1x2048xf32>
    tpu.vector_store %arg4[%c0_10, %c0_11, %c0_12], %26 {strides = array<i32>} : memref<1x1x2048xf32, #tpu.memory_space<vmem>>, vector<1x1x2048xf32>,
    return
  }
  func.func @transform_0(%arg0: i32) -> (i32, i32, i32) {
    %c0_i32 = arith.constant 0 : i32
    %c0_i32_0 = arith.constant 0 : i32
    %c0_i32_1 = arith.constant 0 : i32
    return %arg0, %c0_i32, %c0_i32_0 : i32, i32, i32
  }
  func.func @transform_1(%arg0: i32) -> (i32, i32) {
    %c0_i32 = arith.constant 0 : i32
    %c0_i32_0 = arith.constant 0 : i32
    %c0_i32_1 = arith.constant 0 : i32
    return %c0_i32, %c0_i32_0 : i32, i32
  }
  func.func @transform_2(%arg0: i32) -> (i32, i32) {
    %c0_i32 = arith.constant 0 : i32
    %c0_i32_0 = arith.constant 0 : i32
    %c0_i32_1 = arith.constant 0 : i32
    return %c0_i32, %c0_i32_0 : i32, i32
  }
  func.func @transform_3(%arg0: i32) -> (i32, i32, i32) {
    %c0_i32 = arith.constant 0 : i32
    %c0_i32_0 = arith.constant 0 : i32
    %c0_i32_1 = arith.constant 0 : i32
    return %arg0, %c0_i32, %c0_i32_0 : i32, i32, i32
  }
}

module attributes {stable_mosaic.version = 11 : i64} {
  func.func @_bigru_kernel(%arg0: i32, %arg1: memref<2x8x32xf32, #tpu.memory_space<vmem>>, %arg2: memref<1x32x384xf32, #tpu.memory_space<vmem>>, %arg3: memref<1x128x384xf32, #tpu.memory_space<vmem>>, %arg4: memref<1x1x384xf32, #tpu.memory_space<vmem>>, %arg5: memref<1x1x384xf32, #tpu.memory_space<vmem>>, %arg6: memref<2x8x128xf32, #tpu.memory_space<vmem>>, %arg7: memref<16x384xf32, #tpu.memory_space<vmem>>) attributes {dimension_semantics = [#tpu.dimension_semantics<parallel>], iteration_bounds = array<i64: 2>, scalar_prefetch = 0 : i64, scratch_operands = 1 : i64, tpu.core_type = #tpu.core_type<tc>, window_params = [{pipeline_mode = #tpu.pipeline_mode<synchronous>, transform_indices = @transform_0, window_bounds = array<i64: 2, 8, 32>}, {transform_indices = @transform_1, window_bounds = array<i64: 1, 32, 384>}, {transform_indices = @transform_2, window_bounds = array<i64: 1, 128, 384>}, {transform_indices = @transform_3, window_bounds = array<i64: 1, 1, 384>}, {transform_indices = @transform_4, window_bounds = array<i64: 1, 1, 384>}, {transform_indices = @transform_5, window_bounds = array<i64: 2, 8, 128>}]} {
    %c0 = arith.constant 0 : index
    %c0_0 = arith.constant 0 : index
    %c0_1 = arith.constant 0 : index
    %0 = vector.load %arg1[%c0, %c0_0, %c0_1] : memref<2x8x32xf32, #tpu.memory_space<vmem>>, vector<2x8x32xf32>
    %1 = vector.shape_cast %0 : vector<2x8x32xf32> to vector<16x32xf32>
    %2 = arith.truncf %1 : vector<16x32xf32> to vector<16x32xbf16>
    %c0_2 = arith.constant 0 : index
    %c0_3 = arith.constant 0 : index
    %c0_4 = arith.constant 0 : index
    %3 = vector.load %arg2[%c0_2, %c0_3, %c0_4] : memref<1x32x384xf32, #tpu.memory_space<vmem>>, vector<1x32x384xf32>
    %4 = vector.shape_cast %3 : vector<1x32x384xf32> to vector<32x384xf32>
    %5 = arith.truncf %4 : vector<32x384xf32> to vector<32x384xbf16>
    %cst = arith.constant dense<0.000000e+00> : vector<16x384xf32>
    %6 = tpu.matmul %2, %5, %cst {dimension_numbers = #tpu.dot_dimension_numbers<[1], [0], [0], [1], [0, 0, 1, 1], [], []>} : vector<16x32xbf16>, vector<32x384xbf16>, vector<16x384xf32> -> vector<16x384xf32>
    %c0_5 = arith.constant 0 : index
    %c0_6 = arith.constant 0 : index
    %c0_7 = arith.constant 0 : index
    %7 = vector.load %arg4[%c0_5, %c0_6, %c0_7] : memref<1x1x384xf32, #tpu.memory_space<vmem>>, vector<1x1x384xf32>
    %8 = vector.shape_cast %7 : vector<1x1x384xf32> to vector<1x384xf32>
    %9 = vector.broadcast %8 : vector<1x384xf32> to vector<16x384xf32>
    %10 = arith.addf %6, %9 : vector<16x384xf32>
    %c0_8 = arith.constant 0 : index
    %c0_9 = arith.constant 0 : index
    %11 = vector.load %arg7[%c0_8, %c0_9] : memref<16x384xf32, #tpu.memory_space<vmem>>, vector<16x384xf32>
    tpu.vector_store %arg7[%c0_8, %c0_9], %10 {strides = array<i32>} : memref<16x384xf32, #tpu.memory_space<vmem>>, vector<16x384xf32>,
    %c0_10 = arith.constant 0 : index
    %c0_11 = arith.constant 0 : index
    %c0_12 = arith.constant 0 : index
    %12 = vector.load %arg3[%c0_10, %c0_11, %c0_12] : memref<1x128x384xf32, #tpu.memory_space<vmem>>, vector<1x128x384xf32>
    %13 = vector.shape_cast %12 : vector<1x128x384xf32> to vector<128x384xf32>
    %14 = arith.truncf %13 : vector<128x384xf32> to vector<128x384xbf16>
    %c0_13 = arith.constant 0 : index
    %c0_14 = arith.constant 0 : index
    %c0_15 = arith.constant 0 : index
    %15 = vector.load %arg5[%c0_13, %c0_14, %c0_15] : memref<1x1x384xf32, #tpu.memory_space<vmem>>, vector<1x1x384xf32>
    %16 = vector.shape_cast %15 : vector<1x1x384xf32> to vector<1x384xf32>
    %cst_16 = arith.constant 0.000000e+00 : f32
    %17 = vector.broadcast %cst_16 : f32 to vector<2x128xf32>
    %c0_i32 = arith.constant 0 : i32
    %c0_i32_17 = arith.constant 0 : i32
    %18 = arith.cmpi eq, %arg0, %c0_i32_17 : i32
    %c7_i32 = arith.constant 7 : i32
    %19 = arith.subi %c7_i32, %c0_i32 : i32
    %20 = arith.select %18, %c0_i32, %19 : i32
    %c0_i32_18 = arith.constant 0 : i32
    %21 = arith.addi %c0_i32_18, %20 : i32
    %22 = arith.index_cast %21 : i32 to index
    %c0_19 = arith.constant 0 : index
    %23 = vector.load %arg7[%22, %c0_19] : memref<16x384xf32, #tpu.memory_space<vmem>>, vector<1x384xf32>
    %c8_i32 = arith.constant 8 : i32
    %24 = arith.addi %c8_i32, %20 : i32
    %25 = arith.index_cast %24 : i32 to index
    %c0_20 = arith.constant 0 : index
    %26 = vector.load %arg7[%25, %c0_20] : memref<16x384xf32, #tpu.memory_space<vmem>>, vector<1x384xf32>
    %27 = tpu.concatenate %23, %26 in 0 : vector<1x384xf32>, vector<1x384xf32> -> vector<2x384xf32>
    %28 = arith.truncf %17 : vector<2x128xf32> to vector<2x128xbf16>
    %cst_21 = arith.constant dense<0.000000e+00> : vector<2x384xf32>
    %29 = tpu.matmul %28, %14, %cst_21 {dimension_numbers = #tpu.dot_dimension_numbers<[1], [0], [0], [1], [0, 0, 1, 1], [], []>} : vector<2x128xbf16>, vector<128x384xbf16>, vector<2x384xf32> -> vector<2x384xf32>
    %30 = vector.broadcast %16 : vector<1x384xf32> to vector<2x384xf32>
    %31 = arith.addf %29, %30 : vector<2x384xf32>
    %32 = vector.extract_strided_slice %27 {offsets = [0, 0], sizes = [2, 128], strides = [1, 1]} : vector<2x384xf32> to vector<2x128xf32>
    %33 = vector.extract_strided_slice %31 {offsets = [0, 0], sizes = [2, 128], strides = [1, 1]} : vector<2x384xf32> to vector<2x128xf32>
    %34 = arith.addf %32, %33 : vector<2x128xf32>
    %35 = arith.negf %34 : vector<2x128xf32>
    %36 = math.exp %35 : vector<2x128xf32>
    %cst_22 = arith.constant 1.000000e+00 : f32
    %37 = vector.broadcast %cst_22 : f32 to vector<2x128xf32>
    %38 = arith.addf %37, %36 : vector<2x128xf32>
    %39 = arith.divf %37, %38 : vector<2x128xf32>
    %40 = vector.extract_strided_slice %27 {offsets = [0, 128], sizes = [2, 128], strides = [1, 1]} : vector<2x384xf32> to vector<2x128xf32>
    %41 = vector.extract_strided_slice %31 {offsets = [0, 128], sizes = [2, 128], strides = [1, 1]} : vector<2x384xf32> to vector<2x128xf32>
    %42 = arith.addf %40, %41 : vector<2x128xf32>
    %43 = arith.negf %42 : vector<2x128xf32>
    %44 = math.exp %43 : vector<2x128xf32>
    %cst_23 = arith.constant 1.000000e+00 : f32
    %45 = vector.broadcast %cst_23 : f32 to vector<2x128xf32>
    %46 = arith.addf %45, %44 : vector<2x128xf32>
    %47 = arith.divf %45, %46 : vector<2x128xf32>
    %48 = vector.extract_strided_slice %27 {offsets = [0, 256], sizes = [2, 128], strides = [1, 1]} : vector<2x384xf32> to vector<2x128xf32>
    %49 = vector.extract_strided_slice %31 {offsets = [0, 256], sizes = [2, 128], strides = [1, 1]} : vector<2x384xf32> to vector<2x128xf32>
    %50 = arith.mulf %39, %49 : vector<2x128xf32>
    %51 = arith.addf %48, %50 : vector<2x128xf32>
    %52 = math.tanh %51 : vector<2x128xf32>
    %cst_24 = arith.constant 1.000000e+00 : f32
    %53 = vector.broadcast %cst_24 : f32 to vector<2x128xf32>
    %54 = arith.subf %53, %47 : vector<2x128xf32>
    %55 = arith.mulf %54, %52 : vector<2x128xf32>
    %56 = arith.mulf %47, %17 : vector<2x128xf32>
    %57 = arith.addf %55, %56 : vector<2x128xf32>
    %58 = vector.extract_strided_slice %57 {offsets = [0, 0], sizes = [1, 128], strides = [1, 1]} : vector<2x128xf32> to vector<1x128xf32>
    %c0_25 = arith.constant 0 : index
    %59 = arith.index_cast %20 : i32 to index
    %c0_26 = arith.constant 0 : index
    %60 = vector.load %arg6[%c0_25, %59, %c0_26] : memref<2x8x128xf32, #tpu.memory_space<vmem>>, vector<1x1x128xf32>
    %61 = vector.shape_cast %60 : vector<1x1x128xf32> to vector<1x128xf32>
    %62 = vector.shape_cast %58 : vector<1x128xf32> to vector<1x1x128xf32>
    tpu.vector_store %arg6[%c0_25, %59, %c0_26], %62 {strides = array<i32>} : memref<2x8x128xf32, #tpu.memory_space<vmem>>, vector<1x1x128xf32>,
    %63 = vector.extract_strided_slice %57 {offsets = [1, 0], sizes = [1, 128], strides = [1, 1]} : vector<2x128xf32> to vector<1x128xf32>
    %c1 = arith.constant 1 : index
    %64 = arith.index_cast %20 : i32 to index
    %c0_27 = arith.constant 0 : index
    %65 = vector.load %arg6[%c1, %64, %c0_27] : memref<2x8x128xf32, #tpu.memory_space<vmem>>, vector<1x1x128xf32>
    %66 = vector.shape_cast %65 : vector<1x1x128xf32> to vector<1x128xf32>
    %67 = vector.shape_cast %63 : vector<1x128xf32> to vector<1x1x128xf32>
    tpu.vector_store %arg6[%c1, %64, %c0_27], %67 {strides = array<i32>} : memref<2x8x128xf32, #tpu.memory_space<vmem>>, vector<1x1x128xf32>,
    %c1_i32 = arith.constant 1 : i32
    %c0_i32_28 = arith.constant 0 : i32
    %68 = arith.cmpi eq, %arg0, %c0_i32_28 : i32
    %c7_i32_29 = arith.constant 7 : i32
    %69 = arith.subi %c7_i32_29, %c1_i32 : i32
    %70 = arith.select %68, %c1_i32, %69 : i32
    %c0_i32_30 = arith.constant 0 : i32
    %71 = arith.addi %c0_i32_30, %70 : i32
    %72 = arith.index_cast %71 : i32 to index
    %c0_31 = arith.constant 0 : index
    %73 = vector.load %arg7[%72, %c0_31] : memref<16x384xf32, #tpu.memory_space<vmem>>, vector<1x384xf32>
    %c8_i32_32 = arith.constant 8 : i32
    %74 = arith.addi %c8_i32_32, %70 : i32
    %75 = arith.index_cast %74 : i32 to index
    %c0_33 = arith.constant 0 : index
    %76 = vector.load %arg7[%75, %c0_33] : memref<16x384xf32, #tpu.memory_space<vmem>>, vector<1x384xf32>
    %77 = tpu.concatenate %73, %76 in 0 : vector<1x384xf32>, vector<1x384xf32> -> vector<2x384xf32>
    %78 = arith.truncf %57 : vector<2x128xf32> to vector<2x128xbf16>
    %cst_34 = arith.constant dense<0.000000e+00> : vector<2x384xf32>
    %79 = tpu.matmul %78, %14, %cst_34 {dimension_numbers = #tpu.dot_dimension_numbers<[1], [0], [0], [1], [0, 0, 1, 1], [], []>} : vector<2x128xbf16>, vector<128x384xbf16>, vector<2x384xf32> -> vector<2x384xf32>
    %80 = vector.broadcast %16 : vector<1x384xf32> to vector<2x384xf32>
    %81 = arith.addf %79, %80 : vector<2x384xf32>
    %82 = vector.extract_strided_slice %77 {offsets = [0, 0], sizes = [2, 128], strides = [1, 1]} : vector<2x384xf32> to vector<2x128xf32>
    %83 = vector.extract_strided_slice %81 {offsets = [0, 0], sizes = [2, 128], strides = [1, 1]} : vector<2x384xf32> to vector<2x128xf32>
    %84 = arith.addf %82, %83 : vector<2x128xf32>
    %85 = arith.negf %84 : vector<2x128xf32>
    %86 = math.exp %85 : vector<2x128xf32>
    %cst_35 = arith.constant 1.000000e+00 : f32
    %87 = vector.broadcast %cst_35 : f32 to vector<2x128xf32>
    %88 = arith.addf %87, %86 : vector<2x128xf32>
    %89 = arith.divf %87, %88 : vector<2x128xf32>
    %90 = vector.extract_strided_slice %77 {offsets = [0, 128], sizes = [2, 128], strides = [1, 1]} : vector<2x384xf32> to vector<2x128xf32>
    %91 = vector.extract_strided_slice %81 {offsets = [0, 128], sizes = [2, 128], strides = [1, 1]} : vector<2x384xf32> to vector<2x128xf32>
    %92 = arith.addf %90, %91 : vector<2x128xf32>
    %93 = arith.negf %92 : vector<2x128xf32>
    %94 = math.exp %93 : vector<2x128xf32>
    %cst_36 = arith.constant 1.000000e+00 : f32
    %95 = vector.broadcast %cst_36 : f32 to vector<2x128xf32>
    %96 = arith.addf %95, %94 : vector<2x128xf32>
    %97 = arith.divf %95, %96 : vector<2x128xf32>
    %98 = vector.extract_strided_slice %77 {offsets = [0, 256], sizes = [2, 128], strides = [1, 1]} : vector<2x384xf32> to vector<2x128xf32>
    %99 = vector.extract_strided_slice %81 {offsets = [0, 256], sizes = [2, 128], strides = [1, 1]} : vector<2x384xf32> to vector<2x128xf32>
    %100 = arith.mulf %89, %99 : vector<2x128xf32>
    %101 = arith.addf %98, %100 : vector<2x128xf32>
    %102 = math.tanh %101 : vector<2x128xf32>
    %cst_37 = arith.constant 1.000000e+00 : f32
    %103 = vector.broadcast %cst_37 : f32 to vector<2x128xf32>
    %104 = arith.subf %103, %97 : vector<2x128xf32>
    %105 = arith.mulf %104, %102 : vector<2x128xf32>
    %106 = arith.mulf %97, %57 : vector<2x128xf32>
    %107 = arith.addf %105, %106 : vector<2x128xf32>
    %108 = vector.extract_strided_slice %107 {offsets = [0, 0], sizes = [1, 128], strides = [1, 1]} : vector<2x128xf32> to vector<1x128xf32>
    %c0_38 = arith.constant 0 : index
    %109 = arith.index_cast %70 : i32 to index
    %c0_39 = arith.constant 0 : index
    %110 = vector.load %arg6[%c0_38, %109, %c0_39] : memref<2x8x128xf32, #tpu.memory_space<vmem>>, vector<1x1x128xf32>
    %111 = vector.shape_cast %110 : vector<1x1x128xf32> to vector<1x128xf32>
    %112 = vector.shape_cast %108 : vector<1x128xf32> to vector<1x1x128xf32>
    tpu.vector_store %arg6[%c0_38, %109, %c0_39], %112 {strides = array<i32>} : memref<2x8x128xf32, #tpu.memory_space<vmem>>, vector<1x1x128xf32>,
    %113 = vector.extract_strided_slice %107 {offsets = [1, 0], sizes = [1, 128], strides = [1, 1]} : vector<2x128xf32> to vector<1x128xf32>
    %c1_40 = arith.constant 1 : index
    %114 = arith.index_cast %70 : i32 to index
    %c0_41 = arith.constant 0 : index
    %115 = vector.load %arg6[%c1_40, %114, %c0_41] : memref<2x8x128xf32, #tpu.memory_space<vmem>>, vector<1x1x128xf32>
    %116 = vector.shape_cast %115 : vector<1x1x128xf32> to vector<1x128xf32>
    %117 = vector.shape_cast %113 : vector<1x128xf32> to vector<1x1x128xf32>
    tpu.vector_store %arg6[%c1_40, %114, %c0_41], %117 {strides = array<i32>} : memref<2x8x128xf32, #tpu.memory_space<vmem>>, vector<1x1x128xf32>,
    %c2_i32 = arith.constant 2 : i32
    %c0_i32_42 = arith.constant 0 : i32
    %118 = arith.cmpi eq, %arg0, %c0_i32_42 : i32
    %c7_i32_43 = arith.constant 7 : i32
    %119 = arith.subi %c7_i32_43, %c2_i32 : i32
    %120 = arith.select %118, %c2_i32, %119 : i32
    %c0_i32_44 = arith.constant 0 : i32
    %121 = arith.addi %c0_i32_44, %120 : i32
    %122 = arith.index_cast %121 : i32 to index
    %c0_45 = arith.constant 0 : index
    %123 = vector.load %arg7[%122, %c0_45] : memref<16x384xf32, #tpu.memory_space<vmem>>, vector<1x384xf32>
    %c8_i32_46 = arith.constant 8 : i32
    %124 = arith.addi %c8_i32_46, %120 : i32
    %125 = arith.index_cast %124 : i32 to index
    %c0_47 = arith.constant 0 : index
    %126 = vector.load %arg7[%125, %c0_47] : memref<16x384xf32, #tpu.memory_space<vmem>>, vector<1x384xf32>
    %127 = tpu.concatenate %123, %126 in 0 : vector<1x384xf32>, vector<1x384xf32> -> vector<2x384xf32>
    %128 = arith.truncf %107 : vector<2x128xf32> to vector<2x128xbf16>
    %cst_48 = arith.constant dense<0.000000e+00> : vector<2x384xf32>
    %129 = tpu.matmul %128, %14, %cst_48 {dimension_numbers = #tpu.dot_dimension_numbers<[1], [0], [0], [1], [0, 0, 1, 1], [], []>} : vector<2x128xbf16>, vector<128x384xbf16>, vector<2x384xf32> -> vector<2x384xf32>
    %130 = vector.broadcast %16 : vector<1x384xf32> to vector<2x384xf32>
    %131 = arith.addf %129, %130 : vector<2x384xf32>
    %132 = vector.extract_strided_slice %127 {offsets = [0, 0], sizes = [2, 128], strides = [1, 1]} : vector<2x384xf32> to vector<2x128xf32>
    %133 = vector.extract_strided_slice %131 {offsets = [0, 0], sizes = [2, 128], strides = [1, 1]} : vector<2x384xf32> to vector<2x128xf32>
    %134 = arith.addf %132, %133 : vector<2x128xf32>
    %135 = arith.negf %134 : vector<2x128xf32>
    %136 = math.exp %135 : vector<2x128xf32>
    %cst_49 = arith.constant 1.000000e+00 : f32
    %137 = vector.broadcast %cst_49 : f32 to vector<2x128xf32>
    %138 = arith.addf %137, %136 : vector<2x128xf32>
    %139 = arith.divf %137, %138 : vector<2x128xf32>
    %140 = vector.extract_strided_slice %127 {offsets = [0, 128], sizes = [2, 128], strides = [1, 1]} : vector<2x384xf32> to vector<2x128xf32>
    %141 = vector.extract_strided_slice %131 {offsets = [0, 128], sizes = [2, 128], strides = [1, 1]} : vector<2x384xf32> to vector<2x128xf32>
    %142 = arith.addf %140, %141 : vector<2x128xf32>
    %143 = arith.negf %142 : vector<2x128xf32>
    %144 = math.exp %143 : vector<2x128xf32>
    %cst_50 = arith.constant 1.000000e+00 : f32
    %145 = vector.broadcast %cst_50 : f32 to vector<2x128xf32>
    %146 = arith.addf %145, %144 : vector<2x128xf32>
    %147 = arith.divf %145, %146 : vector<2x128xf32>
    %148 = vector.extract_strided_slice %127 {offsets = [0, 256], sizes = [2, 128], strides = [1, 1]} : vector<2x384xf32> to vector<2x128xf32>
    %149 = vector.extract_strided_slice %131 {offsets = [0, 256], sizes = [2, 128], strides = [1, 1]} : vector<2x384xf32> to vector<2x128xf32>
    %150 = arith.mulf %139, %149 : vector<2x128xf32>
    %151 = arith.addf %148, %150 : vector<2x128xf32>
    %152 = math.tanh %151 : vector<2x128xf32>
    %cst_51 = arith.constant 1.000000e+00 : f32
    %153 = vector.broadcast %cst_51 : f32 to vector<2x128xf32>
    %154 = arith.subf %153, %147 : vector<2x128xf32>
    %155 = arith.mulf %154, %152 : vector<2x128xf32>
    %156 = arith.mulf %147, %107 : vector<2x128xf32>
    %157 = arith.addf %155, %156 : vector<2x128xf32>
    %158 = vector.extract_strided_slice %157 {offsets = [0, 0], sizes = [1, 128], strides = [1, 1]} : vector<2x128xf32> to vector<1x128xf32>
    %c0_52 = arith.constant 0 : index
    %159 = arith.index_cast %120 : i32 to index
    %c0_53 = arith.constant 0 : index
    %160 = vector.load %arg6[%c0_52, %159, %c0_53] : memref<2x8x128xf32, #tpu.memory_space<vmem>>, vector<1x1x128xf32>
    %161 = vector.shape_cast %160 : vector<1x1x128xf32> to vector<1x128xf32>
    %162 = vector.shape_cast %158 : vector<1x128xf32> to vector<1x1x128xf32>
    tpu.vector_store %arg6[%c0_52, %159, %c0_53], %162 {strides = array<i32>} : memref<2x8x128xf32, #tpu.memory_space<vmem>>, vector<1x1x128xf32>,
    %163 = vector.extract_strided_slice %157 {offsets = [1, 0], sizes = [1, 128], strides = [1, 1]} : vector<2x128xf32> to vector<1x128xf32>
    %c1_54 = arith.constant 1 : index
    %164 = arith.index_cast %120 : i32 to index
    %c0_55 = arith.constant 0 : index
    %165 = vector.load %arg6[%c1_54, %164, %c0_55] : memref<2x8x128xf32, #tpu.memory_space<vmem>>, vector<1x1x128xf32>
    %166 = vector.shape_cast %165 : vector<1x1x128xf32> to vector<1x128xf32>
    %167 = vector.shape_cast %163 : vector<1x128xf32> to vector<1x1x128xf32>
    tpu.vector_store %arg6[%c1_54, %164, %c0_55], %167 {strides = array<i32>} : memref<2x8x128xf32, #tpu.memory_space<vmem>>, vector<1x1x128xf32>,
    %c3_i32 = arith.constant 3 : i32
    %c0_i32_56 = arith.constant 0 : i32
    %168 = arith.cmpi eq, %arg0, %c0_i32_56 : i32
    %c7_i32_57 = arith.constant 7 : i32
    %169 = arith.subi %c7_i32_57, %c3_i32 : i32
    %170 = arith.select %168, %c3_i32, %169 : i32
    %c0_i32_58 = arith.constant 0 : i32
    %171 = arith.addi %c0_i32_58, %170 : i32
    %172 = arith.index_cast %171 : i32 to index
    %c0_59 = arith.constant 0 : index
    %173 = vector.load %arg7[%172, %c0_59] : memref<16x384xf32, #tpu.memory_space<vmem>>, vector<1x384xf32>
    %c8_i32_60 = arith.constant 8 : i32
    %174 = arith.addi %c8_i32_60, %170 : i32
    %175 = arith.index_cast %174 : i32 to index
    %c0_61 = arith.constant 0 : index
    %176 = vector.load %arg7[%175, %c0_61] : memref<16x384xf32, #tpu.memory_space<vmem>>, vector<1x384xf32>
    %177 = tpu.concatenate %173, %176 in 0 : vector<1x384xf32>, vector<1x384xf32> -> vector<2x384xf32>
    %178 = arith.truncf %157 : vector<2x128xf32> to vector<2x128xbf16>
    %cst_62 = arith.constant dense<0.000000e+00> : vector<2x384xf32>
    %179 = tpu.matmul %178, %14, %cst_62 {dimension_numbers = #tpu.dot_dimension_numbers<[1], [0], [0], [1], [0, 0, 1, 1], [], []>} : vector<2x128xbf16>, vector<128x384xbf16>, vector<2x384xf32> -> vector<2x384xf32>
    %180 = vector.broadcast %16 : vector<1x384xf32> to vector<2x384xf32>
    %181 = arith.addf %179, %180 : vector<2x384xf32>
    %182 = vector.extract_strided_slice %177 {offsets = [0, 0], sizes = [2, 128], strides = [1, 1]} : vector<2x384xf32> to vector<2x128xf32>
    %183 = vector.extract_strided_slice %181 {offsets = [0, 0], sizes = [2, 128], strides = [1, 1]} : vector<2x384xf32> to vector<2x128xf32>
    %184 = arith.addf %182, %183 : vector<2x128xf32>
    %185 = arith.negf %184 : vector<2x128xf32>
    %186 = math.exp %185 : vector<2x128xf32>
    %cst_63 = arith.constant 1.000000e+00 : f32
    %187 = vector.broadcast %cst_63 : f32 to vector<2x128xf32>
    %188 = arith.addf %187, %186 : vector<2x128xf32>
    %189 = arith.divf %187, %188 : vector<2x128xf32>
    %190 = vector.extract_strided_slice %177 {offsets = [0, 128], sizes = [2, 128], strides = [1, 1]} : vector<2x384xf32> to vector<2x128xf32>
    %191 = vector.extract_strided_slice %181 {offsets = [0, 128], sizes = [2, 128], strides = [1, 1]} : vector<2x384xf32> to vector<2x128xf32>
    %192 = arith.addf %190, %191 : vector<2x128xf32>
    %193 = arith.negf %192 : vector<2x128xf32>
    %194 = math.exp %193 : vector<2x128xf32>
    %cst_64 = arith.constant 1.000000e+00 : f32
    %195 = vector.broadcast %cst_64 : f32 to vector<2x128xf32>
    %196 = arith.addf %195, %194 : vector<2x128xf32>
    %197 = arith.divf %195, %196 : vector<2x128xf32>
    %198 = vector.extract_strided_slice %177 {offsets = [0, 256], sizes = [2, 128], strides = [1, 1]} : vector<2x384xf32> to vector<2x128xf32>
    %199 = vector.extract_strided_slice %181 {offsets = [0, 256], sizes = [2, 128], strides = [1, 1]} : vector<2x384xf32> to vector<2x128xf32>
    %200 = arith.mulf %189, %199 : vector<2x128xf32>
    %201 = arith.addf %198, %200 : vector<2x128xf32>
    %202 = math.tanh %201 : vector<2x128xf32>
    %cst_65 = arith.constant 1.000000e+00 : f32
    %203 = vector.broadcast %cst_65 : f32 to vector<2x128xf32>
    %204 = arith.subf %203, %197 : vector<2x128xf32>
    %205 = arith.mulf %204, %202 : vector<2x128xf32>
    %206 = arith.mulf %197, %157 : vector<2x128xf32>
    %207 = arith.addf %205, %206 : vector<2x128xf32>
    %208 = vector.extract_strided_slice %207 {offsets = [0, 0], sizes = [1, 128], strides = [1, 1]} : vector<2x128xf32> to vector<1x128xf32>
    %c0_66 = arith.constant 0 : index
    %209 = arith.index_cast %170 : i32 to index
    %c0_67 = arith.constant 0 : index
    %210 = vector.load %arg6[%c0_66, %209, %c0_67] : memref<2x8x128xf32, #tpu.memory_space<vmem>>, vector<1x1x128xf32>
    %211 = vector.shape_cast %210 : vector<1x1x128xf32> to vector<1x128xf32>
    %212 = vector.shape_cast %208 : vector<1x128xf32> to vector<1x1x128xf32>
    tpu.vector_store %arg6[%c0_66, %209, %c0_67], %212 {strides = array<i32>} : memref<2x8x128xf32, #tpu.memory_space<vmem>>, vector<1x1x128xf32>,
    %213 = vector.extract_strided_slice %207 {offsets = [1, 0], sizes = [1, 128], strides = [1, 1]} : vector<2x128xf32> to vector<1x128xf32>
    %c1_68 = arith.constant 1 : index
    %214 = arith.index_cast %170 : i32 to index
    %c0_69 = arith.constant 0 : index
    %215 = vector.load %arg6[%c1_68, %214, %c0_69] : memref<2x8x128xf32, #tpu.memory_space<vmem>>, vector<1x1x128xf32>
    %216 = vector.shape_cast %215 : vector<1x1x128xf32> to vector<1x128xf32>
    %217 = vector.shape_cast %213 : vector<1x128xf32> to vector<1x1x128xf32>
    tpu.vector_store %arg6[%c1_68, %214, %c0_69], %217 {strides = array<i32>} : memref<2x8x128xf32, #tpu.memory_space<vmem>>, vector<1x1x128xf32>,
    %c4_i32 = arith.constant 4 : i32
    %c0_i32_70 = arith.constant 0 : i32
    %218 = arith.cmpi eq, %arg0, %c0_i32_70 : i32
    %c7_i32_71 = arith.constant 7 : i32
    %219 = arith.subi %c7_i32_71, %c4_i32 : i32
    %220 = arith.select %218, %c4_i32, %219 : i32
    %c0_i32_72 = arith.constant 0 : i32
    %221 = arith.addi %c0_i32_72, %220 : i32
    %222 = arith.index_cast %221 : i32 to index
    %c0_73 = arith.constant 0 : index
    %223 = vector.load %arg7[%222, %c0_73] : memref<16x384xf32, #tpu.memory_space<vmem>>, vector<1x384xf32>
    %c8_i32_74 = arith.constant 8 : i32
    %224 = arith.addi %c8_i32_74, %220 : i32
    %225 = arith.index_cast %224 : i32 to index
    %c0_75 = arith.constant 0 : index
    %226 = vector.load %arg7[%225, %c0_75] : memref<16x384xf32, #tpu.memory_space<vmem>>, vector<1x384xf32>
    %227 = tpu.concatenate %223, %226 in 0 : vector<1x384xf32>, vector<1x384xf32> -> vector<2x384xf32>
    %228 = arith.truncf %207 : vector<2x128xf32> to vector<2x128xbf16>
    %cst_76 = arith.constant dense<0.000000e+00> : vector<2x384xf32>
    %229 = tpu.matmul %228, %14, %cst_76 {dimension_numbers = #tpu.dot_dimension_numbers<[1], [0], [0], [1], [0, 0, 1, 1], [], []>} : vector<2x128xbf16>, vector<128x384xbf16>, vector<2x384xf32> -> vector<2x384xf32>
    %230 = vector.broadcast %16 : vector<1x384xf32> to vector<2x384xf32>
    %231 = arith.addf %229, %230 : vector<2x384xf32>
    %232 = vector.extract_strided_slice %227 {offsets = [0, 0], sizes = [2, 128], strides = [1, 1]} : vector<2x384xf32> to vector<2x128xf32>
    %233 = vector.extract_strided_slice %231 {offsets = [0, 0], sizes = [2, 128], strides = [1, 1]} : vector<2x384xf32> to vector<2x128xf32>
    %234 = arith.addf %232, %233 : vector<2x128xf32>
    %235 = arith.negf %234 : vector<2x128xf32>
    %236 = math.exp %235 : vector<2x128xf32>
    %cst_77 = arith.constant 1.000000e+00 : f32
    %237 = vector.broadcast %cst_77 : f32 to vector<2x128xf32>
    %238 = arith.addf %237, %236 : vector<2x128xf32>
    %239 = arith.divf %237, %238 : vector<2x128xf32>
    %240 = vector.extract_strided_slice %227 {offsets = [0, 128], sizes = [2, 128], strides = [1, 1]} : vector<2x384xf32> to vector<2x128xf32>
    %241 = vector.extract_strided_slice %231 {offsets = [0, 128], sizes = [2, 128], strides = [1, 1]} : vector<2x384xf32> to vector<2x128xf32>
    %242 = arith.addf %240, %241 : vector<2x128xf32>
    %243 = arith.negf %242 : vector<2x128xf32>
    %244 = math.exp %243 : vector<2x128xf32>
    %cst_78 = arith.constant 1.000000e+00 : f32
    %245 = vector.broadcast %cst_78 : f32 to vector<2x128xf32>
    %246 = arith.addf %245, %244 : vector<2x128xf32>
    %247 = arith.divf %245, %246 : vector<2x128xf32>
    %248 = vector.extract_strided_slice %227 {offsets = [0, 256], sizes = [2, 128], strides = [1, 1]} : vector<2x384xf32> to vector<2x128xf32>
    %249 = vector.extract_strided_slice %231 {offsets = [0, 256], sizes = [2, 128], strides = [1, 1]} : vector<2x384xf32> to vector<2x128xf32>
    %250 = arith.mulf %239, %249 : vector<2x128xf32>
    %251 = arith.addf %248, %250 : vector<2x128xf32>
    %252 = math.tanh %251 : vector<2x128xf32>
    %cst_79 = arith.constant 1.000000e+00 : f32
    %253 = vector.broadcast %cst_79 : f32 to vector<2x128xf32>
    %254 = arith.subf %253, %247 : vector<2x128xf32>
    %255 = arith.mulf %254, %252 : vector<2x128xf32>
    %256 = arith.mulf %247, %207 : vector<2x128xf32>
    %257 = arith.addf %255, %256 : vector<2x128xf32>
    %258 = vector.extract_strided_slice %257 {offsets = [0, 0], sizes = [1, 128], strides = [1, 1]} : vector<2x128xf32> to vector<1x128xf32>
    %c0_80 = arith.constant 0 : index
    %259 = arith.index_cast %220 : i32 to index
    %c0_81 = arith.constant 0 : index
    %260 = vector.load %arg6[%c0_80, %259, %c0_81] : memref<2x8x128xf32, #tpu.memory_space<vmem>>, vector<1x1x128xf32>
    %261 = vector.shape_cast %260 : vector<1x1x128xf32> to vector<1x128xf32>
    %262 = vector.shape_cast %258 : vector<1x128xf32> to vector<1x1x128xf32>
    tpu.vector_store %arg6[%c0_80, %259, %c0_81], %262 {strides = array<i32>} : memref<2x8x128xf32, #tpu.memory_space<vmem>>, vector<1x1x128xf32>,
    %263 = vector.extract_strided_slice %257 {offsets = [1, 0], sizes = [1, 128], strides = [1, 1]} : vector<2x128xf32> to vector<1x128xf32>
    %c1_82 = arith.constant 1 : index
    %264 = arith.index_cast %220 : i32 to index
    %c0_83 = arith.constant 0 : index
    %265 = vector.load %arg6[%c1_82, %264, %c0_83] : memref<2x8x128xf32, #tpu.memory_space<vmem>>, vector<1x1x128xf32>
    %266 = vector.shape_cast %265 : vector<1x1x128xf32> to vector<1x128xf32>
    %267 = vector.shape_cast %263 : vector<1x128xf32> to vector<1x1x128xf32>
    tpu.vector_store %arg6[%c1_82, %264, %c0_83], %267 {strides = array<i32>} : memref<2x8x128xf32, #tpu.memory_space<vmem>>, vector<1x1x128xf32>,
    %c5_i32 = arith.constant 5 : i32
    %c0_i32_84 = arith.constant 0 : i32
    %268 = arith.cmpi eq, %arg0, %c0_i32_84 : i32
    %c7_i32_85 = arith.constant 7 : i32
    %269 = arith.subi %c7_i32_85, %c5_i32 : i32
    %270 = arith.select %268, %c5_i32, %269 : i32
    %c0_i32_86 = arith.constant 0 : i32
    %271 = arith.addi %c0_i32_86, %270 : i32
    %272 = arith.index_cast %271 : i32 to index
    %c0_87 = arith.constant 0 : index
    %273 = vector.load %arg7[%272, %c0_87] : memref<16x384xf32, #tpu.memory_space<vmem>>, vector<1x384xf32>
    %c8_i32_88 = arith.constant 8 : i32
    %274 = arith.addi %c8_i32_88, %270 : i32
    %275 = arith.index_cast %274 : i32 to index
    %c0_89 = arith.constant 0 : index
    %276 = vector.load %arg7[%275, %c0_89] : memref<16x384xf32, #tpu.memory_space<vmem>>, vector<1x384xf32>
    %277 = tpu.concatenate %273, %276 in 0 : vector<1x384xf32>, vector<1x384xf32> -> vector<2x384xf32>
    %278 = arith.truncf %257 : vector<2x128xf32> to vector<2x128xbf16>
    %cst_90 = arith.constant dense<0.000000e+00> : vector<2x384xf32>
    %279 = tpu.matmul %278, %14, %cst_90 {dimension_numbers = #tpu.dot_dimension_numbers<[1], [0], [0], [1], [0, 0, 1, 1], [], []>} : vector<2x128xbf16>, vector<128x384xbf16>, vector<2x384xf32> -> vector<2x384xf32>
    %280 = vector.broadcast %16 : vector<1x384xf32> to vector<2x384xf32>
    %281 = arith.addf %279, %280 : vector<2x384xf32>
    %282 = vector.extract_strided_slice %277 {offsets = [0, 0], sizes = [2, 128], strides = [1, 1]} : vector<2x384xf32> to vector<2x128xf32>
    %283 = vector.extract_strided_slice %281 {offsets = [0, 0], sizes = [2, 128], strides = [1, 1]} : vector<2x384xf32> to vector<2x128xf32>
    %284 = arith.addf %282, %283 : vector<2x128xf32>
    %285 = arith.negf %284 : vector<2x128xf32>
    %286 = math.exp %285 : vector<2x128xf32>
    %cst_91 = arith.constant 1.000000e+00 : f32
    %287 = vector.broadcast %cst_91 : f32 to vector<2x128xf32>
    %288 = arith.addf %287, %286 : vector<2x128xf32>
    %289 = arith.divf %287, %288 : vector<2x128xf32>
    %290 = vector.extract_strided_slice %277 {offsets = [0, 128], sizes = [2, 128], strides = [1, 1]} : vector<2x384xf32> to vector<2x128xf32>
    %291 = vector.extract_strided_slice %281 {offsets = [0, 128], sizes = [2, 128], strides = [1, 1]} : vector<2x384xf32> to vector<2x128xf32>
    %292 = arith.addf %290, %291 : vector<2x128xf32>
    %293 = arith.negf %292 : vector<2x128xf32>
    %294 = math.exp %293 : vector<2x128xf32>
    %cst_92 = arith.constant 1.000000e+00 : f32
    %295 = vector.broadcast %cst_92 : f32 to vector<2x128xf32>
    %296 = arith.addf %295, %294 : vector<2x128xf32>
    %297 = arith.divf %295, %296 : vector<2x128xf32>
    %298 = vector.extract_strided_slice %277 {offsets = [0, 256], sizes = [2, 128], strides = [1, 1]} : vector<2x384xf32> to vector<2x128xf32>
    %299 = vector.extract_strided_slice %281 {offsets = [0, 256], sizes = [2, 128], strides = [1, 1]} : vector<2x384xf32> to vector<2x128xf32>
    %300 = arith.mulf %289, %299 : vector<2x128xf32>
    %301 = arith.addf %298, %300 : vector<2x128xf32>
    %302 = math.tanh %301 : vector<2x128xf32>
    %cst_93 = arith.constant 1.000000e+00 : f32
    %303 = vector.broadcast %cst_93 : f32 to vector<2x128xf32>
    %304 = arith.subf %303, %297 : vector<2x128xf32>
    %305 = arith.mulf %304, %302 : vector<2x128xf32>
    %306 = arith.mulf %297, %257 : vector<2x128xf32>
    %307 = arith.addf %305, %306 : vector<2x128xf32>
    %308 = vector.extract_strided_slice %307 {offsets = [0, 0], sizes = [1, 128], strides = [1, 1]} : vector<2x128xf32> to vector<1x128xf32>
    %c0_94 = arith.constant 0 : index
    %309 = arith.index_cast %270 : i32 to index
    %c0_95 = arith.constant 0 : index
    %310 = vector.load %arg6[%c0_94, %309, %c0_95] : memref<2x8x128xf32, #tpu.memory_space<vmem>>, vector<1x1x128xf32>
    %311 = vector.shape_cast %310 : vector<1x1x128xf32> to vector<1x128xf32>
    %312 = vector.shape_cast %308 : vector<1x128xf32> to vector<1x1x128xf32>
    tpu.vector_store %arg6[%c0_94, %309, %c0_95], %312 {strides = array<i32>} : memref<2x8x128xf32, #tpu.memory_space<vmem>>, vector<1x1x128xf32>,
    %313 = vector.extract_strided_slice %307 {offsets = [1, 0], sizes = [1, 128], strides = [1, 1]} : vector<2x128xf32> to vector<1x128xf32>
    %c1_96 = arith.constant 1 : index
    %314 = arith.index_cast %270 : i32 to index
    %c0_97 = arith.constant 0 : index
    %315 = vector.load %arg6[%c1_96, %314, %c0_97] : memref<2x8x128xf32, #tpu.memory_space<vmem>>, vector<1x1x128xf32>
    %316 = vector.shape_cast %315 : vector<1x1x128xf32> to vector<1x128xf32>
    %317 = vector.shape_cast %313 : vector<1x128xf32> to vector<1x1x128xf32>
    tpu.vector_store %arg6[%c1_96, %314, %c0_97], %317 {strides = array<i32>} : memref<2x8x128xf32, #tpu.memory_space<vmem>>, vector<1x1x128xf32>,
    %c6_i32 = arith.constant 6 : i32
    %c0_i32_98 = arith.constant 0 : i32
    %318 = arith.cmpi eq, %arg0, %c0_i32_98 : i32
    %c7_i32_99 = arith.constant 7 : i32
    %319 = arith.subi %c7_i32_99, %c6_i32 : i32
    %320 = arith.select %318, %c6_i32, %319 : i32
    %c0_i32_100 = arith.constant 0 : i32
    %321 = arith.addi %c0_i32_100, %320 : i32
    %322 = arith.index_cast %321 : i32 to index
    %c0_101 = arith.constant 0 : index
    %323 = vector.load %arg7[%322, %c0_101] : memref<16x384xf32, #tpu.memory_space<vmem>>, vector<1x384xf32>
    %c8_i32_102 = arith.constant 8 : i32
    %324 = arith.addi %c8_i32_102, %320 : i32
    %325 = arith.index_cast %324 : i32 to index
    %c0_103 = arith.constant 0 : index
    %326 = vector.load %arg7[%325, %c0_103] : memref<16x384xf32, #tpu.memory_space<vmem>>, vector<1x384xf32>
    %327 = tpu.concatenate %323, %326 in 0 : vector<1x384xf32>, vector<1x384xf32> -> vector<2x384xf32>
    %328 = arith.truncf %307 : vector<2x128xf32> to vector<2x128xbf16>
    %cst_104 = arith.constant dense<0.000000e+00> : vector<2x384xf32>
    %329 = tpu.matmul %328, %14, %cst_104 {dimension_numbers = #tpu.dot_dimension_numbers<[1], [0], [0], [1], [0, 0, 1, 1], [], []>} : vector<2x128xbf16>, vector<128x384xbf16>, vector<2x384xf32> -> vector<2x384xf32>
    %330 = vector.broadcast %16 : vector<1x384xf32> to vector<2x384xf32>
    %331 = arith.addf %329, %330 : vector<2x384xf32>
    %332 = vector.extract_strided_slice %327 {offsets = [0, 0], sizes = [2, 128], strides = [1, 1]} : vector<2x384xf32> to vector<2x128xf32>
    %333 = vector.extract_strided_slice %331 {offsets = [0, 0], sizes = [2, 128], strides = [1, 1]} : vector<2x384xf32> to vector<2x128xf32>
    %334 = arith.addf %332, %333 : vector<2x128xf32>
    %335 = arith.negf %334 : vector<2x128xf32>
    %336 = math.exp %335 : vector<2x128xf32>
    %cst_105 = arith.constant 1.000000e+00 : f32
    %337 = vector.broadcast %cst_105 : f32 to vector<2x128xf32>
    %338 = arith.addf %337, %336 : vector<2x128xf32>
    %339 = arith.divf %337, %338 : vector<2x128xf32>
    %340 = vector.extract_strided_slice %327 {offsets = [0, 128], sizes = [2, 128], strides = [1, 1]} : vector<2x384xf32> to vector<2x128xf32>
    %341 = vector.extract_strided_slice %331 {offsets = [0, 128], sizes = [2, 128], strides = [1, 1]} : vector<2x384xf32> to vector<2x128xf32>
    %342 = arith.addf %340, %341 : vector<2x128xf32>
    %343 = arith.negf %342 : vector<2x128xf32>
    %344 = math.exp %343 : vector<2x128xf32>
    %cst_106 = arith.constant 1.000000e+00 : f32
    %345 = vector.broadcast %cst_106 : f32 to vector<2x128xf32>
    %346 = arith.addf %345, %344 : vector<2x128xf32>
    %347 = arith.divf %345, %346 : vector<2x128xf32>
    %348 = vector.extract_strided_slice %327 {offsets = [0, 256], sizes = [2, 128], strides = [1, 1]} : vector<2x384xf32> to vector<2x128xf32>
    %349 = vector.extract_strided_slice %331 {offsets = [0, 256], sizes = [2, 128], strides = [1, 1]} : vector<2x384xf32> to vector<2x128xf32>
    %350 = arith.mulf %339, %349 : vector<2x128xf32>
    %351 = arith.addf %348, %350 : vector<2x128xf32>
    %352 = math.tanh %351 : vector<2x128xf32>
    %cst_107 = arith.constant 1.000000e+00 : f32
    %353 = vector.broadcast %cst_107 : f32 to vector<2x128xf32>
    %354 = arith.subf %353, %347 : vector<2x128xf32>
    %355 = arith.mulf %354, %352 : vector<2x128xf32>
    %356 = arith.mulf %347, %307 : vector<2x128xf32>
    %357 = arith.addf %355, %356 : vector<2x128xf32>
    %358 = vector.extract_strided_slice %357 {offsets = [0, 0], sizes = [1, 128], strides = [1, 1]} : vector<2x128xf32> to vector<1x128xf32>
    %c0_108 = arith.constant 0 : index
    %359 = arith.index_cast %320 : i32 to index
    %c0_109 = arith.constant 0 : index
    %360 = vector.load %arg6[%c0_108, %359, %c0_109] : memref<2x8x128xf32, #tpu.memory_space<vmem>>, vector<1x1x128xf32>
    %361 = vector.shape_cast %360 : vector<1x1x128xf32> to vector<1x128xf32>
    %362 = vector.shape_cast %358 : vector<1x128xf32> to vector<1x1x128xf32>
    tpu.vector_store %arg6[%c0_108, %359, %c0_109], %362 {strides = array<i32>} : memref<2x8x128xf32, #tpu.memory_space<vmem>>, vector<1x1x128xf32>,
    %363 = vector.extract_strided_slice %357 {offsets = [1, 0], sizes = [1, 128], strides = [1, 1]} : vector<2x128xf32> to vector<1x128xf32>
    %c1_110 = arith.constant 1 : index
    %364 = arith.index_cast %320 : i32 to index
    %c0_111 = arith.constant 0 : index
    %365 = vector.load %arg6[%c1_110, %364, %c0_111] : memref<2x8x128xf32, #tpu.memory_space<vmem>>, vector<1x1x128xf32>
    %366 = vector.shape_cast %365 : vector<1x1x128xf32> to vector<1x128xf32>
    %367 = vector.shape_cast %363 : vector<1x128xf32> to vector<1x1x128xf32>
    tpu.vector_store %arg6[%c1_110, %364, %c0_111], %367 {strides = array<i32>} : memref<2x8x128xf32, #tpu.memory_space<vmem>>, vector<1x1x128xf32>,
    %c7_i32_112 = arith.constant 7 : i32
    %c0_i32_113 = arith.constant 0 : i32
    %368 = arith.cmpi eq, %arg0, %c0_i32_113 : i32
    %c7_i32_114 = arith.constant 7 : i32
    %369 = arith.subi %c7_i32_114, %c7_i32_112 : i32
    %370 = arith.select %368, %c7_i32_112, %369 : i32
    %c0_i32_115 = arith.constant 0 : i32
    %371 = arith.addi %c0_i32_115, %370 : i32
    %372 = arith.index_cast %371 : i32 to index
    %c0_116 = arith.constant 0 : index
    %373 = vector.load %arg7[%372, %c0_116] : memref<16x384xf32, #tpu.memory_space<vmem>>, vector<1x384xf32>
    %c8_i32_117 = arith.constant 8 : i32
    %374 = arith.addi %c8_i32_117, %370 : i32
    %375 = arith.index_cast %374 : i32 to index
    %c0_118 = arith.constant 0 : index
    %376 = vector.load %arg7[%375, %c0_118] : memref<16x384xf32, #tpu.memory_space<vmem>>, vector<1x384xf32>
    %377 = tpu.concatenate %373, %376 in 0 : vector<1x384xf32>, vector<1x384xf32> -> vector<2x384xf32>
    %378 = arith.truncf %357 : vector<2x128xf32> to vector<2x128xbf16>
    %cst_119 = arith.constant dense<0.000000e+00> : vector<2x384xf32>
    %379 = tpu.matmul %378, %14, %cst_119 {dimension_numbers = #tpu.dot_dimension_numbers<[1], [0], [0], [1], [0, 0, 1, 1], [], []>} : vector<2x128xbf16>, vector<128x384xbf16>, vector<2x384xf32> -> vector<2x384xf32>
    %380 = vector.broadcast %16 : vector<1x384xf32> to vector<2x384xf32>
    %381 = arith.addf %379, %380 : vector<2x384xf32>
    %382 = vector.extract_strided_slice %377 {offsets = [0, 0], sizes = [2, 128], strides = [1, 1]} : vector<2x384xf32> to vector<2x128xf32>
    %383 = vector.extract_strided_slice %381 {offsets = [0, 0], sizes = [2, 128], strides = [1, 1]} : vector<2x384xf32> to vector<2x128xf32>
    %384 = arith.addf %382, %383 : vector<2x128xf32>
    %385 = arith.negf %384 : vector<2x128xf32>
    %386 = math.exp %385 : vector<2x128xf32>
    %cst_120 = arith.constant 1.000000e+00 : f32
    %387 = vector.broadcast %cst_120 : f32 to vector<2x128xf32>
    %388 = arith.addf %387, %386 : vector<2x128xf32>
    %389 = arith.divf %387, %388 : vector<2x128xf32>
    %390 = vector.extract_strided_slice %377 {offsets = [0, 128], sizes = [2, 128], strides = [1, 1]} : vector<2x384xf32> to vector<2x128xf32>
    %391 = vector.extract_strided_slice %381 {offsets = [0, 128], sizes = [2, 128], strides = [1, 1]} : vector<2x384xf32> to vector<2x128xf32>
    %392 = arith.addf %390, %391 : vector<2x128xf32>
    %393 = arith.negf %392 : vector<2x128xf32>
    %394 = math.exp %393 : vector<2x128xf32>
    %cst_121 = arith.constant 1.000000e+00 : f32
    %395 = vector.broadcast %cst_121 : f32 to vector<2x128xf32>
    %396 = arith.addf %395, %394 : vector<2x128xf32>
    %397 = arith.divf %395, %396 : vector<2x128xf32>
    %398 = vector.extract_strided_slice %377 {offsets = [0, 256], sizes = [2, 128], strides = [1, 1]} : vector<2x384xf32> to vector<2x128xf32>
    %399 = vector.extract_strided_slice %381 {offsets = [0, 256], sizes = [2, 128], strides = [1, 1]} : vector<2x384xf32> to vector<2x128xf32>
    %400 = arith.mulf %389, %399 : vector<2x128xf32>
    %401 = arith.addf %398, %400 : vector<2x128xf32>
    %402 = math.tanh %401 : vector<2x128xf32>
    %cst_122 = arith.constant 1.000000e+00 : f32
    %403 = vector.broadcast %cst_122 : f32 to vector<2x128xf32>
    %404 = arith.subf %403, %397 : vector<2x128xf32>
    %405 = arith.mulf %404, %402 : vector<2x128xf32>
    %406 = arith.mulf %397, %357 : vector<2x128xf32>
    %407 = arith.addf %405, %406 : vector<2x128xf32>
    %408 = vector.extract_strided_slice %407 {offsets = [0, 0], sizes = [1, 128], strides = [1, 1]} : vector<2x128xf32> to vector<1x128xf32>
    %c0_123 = arith.constant 0 : index
    %409 = arith.index_cast %370 : i32 to index
    %c0_124 = arith.constant 0 : index
    %410 = vector.load %arg6[%c0_123, %409, %c0_124] : memref<2x8x128xf32, #tpu.memory_space<vmem>>, vector<1x1x128xf32>
    %411 = vector.shape_cast %410 : vector<1x1x128xf32> to vector<1x128xf32>
    %412 = vector.shape_cast %408 : vector<1x128xf32> to vector<1x1x128xf32>
    tpu.vector_store %arg6[%c0_123, %409, %c0_124], %412 {strides = array<i32>} : memref<2x8x128xf32, #tpu.memory_space<vmem>>, vector<1x1x128xf32>,
    %413 = vector.extract_strided_slice %407 {offsets = [1, 0], sizes = [1, 128], strides = [1, 1]} : vector<2x128xf32> to vector<1x128xf32>
    %c1_125 = arith.constant 1 : index
    %414 = arith.index_cast %370 : i32 to index
    %c0_126 = arith.constant 0 : index
    %415 = vector.load %arg6[%c1_125, %414, %c0_126] : memref<2x8x128xf32, #tpu.memory_space<vmem>>, vector<1x1x128xf32>
    %416 = vector.shape_cast %415 : vector<1x1x128xf32> to vector<1x128xf32>
    %417 = vector.shape_cast %413 : vector<1x128xf32> to vector<1x1x128xf32>
    tpu.vector_store %arg6[%c1_125, %414, %c0_126], %417 {strides = array<i32>} : memref<2x8x128xf32, #tpu.memory_space<vmem>>, vector<1x1x128xf32>,
    %c8_i32_127 = arith.constant 8 : i32
    return
  }
  func.func @transform_0(%arg0: i32) -> (i32, i32, i32) {
    %c0_i32 = arith.constant 0 : i32
    %c0_i32_0 = arith.constant 0 : i32
    %c0_i32_1 = arith.constant 0 : i32
    %c0_i32_2 = arith.constant 0 : i32
    return %c0_i32, %c0_i32_0, %c0_i32_1 : i32, i32, i32
  }
  func.func @transform_1(%arg0: i32) -> (i32, i32, i32) {
    %c0_i32 = arith.constant 0 : i32
    %c0_i32_0 = arith.constant 0 : i32
    %c0_i32_1 = arith.constant 0 : i32
    return %arg0, %c0_i32, %c0_i32_0 : i32, i32, i32
  }
  func.func @transform_2(%arg0: i32) -> (i32, i32, i32) {
    %c0_i32 = arith.constant 0 : i32
    %c0_i32_0 = arith.constant 0 : i32
    %c0_i32_1 = arith.constant 0 : i32
    return %arg0, %c0_i32, %c0_i32_0 : i32, i32, i32
  }
  func.func @transform_3(%arg0: i32) -> (i32, i32, i32) {
    %c0_i32 = arith.constant 0 : i32
    %c0_i32_0 = arith.constant 0 : i32
    %c0_i32_1 = arith.constant 0 : i32
    return %arg0, %c0_i32, %c0_i32_0 : i32, i32, i32
  }
  func.func @transform_4(%arg0: i32) -> (i32, i32, i32) {
    %c0_i32 = arith.constant 0 : i32
    %c0_i32_0 = arith.constant 0 : i32
    %c0_i32_1 = arith.constant 0 : i32
    return %arg0, %c0_i32, %c0_i32_0 : i32, i32, i32
  }
  func.func @transform_5(%arg0: i32) -> (i32, i32, i32) {
    %c0_i32 = arith.constant 0 : i32
    %c0_i32_0 = arith.constant 0 : i32
    %c0_i32_1 = arith.constant 0 : i32
    return %c0_i32, %c0_i32_0, %arg0 : i32, i32, i32
  }
}

module attributes {stable_mosaic.version = 11 : i64} {
  func.func @_adaptive_conv_kernel(%arg0: i32, %arg1: memref<1x8x32xf32, #tpu.memory_space<vmem>>, %arg2: memref<1x64x32xf32, #tpu.memory_space<vmem>>, %arg3: memref<1x7x32xf32, #tpu.memory_space<vmem>>) attributes {dimension_semantics = [#tpu.dimension_semantics<parallel>], iteration_bounds = array<i64: 2>, scalar_prefetch = 0 : i64, scratch_operands = 0 : i64, tpu.core_type = #tpu.core_type<tc>, window_params = [{transform_indices = @transform_0, window_bounds = array<i64: 1, 8, 32>}, {transform_indices = @transform_1, window_bounds = array<i64: 1, 64, 32>}, {transform_indices = @transform_2, window_bounds = array<i64: 1, 7, 32>}]} {
    %c0 = arith.constant 0 : index
    %c0_0 = arith.constant 0 : index
    %c0_1 = arith.constant 0 : index
    %0 = vector.load %arg1[%c0, %c0_0, %c0_1] : memref<1x8x32xf32, #tpu.memory_space<vmem>>, vector<1x8x32xf32>
    %1 = vector.shape_cast %0 : vector<1x8x32xf32> to vector<8x32xf32>
    %2 = vector.extract_strided_slice %1 {offsets = [0, 0], sizes = [7, 32], strides = [1, 1]} : vector<8x32xf32> to vector<7x32xf32>
    %3 = vector.extract_strided_slice %1 {offsets = [1, 0], sizes = [7, 32], strides = [1, 1]} : vector<8x32xf32> to vector<7x32xf32>
    %4 = tpu.concatenate %2, %3 in 1 : vector<7x32xf32>, vector<7x32xf32> -> vector<7x64xf32>
    %5 = arith.truncf %4 : vector<7x64xf32> to vector<7x64xbf16>
    %c0_2 = arith.constant 0 : index
    %c0_3 = arith.constant 0 : index
    %c0_4 = arith.constant 0 : index
    %6 = vector.load %arg2[%c0_2, %c0_3, %c0_4] : memref<1x64x32xf32, #tpu.memory_space<vmem>>, vector<1x64x32xf32>
    %7 = vector.shape_cast %6 : vector<1x64x32xf32> to vector<64x32xf32>
    %8 = arith.truncf %7 : vector<64x32xf32> to vector<64x32xbf16>
    %cst = arith.constant dense<0.000000e+00> : vector<7x32xf32>
    %9 = tpu.matmul %5, %8, %cst {dimension_numbers = #tpu.dot_dimension_numbers<[1], [0], [0], [1], [0, 0, 1, 1], [], []>} : vector<7x64xbf16>, vector<64x32xbf16>, vector<7x32xf32> -> vector<7x32xf32>
    %cst_5 = arith.constant 0.000000e+00 : f32
    %10 = vector.broadcast %cst_5 : f32 to vector<7x32xf32>
    %11 = arith.maximumf %9, %10 : vector<7x32xf32>
    %c0_6 = arith.constant 0 : index
    %c0_7 = arith.constant 0 : index
    %c0_8 = arith.constant 0 : index
    %12 = vector.load %arg3[%c0_6, %c0_7, %c0_8] : memref<1x7x32xf32, #tpu.memory_space<vmem>>, vector<1x7x32xf32>
    %13 = vector.shape_cast %12 : vector<1x7x32xf32> to vector<7x32xf32>
    %14 = vector.shape_cast %11 : vector<7x32xf32> to vector<1x7x32xf32>
    tpu.vector_store %arg3[%c0_6, %c0_7, %c0_8], %14 {strides = array<i32>} : memref<1x7x32xf32, #tpu.memory_space<vmem>>, vector<1x7x32xf32>,
    return
  }
  func.func @transform_0(%arg0: i32) -> (i32, i32, i32) {
    %c0_i32 = arith.constant 0 : i32
    %c0_i32_0 = arith.constant 0 : i32
    %c0_i32_1 = arith.constant 0 : i32
    return %arg0, %c0_i32, %c0_i32_0 : i32, i32, i32
  }
  func.func @transform_1(%arg0: i32) -> (i32, i32, i32) {
    %c0_i32 = arith.constant 0 : i32
    %c0_i32_0 = arith.constant 0 : i32
    %c0_i32_1 = arith.constant 0 : i32
    return %arg0, %c0_i32, %c0_i32_0 : i32, i32, i32
  }
  func.func @transform_2(%arg0: i32) -> (i32, i32, i32) {
    %c0_i32 = arith.constant 0 : i32
    %c0_i32_0 = arith.constant 0 : i32
    %c0_i32_1 = arith.constant 0 : i32
    return %arg0, %c0_i32, %c0_i32_0 : i32, i32, i32
  }
}

</mosaic_0001>

<bundles_post_ra>
// kernel: squeeze.1
= control target key start
LH: loop header
LB: loop body
LE: loop exit
PB: predicated region body
PF: predicated region fallthrough
CT: control target
= control target key end

     0   :  { %vm82_vm0 = vcmask 261120   ;;  %vm193_vm1 = vcmask 1047556   ;;  %s392_s10 = smov 96   ;;  %s394_s14 = smov 32   ;;  %s645_s0 = inlined_call_operand.vmem [shape: f32[2,2048], index: 0, kind: input, shape index: {}]   ;;  %s646_s1 = inlined_call_operand.vmem [shape: f32[2,64,32], index: 1, kind: output, shape index: {}]  }
   0x1   :  { %v339_v0 = vld [vmem:[%s645_s0 + $0xe] sm:$0x3]  ;;  %v340_v1 = vld [vmem:[%s645_s0 + $0xc] sm:$0x3]  ;;  %v341_v2 = vld [vmem:[%s645_s0 + $0xa] sm:$0x3] }
   0x2   :  { %49 = vst [vmem:[#allocation0 + $0x38] sm:$0x3] %v339_v0  ;;  %54 = vst [vmem:[#allocation0 + $0x30] sm:$0x3] %v340_v1  ;;  %v342_v3 = vld [vmem:[%s645_s0 + $0x8] sm:$0x3] }
   0x3   :  { %59 = vst [vmem:[#allocation0 + $0x28] sm:$0x3] %v341_v2  ;;  %v343_v4 = vld [vmem:[%s645_s0 + $0x6] sm:$0x3]  ;;  %v344_v5 = vld [vmem:[%s645_s0 + $0x4] sm:$0x3] }
   0x4   :  { %64 = vst [vmem:[#allocation0 + $0x20] sm:$0x3] %v342_v3  ;;  %69 = vst [vmem:[#allocation0 + $0x18] sm:$0x3] %v343_v4  ;;  %v345_v6 = vld [vmem:[%s645_s0 + $0x2] sm:$0x3] }
   0x5   :  { %74 = vst [vmem:[#allocation0 + $0x10] sm:$0x3] %v344_v5  ;;  %v79_v7 = vld [vmem:[%s645_s0] sm:$0x3]  ;;  %78 = vst [vmem:[#allocation0 + $0x8] sm:$0x3] %v345_v6 }
   0x6   :  { %80 = vst [vmem:[#allocation0] sm:$0x3] %v79_v7  ;;  %v331_v8 = vld [vmem:[%s645_s0 + $0x1e] sm:$0x3]  ;;  %v332_v9 = vld [vmem:[%s645_s0 + $0x1c] sm:$0x3] }
   0x7   :  { %9 = vst [vmem:[#allocation0 + $0x78] sm:$0x3] %v331_v8  ;;  %14 = vst [vmem:[#allocation0 + $0x70] sm:$0x3] %v332_v9  ;;  %v333_v10 = vld [vmem:[%s645_s0 + $0x1a] sm:$0x3] }
   0x8   :  { %v334_v11 = vld [vmem:[%s645_s0 + $0x18] sm:$0x3]  ;;  %v335_v12 = vld [vmem:[%s645_s0 + $0x16] sm:$0x3]  ;;  %19 = vst [vmem:[#allocation0 + $0x68] sm:$0x3] %v333_v10 }
   0x9   :  { %24 = vst [vmem:[#allocation0 + $0x60] sm:$0x3] %v334_v11  ;;  %29 = vst [vmem:[#allocation0 + $0x58] sm:$0x3] %v335_v12  ;;  %v336_v13 = vld [vmem:[%s645_s0 + $0x14] sm:$0x3] }
   0xa   :  { %v337_v14 = vld [vmem:[%s645_s0 + $0x12] sm:$0x3]  ;;  %v338_v15 = vld [vmem:[%s645_s0 + $0x10] sm:$0x3]  ;;  %34 = vst [vmem:[#allocation0 + $0x50] sm:$0x3] %v336_v13 }
   0xb   :  { %39 = vst [vmem:[#allocation0 + $0x48] sm:$0x3] %v337_v14  ;;  %44 = vst [vmem:[#allocation0 + $0x40] sm:$0x3] %v338_v15  ;;  %v115_v16 = vld [vmem:[#allocation0 + $0x28] sm:$0x3]  }
   0xc   :  { %v122_v17 = vld [vmem:[#allocation0 + $0x30] sm:$0x3]   ;;  %v129_v18 = vld [vmem:[#allocation0 + $0x38] sm:$0x3]   ;;  %v108_v21 = vld [vmem:[#allocation0 + $0x20] sm:$0x3]  }
   0xd   :  { %v94_v19 = vld [vmem:[#allocation0 + $0x10] sm:$0x3]   ;;  %v101_v20 = vld [vmem:[#allocation0 + $0x18] sm:$0x3]   ;;  %355 = vst.msk [vmem:[%s646_s1 + $0x14] sm:$0x1] %vm82_vm0, %v115_v16  }
   0xe   :  { %356 = vst.msk [vmem:[%s646_s1 + $0x53] sm:$0x2] %vm82_vm0, %v115_v16   ;;  %357 = vst.msk [vmem:[%s646_s1 + $0x18] sm:$0x1] %vm82_vm0, %v122_v17   ;;  %v81_v22 = vld [vmem:[#allocation0] sm:$0x3]  }
   0xf   :  { %358 = vst.msk [vmem:[%s646_s1 + $0x57] sm:$0x2] %vm82_vm0, %v122_v17   ;;  %359 = vst.msk [vmem:[%s646_s1 + $0x1c] sm:$0x1] %vm82_vm0, %v129_v18   ;;  %v87_v23 = vld [vmem:[#allocation0 + $0x8] sm:$0x3]  }
  0x10   :  { %360 = vst.msk [vmem:[%s646_s1 + $0x5b] sm:$0x2] %vm82_vm0, %v129_v18   ;;  %349 = vst.msk [vmem:[%s646_s1 + $0x8] sm:$0x1] %vm82_vm0, %v94_v19   ;;  %v157_v27 = vld [vmem:[#allocation0 + $0x58] sm:$0x3]  }
  0x11   :  { %350 = vst.msk [vmem:[%s646_s1 + $0x47] sm:$0x2] %vm82_vm0, %v94_v19   ;;  %351 = vst.msk [vmem:[%s646_s1 + $0xc] sm:$0x1] %vm82_vm0, %v101_v20   ;;  %v164_v28 = vld [vmem:[#allocation0 + $0x60] sm:$0x3]  }
  0x12   :  { %352 = vst.msk [vmem:[%s646_s1 + $0x4b] sm:$0x2] %vm82_vm0, %v101_v20   ;;  %353 = vst.msk [vmem:[%s646_s1 + $0x10] sm:$0x1] %vm82_vm0, %v108_v21   ;;  %v171_v29 = vld [vmem:[#allocation0 + $0x68] sm:$0x3]  }
  0x13   :  { %354 = vst.msk [vmem:[%s646_s1 + $0x4f] sm:$0x2] %vm82_vm0, %v108_v21   ;;  %83 = vst.msk [vmem:[%s646_s1] sm:$0x1] %vm82_vm0, %v81_v22   ;;  %v136_v30 = vld [vmem:[#allocation0 + $0x40] sm:$0x3]  }
  0x14   :  { %346 = vst.msk [vmem:[%s646_s1 + $0x3f] sm:$0x2] %vm82_vm0, %v81_v22   ;;  %347 = vst.msk [vmem:[%s646_s1 + $0x4] sm:$0x1] %vm82_vm0, %v87_v23   ;;  %v143_v31 = vld [vmem:[#allocation0 + $0x48] sm:$0x3]  }
  0x15   :  { %348 = vst.msk [vmem:[%s646_s1 + $0x43] sm:$0x2] %vm82_vm0, %v87_v23   ;;  %v191_v24 = vld [vmem:[#allocation0] ss:$8 sm:$0xf]  }
  0x16   :  { %v192_v25 = vld [vmem:[#allocation0] ss:$8 sm:$0xf0]   ;;  %367 = vst.msk [vmem:[%s646_s1 + $0x2c] sm:$0x1] %vm82_vm0, %v157_v27  }
  0x17   :  { %v194_v26 = vsel %vm193_vm1, %v192_v25, %v191_v24  ;;  %v150_v32 = vld [vmem:[#allocation0 + $0x50] sm:$0x3]   ;;  %368 = vst.msk [vmem:[%s646_s1 + $0x6b] sm:$0x2] %vm82_vm0, %v157_v27   ;;  %369 = vst.msk [vmem:[%s646_s1 + $0x30] sm:$0x1] %vm82_vm0, %v164_v28  }
  0x18   :  { %195 = vrot.lane.b32.xlu0 %v194_v26, %s392_s10  ;;  %370 = vst.msk [vmem:[%s646_s1 + $0x6f] sm:$0x2] %vm82_vm0, %v164_v28   ;;  %371 = vst.msk [vmem:[%s646_s1 + $0x34] sm:$0x1] %vm82_vm0, %v171_v29   ;;  %v178_v33 = vld [vmem:[#allocation0 + $0x70] sm:$0x3]  }
  0x19   :  { %372 = vst.msk [vmem:[%s646_s1 + $0x73] sm:$0x2] %vm82_vm0, %v171_v29   ;;  %361 = vst.msk [vmem:[%s646_s1 + $0x20] sm:$0x1] %vm82_vm0, %v136_v30   ;;  %v185_v36 = vld [vmem:[#allocation0 + $0x78] sm:$0x3]  }
  0x1a   :  { %362 = vst.msk [vmem:[%s646_s1 + $0x5f] sm:$0x2] %vm82_vm0, %v136_v30   ;;  %363 = vst.msk [vmem:[%s646_s1 + $0x24] sm:$0x1] %vm82_vm0, %v143_v31  }
  0x1b   :  { %364 = vst.msk [vmem:[%s646_s1 + $0x63] sm:$0x2] %vm82_vm0, %v143_v31   ;;  %365 = vst.msk [vmem:[%s646_s1 + $0x28] sm:$0x1] %vm82_vm0, %v150_v32  }
  0x1c   :  { %366 = vst.msk [vmem:[%s646_s1 + $0x67] sm:$0x2] %vm82_vm0, %v150_v32   ;;  %v212_v34 = vld [vmem:[#allocation0 + $0x40] ss:$8 sm:$0xf]  }
  0x1d   :  { %373 = vst.msk [vmem:[%s646_s1 + $0x38] sm:$0x1] %vm82_vm0, %v178_v33   ;;  %374 = vst.msk [vmem:[%s646_s1 + $0x77] sm:$0x2] %vm82_vm0, %v178_v33  }
  0x1e   :  { %v214_v35 = vld [vmem:[#allocation0 + $0x40] ss:$8 sm:$0xf0]   ;;  %375 = vst.msk [vmem:[%s646_s1 + $0x3c] sm:$0x1] %vm82_vm0, %v185_v36  }
  0x1f   :  { %v216_v37 = vsel %vm193_vm1, %v214_v35, %v212_v34  ;;  %376 = vst.msk [vmem:[%s646_s1 + $0x7b] sm:$0x2] %vm82_vm0, %v185_v36   ;;  %v201_v38 = vld [vmem:[#allocation0 + $0x1] ss:$8 sm:$0xf]  }
  0x20   :  { %v203_v39 = vld [vmem:[#allocation0 + $0x1] ss:$8 sm:$0xf0]   ;;  %217 = vrot.lane.b32.xlu1 %v216_v37, %s392_s10  ;;  %v233_v44 = vld [vmem:[#allocation0] ss:$8 sm:$0xf]  }
  0x21   :  { %v205_v40 = vsel %vm193_vm1, %v203_v39, %v201_v38  ;;  %v223_v41 = vld [vmem:[#allocation0 + $0x41] ss:$8 sm:$0xf]   ;;  %v234_v45 = vld [vmem:[#allocation0] ss:$8 sm:$0xf0]  }
  0x22   :  { %v225_v42 = vld [vmem:[#allocation0 + $0x41] ss:$8 sm:$0xf0]   ;;  %206 = vrot.lane.b32.xlu0 %v205_v40, %s392_s10  ;;  %v236_v46 = vsel %vm193_vm1, %v234_v45, %v233_v44  ;;  %v254_v49 = vld [vmem:[#allocation0 + $0x40] ss:$8 sm:$0xf]  }
  0x23   :  { %v227_v43 = vsel %vm193_vm1, %v225_v42, %v223_v41  ;;  %v243_v47 = vld [vmem:[#allocation0 + $0x1] ss:$8 sm:$0xf]   ;;  %v256_v50 = vld [vmem:[#allocation0 + $0x40] ss:$8 sm:$0xf0]  }
  0x24   :  { %v245_v48 = vld [vmem:[#allocation0 + $0x1] ss:$8 sm:$0xf0]   ;;  %228 = vrot.lane.b32.xlu1 %v227_v43, %s392_s10  ;;  %s393_s10 = smov 64   ;;  %v258_v52 = vsel %vm193_vm1, %v256_v50, %v254_v49 }
  0x25   :  { %v247_v51 = vsel %vm193_vm1, %v245_v48, %v243_v47  ;;  %v265_v53 = vld [vmem:[#allocation0 + $0x41] ss:$8 sm:$0xf]   ;;  %v275_v55 = vld [vmem:[#allocation0] ss:$8 sm:$0xf]  }
  0x26   :  { %237 = vrot.lane.b32.xlu0 %v236_v46, %s393_s10  ;;  %v267_v54 = vld [vmem:[#allocation0 + $0x41] ss:$8 sm:$0xf0]   ;;  %v276_v56 = vld [vmem:[#allocation0] ss:$8 sm:$0xf0]  }
  0x27   :  { %v269_v57 = vsel %vm193_vm1, %v267_v54, %v265_v53  ;;  %v278_v58 = vsel %vm193_vm1, %v276_v56, %v275_v55  ;;  %v285_v59 = vld [vmem:[#allocation0 + $0x1] ss:$8 sm:$0xf]   ;;  %v296_v61 = vld [vmem:[#allocation0 + $0x40] ss:$8 sm:$0xf]  }
  0x28   :  { %248 = vrot.lane.b32.xlu1 %v247_v51, %s393_s10  ;;  %v287_v60 = vld [vmem:[#allocation0 + $0x1] ss:$8 sm:$0xf0]   ;;  %v298_v62 = vld [vmem:[#allocation0 + $0x40] ss:$8 sm:$0xf0]  }
  0x29   :  { %v289_v63 = vsel %vm193_vm1, %v287_v60, %v285_v59  ;;  %v300_v0 = vsel %vm193_vm1, %v298_v62, %v296_v61  ;;  %v307_v1 = vld [vmem:[#allocation0 + $0x41] ss:$8 sm:$0xf]  }
  0x2a   :  { %259 = vrot.lane.b32.xlu0 %v258_v52, %s393_s10  ;;  %v309_v2 = vld [vmem:[#allocation0 + $0x41] ss:$8 sm:$0xf0]  }
  0x2b   :  { %v311_v3 = vsel %vm193_vm1, %v309_v2, %v307_v1 }
  0x2c   :  { %270 = vrot.lane.b32.xlu1 %v269_v57, %s393_s10 }
  0x2e   :  { %279 = vrot.lane.b32.xlu0 %v278_v58, %s394_s14 }
  0x30   :  { %290 = vrot.lane.b32.xlu1 %v289_v63, %s394_s14 }
  0x32   :  { %301 = vrot.lane.b32.xlu0 %v300_v0, %s394_s14 }
  0x34   :  { %312 = vrot.lane.b32.xlu1 %v311_v3, %s394_s14 }
  0x8a   :  { %v196_v4 = vpop.permute.xlu0 %195  }
  0x8b   :  { %377 = vst.msk [vmem:[%s646_s1 + $0x1] ss:$4 sm:$0xff] %vm82_vm0, %v196_v4  }
  0x92   :  { %v218_v5 = vpop.permute.xlu1 %217  }
  0x93   :  { %379 = vst.msk [vmem:[%s646_s1 + $0x21] ss:$4 sm:$0xff] %vm82_vm0, %v218_v5  }
  0x94   :  { %v207_v6 = vpop.permute.xlu0 %206  }
  0x95   :  { %378 = vst.msk [vmem:[%s646_s1 + $0x41] ss:$4 sm:$0xff] %vm82_vm0, %v207_v6  }
  0x96   :  { %v229_v7 = vpop.permute.xlu1 %228  }
  0x97   :  { %380 = vst.msk [vmem:[%s646_s1 + $0x61] ss:$4 sm:$0xff] %vm82_vm0, %v229_v7  }
  0x98   :  { %v238_v8 = vpop.permute.xlu0 %237  }
  0x99   :  { %381 = vst.msk [vmem:[%s646_s1 + $0x2] ss:$4 sm:$0xff] %vm82_vm0, %v238_v8  }
  0x9a   :  { %v249_v9 = vpop.permute.xlu1 %248  }
  0x9b   :  { %382 = vst.msk [vmem:[%s646_s1 + $0x42] ss:$4 sm:$0xff] %vm82_vm0, %v249_v9  }
  0x9c   :  { %v260_v10 = vpop.permute.xlu0 %259  }
  0x9d   :  { %383 = vst.msk [vmem:[%s646_s1 + $0x22] ss:$4 sm:$0xff] %vm82_vm0, %v260_v10  }
  0x9e   :  { %v271_v11 = vpop.permute.xlu1 %270  }
  0x9f   :  { %384 = vst.msk [vmem:[%s646_s1 + $0x62] ss:$4 sm:$0xff] %vm82_vm0, %v271_v11  }
  0xa0   :  { %v280_v12 = vpop.permute.xlu0 %279  }
  0xa1   :  { %385 = vst.msk [vmem:[%s646_s1 + $0x3] ss:$4 sm:$0xff] %vm82_vm0, %v280_v12  }
  0xa2   :  { %v291_v13 = vpop.permute.xlu1 %290  }
  0xa3   :  { %386 = vst.msk [vmem:[%s646_s1 + $0x43] ss:$4 sm:$0xff] %vm82_vm0, %v291_v13  }
  0xa4   :  { %v302_v14 = vpop.permute.xlu0 %301  }
  0xa5   :  { %387 = vst.msk [vmem:[%s646_s1 + $0x23] ss:$4 sm:$0xff] %vm82_vm0, %v302_v14  }
  0xa6   :  { %v313_v15 = vpop.permute.xlu1 %312  }
  0xa7   :  { %388 = vst.msk [vmem:[%s646_s1 + $0x63] ss:$4 sm:$0xff] %vm82_vm0, %v313_v15  }

// kernel: adaptive_conv1d_forward.5
= control target key start
LH: loop header
LB: loop body
LE: loop exit
PB: predicated region body
PF: predicated region fallthrough
CT: control target
= control target key end

     0   :  { %s360_s9 = smov 0   ;;  %s388_s0 = inlined_call_operand.vmem [shape: f32[2,8,32], index: 0, kind: input, shape index: {}]   ;;  %s389_s1 = inlined_call_operand.vmem [shape: f32[2,64,32], index: 1, kind: input, shape index: {}]   ;;  %s390_s2 = inlined_call_operand.vmem [shape: f32[2,7,32], index: 2, kind: output, shape index: {}]  }
   0x1 LB: > { %s293_s10 = sadd.s32 4294967295, %s340_s9   ;;  %p297_p0 = scmp.ge.s32.totalorder %s340_s9, 1  ;;  %s340_s9 = sphi %s360_s9, %s12_s9  }
   0x2   : > { %p121_p1 = scmp.lt.s32.totalorder %s340_s9, 3 }
   0x4   : > { %p122_p2 = pnand %p297_p0, %p121_p1 }
   0x5   : > { %p146_p3 = scmp.lt.s32.totalorder (!%p122_p2), %s293_s10, 1  ;;  %s344_s19 = smov (!%p122_p2), 32  }
   0x6   : > { %125 = sbr.rel (%p122_p2) target bundleno = 334 (0x14e), region = 28 }
   0xb   : > { %v342_v0 = vmov 0.0   ;;  %vm343_vm0 = vmmov 0   ;;  %s392_s10 = smov (!%p146_p3, %s293_s10), 1  ;;  %vm166_vm1 = vcmask 261120   ;;  %vm181_vm2 = vcmask 523264  }
   0xc   : > { %311 = vmatprep.subr.bf16.mxu0 %v342_v0  ;;  %319 = vmatprep.mubr.msk.bf16.mxu0 %vm343_vm0, %v342_v0  ;;  %s298_s11 = sshll.u32 %s392_s10, 3  ;;  %s305_s12 = sshll.u32 %s392_s10, 6  ;;  %vm226_vm3 = vcmask 260096  }
   0xd   : > { %s149_s15 = scalar_lea.vmem %s388_s0, %s298_s11  ;;  %s154_s18 = scalar_lea.vmem %s389_s1, %s305_s12 }
   0xe   : > { %v160_v1 = vld [vmem:[%s149_s15] sm:$0xff]  ;;  %v175_v2 = vld [vmem:[%s154_s18 + $0x30] sm:$0xff]  ;;  %v176_v3 = vld [vmem:[%s154_s18 + $0x38] sm:$0xff]  ;;  %s158_s22 = scalar_lea.vmem %s390_s2, %s298_s11 }
   0xf   : > { %v162_v4 = vrot.slane %v160_v1, 1  ;;  %v180_v5 = vpack.c.bf16 %v176_v3, %v175_v2  ;;  %v173_v6 = vld [vmem:[%s154_s18 + $0x20] sm:$0xff]  ;;  %v174_v7 = vld [vmem:[%s154_s18 + $0x28] sm:$0xff]  ;;  %v171_v9 = vld [vmem:[%s154_s18 + $0x10] sm:$0xff] }
  0x10   : > { %v179_v8 = vpack.c.bf16 %v174_v7, %v173_v6  ;;  %v172_v10 = vld [vmem:[%s154_s18 + $0x18] sm:$0xff]  ;;  %v169_v12 = vld [vmem:[%s154_s18] sm:$0xff]  ;;  %v170_v13 = vld [vmem:[%s154_s18 + $0x8] sm:$0xff] }
  0x11   : > { %163 = vrot.lane.b32.xlu0 %v162_v4, %s344_s19  ;;  %312 = vmatpush3.bf16.msra.mxu0 %v180_v5  ;;  %v178_v11 = vpack.c.bf16 %v172_v10, %v171_v9  ;;  %v177_v14 = vpack.c.bf16 %v170_v13, %v169_v12 }
  0x12   : > { %313 = vmatprep.subr.bf16.mxu0 %v342_v0 }
  0x15   : > { %314 = vmatpush3.bf16.msra.mxu0 %v179_v8 }
  0x16   : > { %315 = vmatprep.subr.bf16.mxu0 %v342_v0 }
  0x19   : > { %316 = vmatpush3.bf16.msra.mxu0 %v178_v11 }
  0x1a   : > { %317 = vmatprep.subr.bf16.mxu0 %v342_v0 }
  0x1d   : > { %318 = vmatpush3.bf16.msra.mxu0 %v177_v14 }
  0x83   : > { %v164_v15 = vpop.permute.xlu0 %163 }
  0x84   : > { %v167_v16 = vsel %vm166_vm1, %v160_v1, %v164_v15 }
  0x85   : > { %v168_v17 = vpack.c.bf16 %v167_v16, %v167_v16 }
  0x87   : > { %320 = vmatmul.mubr.msk.bf16.vlgmr.msra.gmra.mxu0 %vm181_vm2, %v168_v17 }
 0x147   : > { %v219_v18 = vpop.f32.mrf.mxu0 }
 0x148   : > { %v225_v19 = vmax.f32 %v219_v18, 0.0 }
 0x149   : > { %v321_v20 = vpop.f32.mrf.mxu0 }
 0x14a   : > { %227 = vst.msk [vmem:[%s158_s22] sm:$0x7f] %vm226_vm3, %v225_v19 }
 0x14b   : > { %v222_v21 = vpop.f32.mrf.mxu0 }
 0x14d   : > { %v322_v22 = vpop.f32.mrf.mxu0 }
 0x14e PF: > { %s12_s9 = sadd.s32 1, %s340_s9  }
 0x14f   : > { %p9_p4 = scmp.ge.s32.totalorder %s12_s9, 4  }
 0x151   :  { %11 = sbr.rel (!%p9_p4) target bundleno = 1 (0x1), region = 61 }

// kernel: adaptive_conv1d_forward.3
= control target key start
LH: loop header
LB: loop body
LE: loop exit
PB: predicated region body
PF: predicated region fallthrough
CT: control target
= control target key end

     0   :  { %s3728_s0 = inlined_call_operand.hbm [shape: f32[2,8,32], index: 0, kind: input, shape index: {}]   ;;  %s3729_s1 = inlined_call_operand.hbm [shape: f32[2,32,384], index: 1, kind: input, shape index: {}]   ;;  %s3730_s2 = inlined_call_operand.hbm [shape: f32[2,128,384], index: 2, kind: input, shape index: {}]   ;;  %s3731_s3 = inlined_call_operand.hbm [shape: f32[2,1,384], index: 3, kind: input, shape index: {}]   ;;  %s3732_s4 = inlined_call_operand.hbm [shape: f32[2,1,384], index: 4, kind: input, shape index: {}]   ;;  %s3733_s5 = inlined_call_operand.vmem [shape: f32[2,8,256], index: 5, kind: output, shape index: {}]  }
   0x1   :  { %3745 = sst [smem:[#allocation18_spill]] %s3729_s1 }
   0x2   :  { %3746 = sst [smem:[#allocation19_spill]] %s3731_s3 }
   0x3   :  { %3747 = sst [smem:[#allocation20_spill]] %s3733_s5 }
   0x4   :  { %10 = vsyncpa [#allocation4], 0 }
   0x5   :  { %11 = vsyncpa [#allocation6], 0 }
   0x6   :  { %13 = vsyncpa [#allocation6 + $0x1], 0 }
   0x7   :  { %14 = vsyncpa [#allocation9], 0 }
   0x8   :  { %16 = vsyncpa [#allocation9 + $0x1], 0  ;;  %s2825_s18 = smov 0   ;;  %s2827_s19 = smov 0  }
   0x9   :  { %s2829_s20 = smov 0   ;;  %s2831_s21 = smov 0  }
   0xa LB: > { %3748 = sst [smem:[#allocation15_spill]] %s2777_s20  ;;  %s2846_s22 = sadd.s32 1, %s2781_s21   ;;  %s2781_s21 = sphi %s2831_s21, %s3778_s21   ;;  %s2777_s20 = sphi %s2829_s20, %s3780_s20   ;;  %s2773_s19 = sphi %s2827_s19, %s3782_s19   ;;  %s2769_s18 = sphi %s2825_s18, %s3781_s18  }
   0xb   : > { %3749 = sst [smem:[#allocation16_spill]] %s2846_s22  ;;  %s50_s23 = sadd.s32 1, %s2777_s20 }
   0xc   : > { %s47_s24 = ssub.s32 %s2781_s21, %s2846_s22  ;;  %p3734_p0 = scmp.ne.s32.totalorder %s2777_s20, %s2773_s19 }
   0xd   : > { %p48_p1 = scmp.eq.s32.totalorder %s47_s24, 0  ;;  %p58_p2 = scmp.eq.s32.totalorder %s2781_s21, 0 }
   0xe   : > { %p2479_p3 = scmp.lt.s32.totalorder %s2781_s21, 2  ;;  %s204_s26 = sand.u32 1, %s2781_s21  }
   0xf   : > { %s2856_s25 = scalar_select %p48_p1, %s2777_s20, %s50_s23  }
  0x10   : > { %p59_p4 = por %p58_p2, %p3734_p0  ;;  %s2863_s27 = sand.u32 1, %s2777_s20  }
  0x11   : > { %3750 = sst [smem:[#allocation17_spill]] %s2856_s25  ;;  %s2438_s28 = smul.u32 96, %s2863_s27 }
  0x12   : > { %p2866_p5 = pnand %p2479_p3, %p59_p4  ;;  %s2439_s30 = smul.u32 1536, %s2781_s21 }
  0x13   : > { %s3752_s1 = sld [smem:[#allocation18_spill]]  ;;  %s208_s9 = scalar_lea.vmem [#allocation5], %s2438_s28 }
  0x14   : > { %s215_s10 = sshll.u32 %s208_s9, 4  ;;  %s2880_s11 = scalar_lea.sflag [#allocation6], %s204_s26  ;;  %s2876_s10 = int_to_ptr.vmem [resolvable:$true] %s215_s10 }
  0x15   : > { %p2886_p7 = pneg %p2866_p5 }
  0x19   : > { %s2874_s8 = scalar_lea.hbm %s3752_s1, %s2439_s30  ;;  %s2606_s16 = scalar_lea.hbm %s3752_s1, 3072 }
  0x1a   : > { %s2601_s12 = scalar_lea.hbm %s2874_s8, 1536  ;;  %p2607_p10 = scmp.lt.s32.totalorder %s2874_s8, %s3752_s1 }
  0x1b   : > { %p2602_p6 = scmp.ne.s32.totalorder %s2874_s8, %s2601_s12  ;;  %p2608_p11 = scmp.lt.s32.totalorder %s2606_s16, %s2601_s12 }
  0x1d   : > { %p2604_p8 = pnand %p2886_p7, %p2602_p6  ;;  %p2609_p12 = por %p2608_p11, %p2607_p10 }
  0x1f   : > { %p2605_p9 = pneg %p2604_p8 }
  0x21   : > { %p2610_p13 = pnand %p2609_p12, %p2605_p9 }
  0x23   : > { %2613 = shalt.err (!%p2610_p13)
}
  0x24   : > { %s2614_s24 = scalar_lea.vmem %s2876_s10, 1536  ;;  %s2783_s28 = smov [#allocation5]  }
  0x25   : > { %p2615_p1 = scmp.ne.s32.totalorder %s2876_s10, %s2614_s24  ;;  %s2619_s30 = sshll.u32 %s2783_s28, 4  ;;  %s2620_s30 = int_to_ptr.vmem [resolvable:$false] %s2619_s30 }
  0x26   : > { %s2621_s6 = scalar_lea.vmem %s2620_s30, 3072  ;;  %p2622_p4 = scmp.lt.s32.totalorder %s2876_s10, %s2620_s30 }
  0x27   : > { %p2617_p2 = pnand %p2615_p1, %p2886_p7  ;;  %p2623_p6 = scmp.lt.s32.totalorder %s2621_s6, %s2614_s24 }
  0x29   : > { %p2618_p3 = pneg %p2617_p2  ;;  %p2624_p8 = por %p2623_p6, %p2622_p4 }
  0x2b   : > { %p2625_p0 = pnand %p2624_p8, %p2618_p3 }
  0x2d   : > { %2628 = shalt.err (!%p2625_p0)
}
  0x2e   : > { %s3735_s7 = smov 384   ;;  %s3736_s9 = smov 24  }
  0x2f   : > { %2468 = dma.hbm_to_vmem [thread:$0]  (!%p2866_p5), %s2874_s8, 1536, %s2876_s10, %s2880_s11, %s3735_s7, %s3735_s7, %s3736_s9  }
  0x30   : > { %s3737_s12 = smul.u32 3, %s2863_s27  ;;  %s3754_s3 = sld [smem:[#allocation19_spill]] }
  0x31   : > { %s3738_s14 = smul.u32 48, %s2781_s21  ;;  %s2924_s28 = sadd.s32 4294967295, %s2781_s21  }
  0x32   : > { %s250_s23 = scalar_lea.vmem [#allocation8], %s3737_s12  ;;  %s2928_s30 = scalar_lea.sflag [#allocation9], %s204_s26 }
  0x33   : > { %s258_s24 = sshll.u32 %s250_s23, 4  ;;  %s259_s24 = int_to_ptr.vmem [resolvable:$true] %s258_s24 }
  0x36   : > { %s2919_s17 = scalar_lea.hbm %s3754_s3, %s3738_s14  ;;  %s2634_s15 = scalar_lea.hbm %s3754_s3, 96 }
  0x37   : > { %s2629_s8 = scalar_lea.hbm %s2919_s17, 48  ;;  %p2635_p11 = scmp.lt.s32.totalorder %s2919_s17, %s3754_s3 }
  0x38   : > { %p2630_p0 = scmp.ne.s32.totalorder %s2919_s17, %s2629_s8  ;;  %p2636_p12 = scmp.lt.s32.totalorder %s2634_s15, %s2629_s8 }
  0x3a   : > { %p2632_p9 = pnand %p2630_p0, %p2886_p7  ;;  %p2637_p13 = por %p2636_p12, %p2635_p11 }
  0x3c   : > { %p2633_p10 = pneg %p2632_p9 }
  0x3e   : > { %p2638_p1 = pnand %p2637_p13, %p2633_p10 }
  0x40   : > { %2641 = shalt.err (!%p2638_p1)
}
  0x41   : > { %s2642_s23 = scalar_lea.vmem %s259_s24, 48  ;;  %s2786_s26 = smov [#allocation8]  }
  0x42   : > { %p2643_p2 = scmp.ne.s32.totalorder %s259_s24, %s2642_s23  ;;  %s2647_s9 = sshll.u32 %s2786_s26, 4  ;;  %s2648_s9 = int_to_ptr.vmem [resolvable:$false] %s2647_s9 }
  0x43   : > { %s2649_s12 = scalar_lea.vmem %s2648_s9, 96  ;;  %p2650_p6 = scmp.lt.s32.totalorder %s259_s24, %s2648_s9 }
  0x44   : > { %p2645_p3 = pnand %p2643_p2, %p2886_p7  ;;  %p2651_p8 = scmp.lt.s32.totalorder %s2649_s12, %s2642_s23 }
  0x46   : > { %p2646_p4 = pneg %p2645_p3  ;;  %p2652_p0 = por %p2651_p8, %p2650_p6 }
  0x48   : > { %p2653_p9 = pnand %p2652_p0, %p2646_p4 }
  0x4a   : > { %2656 = shalt.err (!%p2653_p9)
}
  0x4b   : > { %2474 = dma.hbm_to_vmem [thread:$0]  (!%p2866_p5), %s2919_s17, 48, %s259_s24, %s2928_s30  }
  0x4c   : > { %p63_p10 = scmp.ne.s32.totalorder %s2773_s19, %s2769_s18  ;;  %p3742_p11 = scmp.eq.s32.totalorder %s2924_s28, 0 }
  0x4d   : > { %p165_p12 = scmp.eq.s32.totalorder %s2924_s28, 1  ;;  %p2139_p13 = scmp.ge.s32.totalorder %s2781_s21, 1 }
  0x4e   : > { %p2954_p1 = por %p3742_p11, %p63_p10  ;;  %p178_p2 = scmp.lt.s32.totalorder %s2781_s21, 3 }
  0x4f   : > { %p3756_p3 = scmp.ne.s32.totalorder %s2777_s20, %s2773_s19  ;;  %s2787_s18 = smov [#allocation3]  }
  0x50   : > { %s3755_s7 = scalar_select %p2954_p1, 1, 0 }
  0x51   : > { %p2962_p4 = por %p165_p12, %p3756_p3  ;;  %p2966_p6 = pnand %p2139_p13, %p178_p2 }
  0x52   : > { %s190_s17 = sshll.u32 %s2787_s18, 4  ;;  %s2440_s24 = smul.u32 384, %s2863_s27  ;;  %s191_s17 = int_to_ptr.vmem [resolvable:$true] %s190_s17 }
  0x53   : > { %s3757_s9 = scalar_select %p2962_p4, 1, 0 }
  0x54   : > { %s3758_s12 = scalar_select %p2966_p6, 1, 0 }
  0x55   : > { %p2461_p8 = pneg %p2966_p6  ;;  %s2441_s10 = smul.u32 6144, %s2781_s21 }
  0x56   : > { %s2668_s23 = scalar_lea.vmem %s191_s17, 256  ;;  %p2676_p2 = scmp.lt.s32.totalorder %s191_s17, %s191_s17 }
  0x57   : > { %p2975_p0 = pnand %p2461_p8, %p3742_p11  ;;  %s2983_s16 = scalar_lea.hbm %s3730_s2, %s2441_s10 }
  0x58   : > { %p2669_p10 = scmp.ne.s32.totalorder %s191_s17, %s2668_s23  ;;  %p2677_p3 = scmp.lt.s32.totalorder %s2668_s23, %s2668_s23 }
  0x59   : > { %p2659_p9 = pneg %p2975_p0 }
  0x5a   : > { %p2678_p4 = por %p2677_p3, %p2676_p2 }
  0x5b   : > { %p2671_p12 = pnand %p2669_p10, %p2659_p9 }
  0x5d   : > { %p2672_p13 = pneg %p2671_p12 }
  0x5f   : > { %p2679_p8 = pnand %p2678_p4, %p2672_p13 }
  0x61   : > { %2682 = shalt.err (!%p2679_p8)
}
  0x62   : > { %s2788_s26 = smov 128   ;;  %s2789_s18 = smov 8  }
  0x63   : > { %2464 = dma.hbm_to_vmem [thread:$0]  (!%p2975_p0), %s3728_s0, 256, %s191_s17, [#allocation4], %s2788_s26, %s2788_s26, %s2789_s18  }
  0x64   : > { %s229_s15 = scalar_lea.vmem [#allocation7], %s2440_s24  ;;  %s3760_s23 = smul.u32 48, %s2781_s21 }
  0x65   : > { %s236_s14 = sshll.u32 %s229_s15, 4  ;;  %s3761_s20 = smul.u32 3, %s2863_s27  ;;  %s2999_s14 = int_to_ptr.vmem [resolvable:$true] %s236_s14 }
  0x66   : > { %s2997_s25 = scalar_lea.hbm %s3732_s4, %s3760_s23  ;;  %s2683_s8 = scalar_lea.hbm %s2983_s16, 6144 }
  0x67   : > { %s3003_s22 = scalar_lea.vmem [#allocation10], %s3761_s20  ;;  %p2684_p4 = scmp.ne.s32.totalorder %s2983_s16, %s2683_s8 }
  0x68   : > { %s277_s5 = sshll.u32 %s3003_s22, 4  ;;  %s2688_s21 = scalar_lea.hbm %s3730_s2, 12288  ;;  %s278_s5 = int_to_ptr.vmem [resolvable:$true] %s277_s5 }
  0x69   : > { %p2686_p9 = pnand %p2684_p4, %p2886_p7  ;;  %p2689_p10 = scmp.lt.s32.totalorder %s2983_s16, %s3730_s2 }
  0x6a   : > { %p2690_p12 = scmp.lt.s32.totalorder %s2688_s21, %s2683_s8 }
  0x6b   : > { %p2687_p0 = pneg %p2686_p9 }
  0x6c   : > { %p2691_p13 = por %p2690_p12, %p2689_p10 }
  0x6e   : > { %p2692_p2 = pnand %p2691_p13, %p2687_p0 }
  0x70   : > { %2695 = shalt.err (!%p2692_p2)
}
  0x71   : > { %s2696_s3 = scalar_lea.vmem %s2999_s14, 6144  ;;  %s2790_s20 = smov [#allocation7]  }
  0x72   : > { %p2697_p3 = scmp.ne.s32.totalorder %s2999_s14, %s2696_s3  ;;  %s2701_s27 = sshll.u32 %s2790_s20, 4  ;;  %s2702_s27 = int_to_ptr.vmem [resolvable:$false] %s2701_s27 }
  0x73   : > { %s2703_s18 = scalar_lea.vmem %s2702_s27, 12288  ;;  %p2704_p9 = scmp.lt.s32.totalorder %s2999_s14, %s2702_s27 }
  0x74   : > { %p2699_p8 = pnand %p2697_p3, %p2886_p7  ;;  %p2705_p11 = scmp.lt.s32.totalorder %s2703_s18, %s2696_s3 }
  0x76   : > { %p2700_p4 = pneg %p2699_p8  ;;  %p2706_p1 = por %p2705_p11, %p2704_p9 }
  0x78   : > { %p2707_p6 = pnand %p2706_p1, %p2700_p4 }
  0x7a   : > { %2710 = shalt.err (!%p2707_p6)
}
  0x7b   : > { %s3762_s10 = smov 24   ;;  %s3763_s6 = smov 384  }
  0x7c   : > { %2471 = dma.hbm_to_vmem [thread:$0]  (!%p2866_p5), %s2983_s16, 6144, %s2999_s14, %s2880_s11, %s3763_s6, %s3763_s6, %s3762_s10  }
  0x7d   : > { %s2711_s15 = scalar_lea.hbm %s2997_s25, 48  ;;  %s2716_s17 = scalar_lea.hbm %s3732_s4, 96 }
  0x7e   : > { %p2712_p11 = scmp.ne.s32.totalorder %s2997_s25, %s2711_s15  ;;  %p2717_p0 = scmp.lt.s32.totalorder %s2997_s25, %s3732_s4 }
  0x7f   : > { %p2718_p10 = scmp.lt.s32.totalorder %s2716_s17, %s2711_s15 }
  0x80   : > { %p2714_p1 = pnand %p2712_p11, %p2886_p7 }
  0x81   : > { %p2719_p12 = por %p2718_p10, %p2717_p0 }
  0x82   : > { %p2715_p6 = pneg %p2714_p1 }
  0x84   : > { %p2720_p13 = pnand %p2719_p12, %p2715_p6 }
  0x86   : > { %2723 = shalt.err (!%p2720_p13)
}
  0x87   : > { %s2724_s11 = scalar_lea.vmem %s278_s5, 48  ;;  %s2791_s22 = smov [#allocation10]  }
  0x88   : > { %p2725_p2 = scmp.ne.s32.totalorder %s278_s5, %s2724_s11  ;;  %s2729_s14 = sshll.u32 %s2791_s22, 4  ;;  %s2730_s14 = int_to_ptr.vmem [resolvable:$false] %s2729_s14 }
  0x89   : > { %s2731_s16 = scalar_lea.vmem %s2730_s14, 96  ;;  %p2732_p4 = scmp.lt.s32.totalorder %s278_s5, %s2730_s14 }
  0x8a   : > { %p2727_p3 = pnand %p2725_p2, %p2886_p7  ;;  %p2733_p9 = scmp.lt.s32.totalorder %s2731_s16, %s2724_s11 }
  0x8c   : > { %p2728_p8 = pneg %p2727_p3  ;;  %p2734_p11 = por %p2733_p9, %p2732_p4 }
  0x8e   : > { %p2735_p1 = pnand %p2734_p11, %p2728_p8 }
  0x90   : > { %2738 = shalt.err (!%p2735_p1)
}
  0x91   : > { %2477 = dma.hbm_to_vmem [thread:$0]  (!%p2866_p5), %s2997_s25, 48, %s278_s5, %s2928_s30  }
  0x92   : > { %p3764_p6 = scmp.ne.s32.totalorder %s3758_s12, 0 }
  0x93   : > { %p3765_p7 = scmp.eq.s32.totalorder (!%p3764_p6), %s2924_s28, 0 }
  0x94   : > { %286 = sbr.rel (%p3764_p6) target bundleno = 2238 (0x8be), region = 40 }
  0x99   : > { %2756 = dma.done.wait (%p3765_p7), [#allocation4], 256   ;;  %p3766_p0 = pmov %p3765_p7 }
  0x9a   : > { %s292_s13 = sand.u32 1, %s2924_s28   ;;  %s3057_s26 = sand.u32 1, %s2773_s19  }
  0x9b   : > { %2758 = vsyncadd (%p3766_p0), [#allocation4], 4294967040  ;;  %s2446_s29 = smul.u32 96, %s3057_s26  ;;  %s293_s1 = scalar_lea.sflag [#allocation6], %s292_s13 }
  0x9c   : > { %p3767_p5 = scmp.ne.s32.totalorder %s3755_s7, 0 }
  0x9d   : > { %s3060_s3 = scalar_lea.vmem [#allocation5], %s2446_s29 }
  0x9e   : > { %2760 = dma.done.wait (%p3767_p5), %s293_s1, 7680  }
  0x9f   : > { %2762 = vsyncadd (%p3767_p5), %s293_s1, 4294959616  ;;  %s2447_s5 = smul.u32 384, %s3057_s26  ;;  %s311_s12 = scalar_lea.sflag [#allocation9], %s292_s13 }
  0xa0   : > { %s2448_s25 = smul.u32 3, %s3057_s26 }
  0xa1   : > { %s3068_s30 = scalar_lea.vmem [#allocation7], %s2447_s5 }
  0xa2   : > { %s3072_s20 = scalar_lea.vmem [#allocation8], %s2448_s25 }
  0xa3   : > { %2764 = dma.done.wait (%p3767_p5), %s311_s12, 96  }
  0xa4   : > { %2766 = vsyncadd (%p3767_p5), %s311_s12, 4294967200  ;;  %v2792_v0 = vmov 0.0   ;;  %v2793_v1 = vmov 0   ;;  %vm2794_vm0 = vmmov 0   ;;  %v375_v2 = vld [vmem:[%s3060_s3 + $0x38] sm:$0xff]  ;;  %v378_v3 = vld [vmem:[%s3060_s3 + $0x50] sm:$0xff]  ;;  %p3768_p10 = pmov %p3766_p0  ;;  %p3769_p12 = pmov %p3766_p0 }
  0xa5   : > { %2270 = vmatprep.subr.bf16.mxu1 %v2792_v0  ;;  %439 = vmatprep.mubr.bf16.mxu0 %v2793_v1  ;;  %v374_v4 = vld [vmem:[%s3060_s3 + $0x30] sm:$0xff]  ;;  %v384_v5 = vpack.c.bf16 %v378_v3, %v375_v2  ;;  %v377_v6 = vld [vmem:[%s3060_s3 + $0x48] sm:$0xff]  ;;  %v376_v7 = vld [vmem:[%s3060_s3 + $0x40] sm:$0xff]  ;;  %vm403_vm1 = vcmask 261120   ;;  %s323_s21 = scalar_lea.vmem [#allocation10], %s2448_s25  ;;  %vm623_vm2 = vcmask 1040384   ;;  %p3770_p13 = pmov %p3766_p0 }
  0xa6   : > { %2274 = vmatprep.mubr.msk.bf16.mxu1 %vm2794_vm0, %v2792_v0  ;;  %v379_v8 = vld [vmem:[%s3060_s3 + $0x58] sm:$0xff]  ;;  %v383_v9 = vpack.c.bf16 %v377_v6, %v374_v4  ;;  %v369_v11 = vld [vmem:[%s3060_s3 + $0x8] sm:$0xff]  ;;  %v372_v12 = vld [vmem:[%s3060_s3 + $0x20] sm:$0xff]  ;;  %s3277_s7 = scalar_select %p3768_p10, 0, 7 }
  0xa7   : > { %v385_v10 = vpack.c.bf16 %v379_v8, %v376_v7  ;;  %v368_v13 = vld [vmem:[%s3060_s3] sm:$0xff]  ;;  %419 = vmatprep.subr.bf16.mxu0 %v384_v5  ;;  %v381_v14 = vpack.c.bf16 %v372_v12, %v369_v11  ;;  %v371_v15 = vld [vmem:[%s3060_s3 + $0x18] sm:$0xff]  ;;  %v370_v16 = vld [vmem:[%s3060_s3 + $0x10] sm:$0xff]  ;;  %s2148_s14 = sshll.u32 %s3057_s26, 4  ;;  %p3771_p2 = pmov %p3766_p0 }
  0xa8   : > { %v373_v17 = vld [vmem:[%s3060_s3 + $0x28] sm:$0xff]  ;;  %420 = vmatpush1.bf16.msra.mxu0 %v383_v9  ;;  %v380_v18 = vpack.c.bf16 %v371_v15, %v368_v13  ;;  %v365_v20 = vld [vmem:[#allocation3] sm:$0xff]  ;;  %v366_v21 = vld [vmem:[#allocation3 + $0x8] sm:$0xff]  ;;  %s581_s27 = sadd.s32 8, %s3277_s7  ;;  %s572_s10 = sshra.s32 %s3277_s7, 3 }
  0xa9   : > { %2271 = vmatpush3.bf16.msra.mxu1 %v385_v10  ;;  %v382_v19 = vpack.c.bf16 %v373_v17, %v370_v16  ;;  %v540_v22 = vld [vmem:[%s3068_s30 + $0x158] sm:$0xff]  ;;  %421 = vmatprep.subr.bf16.mxu0 %v381_v14  ;;  %v543_v23 = vld [vmem:[%s3068_s30 + $0x170] sm:$0xff]  ;;  %v542_v25 = vld [vmem:[%s3068_s30 + $0x168] sm:$0xff]  ;;  %v367_v29 = vpack.c.bf16 %v366_v21, %v365_v20  ;;  %s582_s18 = sshra.s32 %s581_s27, 3  ;;  %s585_s15 = sand.u32 7, %s581_s27 }
  0xaa   : > { %2272 = vmatprep.subr.bf16.mxu1 %v2792_v0  ;;  %v539_v24 = vld [vmem:[%s3068_s30 + $0x150] sm:$0xff]  ;;  %v3099_v26 = vpack.c.bf16 %v543_v23, %v540_v22  ;;  %v534_v27 = vld [vmem:[%s3068_s30 + $0x128] sm:$0xff]  ;;  %v537_v28 = vld [vmem:[%s3068_s30 + $0x140] sm:$0xff]  ;;  %s2152_s6 = smul.u32 24, %s582_s18  ;;  %s575_s8 = sand.u32 7, %s3277_s7 }
  0xab   : > { %v3103_v30 = vpack.c.bf16 %v542_v25, %v539_v24  ;;  %v3106_v31 = vpack.c.bf16 %v537_v28, %v534_v27  ;;  %v533_v32 = vld [vmem:[%s3068_s30 + $0x120] sm:$0xff]  ;;  %v536_v33 = vld [vmem:[%s3068_s30 + $0x138] sm:$0xff]  ;;  %v531_v35 = vld [vmem:[%s3068_s30 + $0x110] sm:$0xff]  ;;  %s2151_s23 = smul.u32 24, %s572_s10  ;;  %s3306_s16 = scalar_lea.vmem [#allocation11], %s2148_s14 }
  0xac   : > { %422 = vmatpush1.bf16.msra.mxu0 %v380_v18  ;;  %v528_v34 = vld [vmem:[%s3068_s30 + $0xf8] sm:$0xff]  ;;  %v3114_v36 = vpack.c.bf16 %v536_v33, %v533_v32  ;;  %v527_v38 = vld [vmem:[%s3068_s30 + $0xf0] sm:$0xff]  ;;  %v530_v39 = vld [vmem:[%s3068_s30 + $0x108] sm:$0xff]  ;;  %s588_s17 = sadd.s32 %s2152_s6, %s585_s15  ;;  %s745_s13 = scalar_lea.vmem %s3306_s16, %s3277_s7 [#allocation11] }
  0xad   : > { %2273 = vmatpush3.bf16.msra.mxu1 %v382_v19  ;;  %643 = vmatprep.subr.bf16.mxu0 %v3099_v26  ;;  %v3118_v37 = vpack.c.bf16 %v531_v35, %v528_v34  ;;  %v522_v40 = vld [vmem:[%s3068_s30 + $0xc8] sm:$0xff]  ;;  %v525_v41 = vld [vmem:[%s3068_s30 + $0xe0] sm:$0xff]  ;;  %v544_v43 = vld [vmem:[%s3068_s30 + $0x178] sm:$0xff]  ;;  %v3129_v44 = vpack.c.bf16 %v530_v39, %v527_v38  ;;  %v388_v38 = vlaneseq  ;;  %s578_s24 = sadd.s32 %s2151_s23, %s575_s8  ;;  %s589_s11 = scalar_lea.vmem [#allocation2], %s588_s17 }
  0xae   : > { %2278 = vmatprep.subr.bf16.mxu1 %v2792_v0  ;;  %v541_v42 = vld [vmem:[%s3068_s30 + $0x160] sm:$0xff]  ;;  %v535_v46 = vld [vmem:[%s3068_s30 + $0x130] sm:$0xff]  ;;  %v538_v47 = vld [vmem:[%s3068_s30 + $0x148] sm:$0xff]  ;;  %v3136_v48 = vpack.c.bf16 %v525_v41, %v522_v40  ;;  %s579_s22 = scalar_lea.vmem [#allocation2], %s578_s24  ;;  %p3772_p3 = pmov %p3766_p0 }
  0xaf   : > { %2149 = vmatmul.mubr.msk.bf16.vlgmr.msra.gmra.mxu0 %vm403_vm1, %v367_v29  ;;  %v3131_v45 = vpack.c.bf16 %v544_v43, %v541_v42  ;;  %v521_v49 = vld [vmem:[%s3068_s30 + $0xc0] sm:$0xff]  ;;  %v524_v50 = vld [vmem:[%s3068_s30 + $0xd8] sm:$0xff]  ;;  %v519_v52 = vld [vmem:[%s3068_s30 + $0xb0] sm:$0xff]  ;;  %v3143_v53 = vpack.c.bf16 %v538_v47, %v535_v46  ;;  %v389_v39 = vshrl.u32 %v388_v38, 7  ;;  %s3353_s26 = scalar_select %p3769_p12, 1, 6 }
  0xb0   : > { %2275 = vmatmul.mubr.msk.bf16.vlgmr.msra.gmra.mxu1 %vm403_vm1, %v367_v29  ;;  %644 = vmatpush1.bf16.msra.mxu0 %v3103_v30  ;;  %v516_v51 = vld [vmem:[%s3068_s30 + $0x98] sm:$0xff]  ;;  %v529_v54 = vld [vmem:[%s3068_s30 + $0x100] sm:$0xff]  ;;  %v3149_v56 = vpack.c.bf16 %v524_v50, %v521_v49  ;;  %v515_v58 = vld [vmem:[%s3068_s30 + $0x90] sm:$0xff]  ;;  %s3416_s6 = scalar_select %p3770_p13, 2, 5 }
  0xb1   : > { %675 = vmatprep.mubr.bf16.mxu0 %v2793_v1  ;;  %645 = vmatprep.subr.bf16.mxu0 %v3106_v31  ;;  %v532_v55 = vld [vmem:[%s3068_s30 + $0x118] sm:$0xff]  ;;  %v3152_v57 = vpack.c.bf16 %v519_v52, %v516_v51  ;;  %v518_v59 = vld [vmem:[%s3068_s30 + $0xa8] sm:$0xff]  ;;  %v513_v61 = vld [vmem:[%s3068_s30 + $0x80] sm:$0xff]  ;;  %v3265_v40 = vsub.s32 0, %v389_v39  ;;  %v3267_v41 = vsub.s32 2, %v389_v39  ;;  %v3270_v43 = vsub.s32 1, %v389_v39  ;;  %s907_s10 = scalar_lea.vmem %s3306_s16, %s3353_s26 [#allocation11]  ;;  %p3773_p8 = pmov %p3766_p0 }
  0xb2   : > { %2294 = vmatprep.mubr.msk.bf16.mxu1 %vm2794_vm0, %v2792_v0  ;;  %2279 = vmatpush3.bf16.msra.mxu1 %v3131_v45  ;;  %v510_v60 = vld [vmem:[%s3068_s30 + $0x68] sm:$0xff]  ;;  %v3159_v62 = vpack.c.bf16 %v532_v55, %v529_v54  ;;  %v523_v63 = vld [vmem:[%s3068_s30 + $0xd0] sm:$0xff]  ;;  %v3165_v3 = vpack.c.bf16 %v518_v59, %v515_v58  ;;  %v509_v5 = vld [vmem:[%s3068_s30 + $0x60] sm:$0xff]  ;;  %s759_s29 = sadd.s32 8, %s3353_s26  ;;  %s750_s3 = sshra.s32 %s3353_s26, 3 }
  0xb3   : > { %2280 = vmatprep.subr.bf16.mxu1 %v2792_v0  ;;  %v526_v2 = vld [vmem:[%s3068_s30 + $0xe8] sm:$0xff]  ;;  %v3168_v4 = vpack.c.bf16 %v513_v61, %v510_v60  ;;  %v512_v6 = vld [vmem:[%s3068_s30 + $0x78] sm:$0xff]  ;;  %v507_v8 = vld [vmem:[%s3068_s30 + $0x50] sm:$0xff]  ;;  %s760_s1 = sshra.s32 %s759_s29, 3  ;;  %s763_s25 = sand.u32 7, %s759_s29 }
  0xb4   : > { %646 = vmatpush1.bf16.msra.mxu0 %v3114_v36  ;;  %v504_v7 = vld [vmem:[%s3068_s30 + $0x38] sm:$0xff]  ;;  %v3175_v9 = vpack.c.bf16 %v526_v2, %v523_v63  ;;  %v517_v10 = vld [vmem:[%s3068_s30 + $0xa0] sm:$0xff]  ;;  %v3181_v12 = vpack.c.bf16 %v512_v6, %v509_v5  ;;  %v503_v14 = vld [vmem:[%s3068_s30 + $0x30] sm:$0xff]  ;;  %s2157_s5 = smul.u32 24, %s760_s1  ;;  %s753_s12 = sand.u32 7, %s3353_s26 }
  0xb5   : > { %647 = vmatprep.subr.bf16.mxu0 %v3118_v37  ;;  %v520_v11 = vld [vmem:[%s3068_s30 + $0xb8] sm:$0xff]  ;;  %v3184_v13 = vpack.c.bf16 %v507_v8, %v504_v7  ;;  %v506_v15 = vld [vmem:[%s3068_s30 + $0x48] sm:$0xff]  ;;  %v501_v17 = vld [vmem:[%s3068_s30 + $0x20] sm:$0xff]  ;;  %s921_s15 = sadd.s32 8, %s3416_s6  ;;  %s912_s8 = sshra.s32 %s3416_s6, 3 }
  0xb6   : > { %2281 = vmatpush3.bf16.msra.mxu1 %v3143_v53  ;;  %v498_v16 = vld [vmem:[%s3068_s30 + $0x8] sm:$0xff]  ;;  %v3191_v18 = vpack.c.bf16 %v520_v11, %v517_v10  ;;  %v511_v19 = vld [vmem:[%s3068_s30 + $0x70] sm:$0xff]  ;;  %v3197_v21 = vpack.c.bf16 %v506_v15, %v503_v14  ;;  %v497_v23 = vld [vmem:[%s3068_s30] sm:$0xff]  ;;  %s922_s23 = sshra.s32 %s921_s15, 3  ;;  %s925_s24 = sand.u32 7, %s921_s15 }
  0xb7   : > { %2282 = vmatprep.subr.bf16.mxu1 %v2792_v0  ;;  %v514_v20 = vld [vmem:[%s3068_s30 + $0x88] sm:$0xff]  ;;  %v3200_v22 = vpack.c.bf16 %v501_v17, %v498_v16  ;;  %v500_v24 = vld [vmem:[%s3068_s30 + $0x18] sm:$0xff]  ;;  %v505_v27 = vld [vmem:[%s3068_s30 + $0x40] sm:$0xff]  ;;  %s2162_s17 = smul.u32 24, %s922_s23  ;;  %s1069_s29 = scalar_lea.vmem %s3306_s16, %s3416_s6 [#allocation11] }
  0xb8   : > { %648 = vmatpush1.bf16.msra.mxu0 %v3129_v44  ;;  %v3205_v25 = vpack.c.bf16 %v514_v20, %v511_v19  ;;  %v508_v28 = vld [vmem:[%s3068_s30 + $0x58] sm:$0xff]  ;;  %v3211_v29 = vpack.c.bf16 %v500_v24, %v497_v23  ;;  %v499_v33 = vld [vmem:[%s3068_s30 + $0x10] sm:$0xff]  ;;  %v502_v34 = vld [vmem:[%s3068_s30 + $0x28] sm:$0xff]  ;;  %s2156_s30 = smul.u32 24, %s750_s3  ;;  %p3774_p4 = pmov %p3766_p0 }
  0xb9   : > { %649 = vmatprep.subr.bf16.mxu0 %v3136_v48  ;;  %v3215_v32 = vpack.c.bf16 %v508_v28, %v505_v27  ;;  %v3223_v35 = vpack.c.bf16 %v502_v34, %v499_v33  ;;  %v386_v42 = vld [vmem:[%s3072_s20] sm:$0x7]  ;;  %v569_v8 = vld [vmem:[%s323_s21] sm:$0x7]  ;;  %s766_s20 = sadd.s32 %s2157_s5, %s763_s25  ;;  %s2161_s21 = smul.u32 24, %s912_s8 }
  0xba   : > { %2283 = vmatpush3.bf16.msra.mxu1 %v3159_v62  ;;  %v391_v46 = vrot.slane %v386_v42, %v3265_v40  ;;  %v399_v47 = vrot.slane %v386_v42, %v3267_v41  ;;  %v395_v49 = vrot.slane %v386_v42, %v3270_v43  ;;  %v3285_v14 = vrot.slane %v569_v8, %v3265_v40  ;;  %s756_s7 = sadd.s32 %s2156_s30, %s753_s12  ;;  %s767_s27 = scalar_lea.vmem [#allocation2], %s766_s20 }
  0xbb   : > { %2284 = vmatprep.subr.bf16.mxu1 %v2792_v0  ;;  %v3291_v20 = vrot.slane %v569_v8, %v3270_v43  ;;  %s757_s18 = scalar_lea.vmem [#allocation2], %s756_s7  ;;  %p3775_p9 = pmov %p3766_p0 }
  0xbc   : > { %650 = vmatpush1.bf16.msra.mxu0 %v3149_v56  ;;  %s3479_s1 = scalar_select %p3771_p2, 3, 4 }
  0xbd   : > { %651 = vmatprep.subr.bf16.mxu0 %v3152_v57  ;;  %s3542_s23 = scalar_select %p3772_p3, 4, 3 }
  0xbe   : > { %2285 = vmatpush3.bf16.msra.mxu1 %v3175_v9  ;;  %s1083_s3 = sadd.s32 8, %s3479_s1  ;;  %s1074_s25 = sshra.s32 %s3479_s1, 3 }
  0xbf   : > { %2286 = vmatprep.subr.bf16.mxu1 %v2792_v0  ;;  %s1084_s5 = sshra.s32 %s1083_s3, 3  ;;  %s1087_s12 = sand.u32 7, %s1083_s3 }
  0xc0   : > { %652 = vmatpush1.bf16.msra.mxu0 %v3165_v3  ;;  %s2167_s30 = smul.u32 24, %s1084_s5  ;;  %s1077_s7 = sand.u32 7, %s3479_s1 }
  0xc1   : > { %653 = vmatprep.subr.bf16.mxu0 %v3168_v4  ;;  %s2166_s20 = smul.u32 24, %s1074_s25  ;;  %s1231_s15 = scalar_lea.vmem %s3306_s16, %s3479_s1 [#allocation11] }
  0xc2   : > { %2287 = vmatpush3.bf16.msra.mxu1 %v3191_v18  ;;  %s1245_s8 = sadd.s32 8, %s3542_s23  ;;  %s1393_s3 = scalar_lea.vmem %s3306_s16, %s3542_s23 [#allocation11] }
  0xc3   : > { %2288 = vmatprep.subr.bf16.mxu1 %v2792_v0  ;;  %s3605_s5 = scalar_select %p3773_p8, 5, 2 }
  0xc4   : > { %654 = vmatpush1.bf16.msra.mxu0 %v3181_v12  ;;  %p3776_p11 = scmp.ne.s32.totalorder %s3757_s9, 0 }
  0xc5   : > { %655 = vmatprep.subr.bf16.mxu0 %v3184_v13  ;;  %s1407_s25 = sadd.s32 8, %s3605_s5 }
  0xc6   : > { %2289 = vmatpush3.bf16.msra.mxu1 %v3205_v25 }
  0xc7   : > { %2290 = vmatprep.subr.bf16.mxu1 %v2792_v0 }
  0xc8   : > { %656 = vmatpush1.bf16.msra.mxu0 %v3197_v21 }
  0xc9   : > { %657 = vmatprep.subr.bf16.mxu0 %v3200_v22 }
  0xca   : > { %2291 = vmatpush3.bf16.msra.mxu1 %v3215_v32 }
  0xcb   : > { %2292 = vmatprep.subr.bf16.mxu1 %v2792_v0 }
  0xcc   : > { %658 = vmatpush1.bf16.msra.mxu0 %v3211_v29 }
  0xcd   : > { %805 = vmatprep.subr.bf16.mxu0 %v3099_v26 }
  0xce   : > { %2293 = vmatpush3.bf16.msra.mxu1 %v3223_v35 }
  0xcf   : > { %676 = vmatmul.mubr.bf16.vlgmr.msra.gmra.mxu0 %v2793_v1  ;;  %2298 = vmatprep.subr.bf16.mxu1 %v2792_v0 }
  0xd0   : > { %806 = vmatpush1.bf16.msra.mxu0 %v3103_v30  ;;  %837 = vmatprep.mubr.bf16.mxu0 %v2793_v1 }
  0xd1   : > { %807 = vmatprep.subr.bf16.mxu0 %v3106_v31  ;;  %2295 = vmatmul.mubr.bf16.vlgmr.msra.gmra.mxu1 %v2793_v1 }
  0xd2   : > { %2299 = vmatpush3.bf16.msra.mxu1 %v3131_v45  ;;  %2314 = vmatprep.mubr.msk.bf16.mxu1 %vm2794_vm0, %v2792_v0 }
  0xd3   : > { %2300 = vmatprep.subr.bf16.mxu1 %v2792_v0 }
  0xd4   : > { %808 = vmatpush1.bf16.msra.mxu0 %v3114_v36 }
  0xd5   : > { %809 = vmatprep.subr.bf16.mxu0 %v3118_v37 }
  0xd6   : > { %2301 = vmatpush3.bf16.msra.mxu1 %v3143_v53 }
  0xd7   : > { %2302 = vmatprep.subr.bf16.mxu1 %v2792_v0 }
  0xd8   : > { %810 = vmatpush1.bf16.msra.mxu0 %v3129_v44 }
  0xd9   : > { %811 = vmatprep.subr.bf16.mxu0 %v3136_v48 }
  0xda   : > { %2303 = vmatpush3.bf16.msra.mxu1 %v3159_v62 }
  0xdb   : > { %2304 = vmatprep.subr.bf16.mxu1 %v2792_v0 }
  0xdc   : > { %812 = vmatpush1.bf16.msra.mxu0 %v3149_v56 }
  0xdd   : > { %813 = vmatprep.subr.bf16.mxu0 %v3152_v57 }
  0xde   : > { %2305 = vmatpush3.bf16.msra.mxu1 %v3175_v9 }
  0xdf   : > { %2306 = vmatprep.subr.bf16.mxu1 %v2792_v0 }
  0xe0   : > { %814 = vmatpush1.bf16.msra.mxu0 %v3165_v3 }
  0xe1   : > { %815 = vmatprep.subr.bf16.mxu0 %v3168_v4 }
  0xe2   : > { %2307 = vmatpush3.bf16.msra.mxu1 %v3191_v18 }
  0xe3   : > { %2308 = vmatprep.subr.bf16.mxu1 %v2792_v0 }
  0xe4   : > { %816 = vmatpush1.bf16.msra.mxu0 %v3181_v12 }
  0xe5   : > { %817 = vmatprep.subr.bf16.mxu0 %v3184_v13 }
  0xe6   : > { %2309 = vmatpush3.bf16.msra.mxu1 %v3205_v25 }
  0xe7   : > { %2310 = vmatprep.subr.bf16.mxu1 %v2792_v0 }
  0xe8   : > { %818 = vmatpush1.bf16.msra.mxu0 %v3197_v21 }
  0xe9   : > { %819 = vmatprep.subr.bf16.mxu0 %v3200_v22 }
  0xea   : > { %2311 = vmatpush3.bf16.msra.mxu1 %v3215_v32 }
  0xeb   : > { %2312 = vmatprep.subr.bf16.mxu1 %v2792_v0 }
  0xec   : > { %820 = vmatpush1.bf16.msra.mxu0 %v3211_v29 }
  0xed   : > { %967 = vmatprep.subr.bf16.mxu0 %v3099_v26 }
  0xee   : > { %2313 = vmatpush3.bf16.msra.mxu1 %v3223_v35 }
  0xef   : > { %2318 = vmatprep.subr.bf16.mxu1 %v2792_v0 }
 0x16f   : > { %v441_v50 = vpop.f32.mrf.mxu0 }
 0x170   : > { %v484_v51 = vpop.f32.mrf.mxu1  ;;  %v442_v52 = vadd.f32 %v441_v50, %v391_v46 }
 0x171   : > { %v485_v54 = vadd.f32 %v484_v51, %v399_v47  ;;  %v443_v55 = vpop.f32.mrf.mxu0 }
 0x172   : > { %v2276_v58 = vpop.f32.mrf.mxu1  ;;  %491 = vst [vmem:[#allocation2] sm:$0xff] %v442_v52  ;;  %v444_v59 = vadd.f32 %v443_v55, %v395_v49 }
 0x173   : > { %493 = vst [vmem:[#allocation2 + $0x10] sm:$0xff] %v485_v54  ;;  %v445_v60 = vpop.f32.mrf.mxu0 }
 0x174   : > { %v487_v61 = vpop.f32.mrf.mxu1  ;;  %492 = vst [vmem:[#allocation2 + $0x8] sm:$0xff] %v444_v59  ;;  %v446_v63 = vadd.f32 %v445_v60, %v391_v46  ;;  %v3299_v59 = vrot.slane %v569_v8, %v3267_v41 }
 0x175   : > { %v488_v2 = vadd.f32 %v487_v61, %v399_v47  ;;  %v447_v5 = vpop.f32.mrf.mxu0 }
 0x176   : > { %v2277_v6 = vpop.f32.mrf.mxu1  ;;  %494 = vst [vmem:[#allocation2 + $0x18] sm:$0xff] %v446_v63  ;;  %v448_v7 = vadd.f32 %v447_v5, %v395_v49 }
 0x177   : > { %496 = vst [vmem:[#allocation2 + $0x28] sm:$0xff] %v488_v2 }
 0x178   : > { %495 = vst [vmem:[#allocation2 + $0x20] sm:$0xff] %v448_v7 }
 0x17f   : > { %v590_v10 = vld [vmem:[%s589_s11] ss:$8 sm:$0x7]  ;;  %s915_s11 = sand.u32 7, %s3416_s6 }
 0x180   : > { %v580_v11 = vld [vmem:[%s579_s22] ss:$8 sm:$0x7]  ;;  %v611_v15 = vrot.slane %v590_v10, %v3265_v40  ;;  %v615_v28 = vrot.slane %v590_v10, %v3270_v43  ;;  %v619_v2 = vrot.slane %v590_v10, %v3267_v41  ;;  %s928_s22 = sadd.s32 %s2162_s17, %s925_s24  ;;  %s918_s14 = sadd.s32 %s2161_s21, %s915_s11 }
 0x181   : > { %v595_v16 = vrot.slane %v580_v11, %v3265_v40  ;;  %v599_v39 = vrot.slane %v580_v11, %v3270_v43  ;;  %v603_v6 = vrot.slane %v580_v11, %v3267_v41  ;;  %s919_s26 = scalar_lea.vmem [#allocation2], %s918_s14  ;;  %s1246_s17 = sshra.s32 %s1245_s8, 3 }
 0x182   : > { %s1236_s24 = sshra.s32 %s3542_s23, 3  ;;  %s2172_s21 = smul.u32 24, %s1246_s17 }
 0x183   : > { %v624_v23 = vsel %vm623_vm2, %v595_v16, %v611_v15  ;;  %v625_v47 = vsel %vm623_vm2, %v599_v39, %v615_v28  ;;  %v626_v15 = vsel %vm623_vm2, %v603_v6, %v619_v2  ;;  %v758_v28 = vld [vmem:[%s757_s18] ss:$8 sm:$0x7]  ;;  %s1080_s18 = sadd.s32 %s2166_s20, %s1077_s7  ;;  %s1249_s11 = sand.u32 7, %s1245_s8 }
 0x184   : > { %s1081_s6 = scalar_lea.vmem [#allocation2], %s1080_s18  ;;  %s1239_s14 = sand.u32 7, %s3542_s23 }
 0x185   : > { %s1411_s7 = sand.u32 7, %s1407_s25  ;;  %s1401_s18 = sand.u32 7, %s3605_s5 }
 0x186   : > { %s1555_s8 = scalar_lea.vmem %s3306_s16, %s3605_s5 [#allocation11] }
 0x187   : > { %s3666_s17 = scalar_select %p3774_p4, 6, 1 }
 0x18f   : > { %v677_v17 = vpop.f32.mrf.mxu0 }
 0x190   : > { %v678_v19 = vadd.f32 %v677_v17, %v3285_v14 }
 0x191   : > { %v679_v24 = vpop.f32.mrf.mxu0  ;;  %v718_v46 = vpop.f32.mrf.mxu1 }
 0x192   : > { %v724_v27 = vadd.f32 %v678_v19, %v624_v23  ;;  %v680_v38 = vadd.f32 %v679_v24, %v3291_v20  ;;  %v719_v63 = vadd.f32 %v718_v46, %v3299_v59 }
 0x193   : > { %v681_v33 = vpop.f32.mrf.mxu0  ;;  %v2296_v49 = vpop.f32.mrf.mxu1 }
 0x194   : > { %v2153_v34 = vmul.f32 -1.442695, %v724_v27  ;;  %v731_v50 = vadd.f32 %v680_v38, %v625_v47  ;;  %v768_v27 = vld [vmem:[%s767_s27] ss:$8 sm:$0x7]  ;;  %s1090_s27 = sadd.s32 %s2167_s30, %s1087_s12  ;;  %s1408_s30 = sshra.s32 %s1407_s25, 3 }
 0x195   : > { %v682_v42 = vpop.f32.mrf.mxu0  ;;  %v721_v51 = vpop.f32.mrf.mxu1  ;;  %v789_v33 = vrot.slane %v768_v27, %v3265_v40  ;;  %s1398_s12 = sshra.s32 %s3605_s5, 3  ;;  %s2177_s20 = smul.u32 24, %s1408_s30 }
 0x196   : > { %2521 = vpow2.f32 %v2153_v34  ;;  %v2154_v54 = vmul.f32 -1.442695, %v731_v50  ;;  %v773_v34 = vrot.slane %v758_v28, %v3265_v40  ;;  %v793_v51 = vrot.slane %v768_v27, %v3270_v43  ;;  %s1717_s25 = scalar_lea.vmem %s3306_s16, %s3666_s17 [#allocation11] }
 0x197   : > { %v2297_v52 = vpop.f32.mrf.mxu1  ;;  %s3688_s30 = scalar_select %p3775_p9, 7, 0 }
 0x198   : > { %2523 = vpow2.f32 %v2154_v54  ;;  %v801_v46 = vsel %vm623_vm2, %v773_v34, %v789_v33 }
 0x1a3   : > { %v2522_v55 = vpop.eup %2521 }
 0x1a4   : > { %v728_v58 = vadd.f32 1.0, %v2522_v55 }
 0x1a5   : > { %v2524_v60 = vpop.eup %2523 }
 0x1a6   : > { %2525 = vrcp.f32 %v728_v58  ;;  %v735_v61 = vadd.f32 1.0, %v2524_v60  ;;  %v777_v60 = vrot.slane %v758_v28, %v3270_v43 }
 0x1a8   : > { %2527 = vrcp.f32 %v735_v61  ;;  %v802_v2 = vsel %vm623_vm2, %v777_v60, %v793_v51 }
 0x1b3   : > { %v2526_v5 = vpop.eup %2525 }
 0x1b4   : > { %v738_v7 = vmul.f32 %v2526_v5, %v719_v63 }
 0x1b5   : > { %v2528_v17 = vpop.eup %2527 }
 0x1b6   : > { %v739_v16 = vadd.f32 %v738_v7, %v626_v15  ;;  %v741_v8 = vsub.f32 1.0, %v2528_v17  ;;  %v743_v24 = vmul.f32 0.0, %v2528_v17 }
 0x1b8   : > { %2529 = vtanh.f32 %v739_v16 }
 0x1c5   : > { %v2530_v19 = vpop.eup %2529 }
 0x1c6   : > { %v742_v23 = vmul.f32 %v2530_v19, %v741_v8  ;;  %v797_v8 = vrot.slane %v768_v27, %v3267_v41 }
 0x1c8   : > { %v3310_v10 = vadd.f32 %v743_v24, %v742_v23  ;;  %v781_v24 = vrot.slane %v758_v28, %v3267_v41  ;;  %v920_v28 = vld [vmem:[%s919_s26] ss:$8 sm:$0x7] }
 0x1c9   : > { %v935_v51 = vrot.slane %v920_v28, %v3265_v40 }
 0x1ca   : > { %746 = vst [vmem:[%s745_s13] sm:$0x1] %v3310_v10  ;;  %2155 = vst [vmem:[%s745_s13 + $0x7] sm:$0x2] %v3310_v10  ;;  %v804_v11 = vpack.c.bf16 %v3310_v10, %v3310_v10  ;;  %v803_v33 = vsel %vm623_vm2, %v781_v24, %v797_v8  ;;  %s929_s13 = scalar_lea.vmem [#allocation2], %s928_s22  ;;  %s2171_s22 = smul.u32 24, %s1236_s24 }
 0x1cb   : > { %s1569_s24 = sadd.s32 8, %s3666_s17 }
 0x1cc   : > { %838 = vmatmul.mubr.bf16.vlgmr.msra.gmra.mxu0 %v804_v11  ;;  %2315 = vmatmul.mubr.bf16.vlgmr.msra.gmra.mxu1 %v804_v11  ;;  %s1242_s26 = sadd.s32 %s2171_s22, %s1239_s14  ;;  %s1573_s14 = sand.u32 7, %s1569_s24 }
 0x1cd   : > { %968 = vmatpush1.bf16.msra.mxu0 %v3103_v30  ;;  %2319 = vmatpush3.bf16.msra.mxu1 %v3131_v45  ;;  %s1243_s1 = scalar_lea.vmem [#allocation2], %s1242_s26  ;;  %s1563_s26 = sand.u32 7, %s3666_s17 }
 0x1ce   : > { %969 = vmatprep.subr.bf16.mxu0 %v3106_v31  ;;  %2320 = vmatprep.subr.bf16.mxu1 %v2792_v0 }
 0x1cf   : > { %999 = vmatprep.mubr.bf16.mxu0 %v2793_v1  ;;  %2334 = vmatprep.mubr.msk.bf16.mxu1 %vm2794_vm0, %v2792_v0 }
 0x1d1   : > { %970 = vmatpush1.bf16.msra.mxu0 %v3114_v36  ;;  %2321 = vmatpush3.bf16.msra.mxu1 %v3143_v53 }
 0x1d2   : > { %971 = vmatprep.subr.bf16.mxu0 %v3118_v37  ;;  %2322 = vmatprep.subr.bf16.mxu1 %v2792_v0 }
 0x1d5   : > { %972 = vmatpush1.bf16.msra.mxu0 %v3129_v44  ;;  %2323 = vmatpush3.bf16.msra.mxu1 %v3159_v62 }
 0x1d6   : > { %973 = vmatprep.subr.bf16.mxu0 %v3136_v48  ;;  %2324 = vmatprep.subr.bf16.mxu1 %v2792_v0 }
 0x1d9   : > { %974 = vmatpush1.bf16.msra.mxu0 %v3149_v56  ;;  %2325 = vmatpush3.bf16.msra.mxu1 %v3175_v9 }
 0x1da   : > { %975 = vmatprep.subr.bf16.mxu0 %v3152_v57  ;;  %2326 = vmatprep.subr.bf16.mxu1 %v2792_v0 }
 0x1dd   : > { %976 = vmatpush1.bf16.msra.mxu0 %v3165_v3  ;;  %2327 = vmatpush3.bf16.msra.mxu1 %v3191_v18 }
 0x1de   : > { %977 = vmatprep.subr.bf16.mxu0 %v3168_v4  ;;  %2328 = vmatprep.subr.bf16.mxu1 %v2792_v0 }
 0x1e1   : > { %978 = vmatpush1.bf16.msra.mxu0 %v3181_v12  ;;  %2329 = vmatpush3.bf16.msra.mxu1 %v3205_v25 }
 0x1e2   : > { %979 = vmatprep.subr.bf16.mxu0 %v3184_v13  ;;  %2330 = vmatprep.subr.bf16.mxu1 %v2792_v0 }
 0x1e5   : > { %980 = vmatpush1.bf16.msra.mxu0 %v3197_v21  ;;  %2331 = vmatpush3.bf16.msra.mxu1 %v3215_v32 }
 0x1e6   : > { %981 = vmatprep.subr.bf16.mxu0 %v3200_v22  ;;  %2332 = vmatprep.subr.bf16.mxu1 %v2792_v0 }
 0x1e9   : > { %982 = vmatpush1.bf16.msra.mxu0 %v3211_v29  ;;  %2333 = vmatpush3.bf16.msra.mxu1 %v3223_v35 }
 0x1ea   : > { %1129 = vmatprep.subr.bf16.mxu0 %v3099_v26  ;;  %2338 = vmatprep.subr.bf16.mxu1 %v2792_v0 }
 0x28c   : > { %v839_v38 = vpop.f32.mrf.mxu0  ;;  %v880_v39 = vpop.f32.mrf.mxu1 }
 0x28d   : > { %v840_v42 = vadd.f32 %v839_v38, %v3285_v14  ;;  %v881_v19 = vadd.f32 %v880_v39, %v3299_v59 }
 0x28e   : > { %v841_v47 = vpop.f32.mrf.mxu0  ;;  %v2316_v49 = vpop.f32.mrf.mxu1 }
 0x28f   : > { %v886_v50 = vadd.f32 %v840_v42, %v801_v46  ;;  %v842_v58 = vadd.f32 %v841_v47, %v3291_v20 }
 0x290   : > { %v843_v52 = vpop.f32.mrf.mxu0  ;;  %v883_v54 = vpop.f32.mrf.mxu1 }
 0x291   : > { %v2158_v55 = vmul.f32 -1.442695, %v886_v50  ;;  %v893_v5 = vadd.f32 %v842_v58, %v802_v2 }
 0x292   : > { %v844_v61 = vpop.f32.mrf.mxu0  ;;  %v2317_v63 = vpop.f32.mrf.mxu1 }
 0x293   : > { %2531 = vpow2.f32 %v2158_v55  ;;  %v2159_v6 = vmul.f32 -1.442695, %v893_v5 }
 0x295   : > { %2533 = vpow2.f32 %v2159_v6 }
 0x2a0   : > { %v2532_v7 = vpop.eup %2531 }
 0x2a1   : > { %v890_v15 = vadd.f32 1.0, %v2532_v7 }
 0x2a2   : > { %v2534_v16 = vpop.eup %2533 }
 0x2a3   : > { %2535 = vrcp.f32 %v890_v15  ;;  %v897_v17 = vadd.f32 1.0, %v2534_v16  ;;  %v939_v16 = vrot.slane %v920_v28, %v3270_v43 }
 0x2a5   : > { %2537 = vrcp.f32 %v897_v17 }
 0x2b0   : > { %v2536_v23 = vpop.eup %2535 }
 0x2b1   : > { %v900_v11 = vmul.f32 %v2536_v23, %v881_v19 }
 0x2b2   : > { %v2538_v38 = vpop.eup %2537 }
 0x2b3   : > { %v901_v34 = vadd.f32 %v900_v11, %v803_v33  ;;  %v903_v42 = vsub.f32 1.0, %v2538_v38  ;;  %v905_v49 = vmul.f32 %v2538_v38, %v3310_v10  ;;  %v930_v10 = vld [vmem:[%s929_s13] ss:$8 sm:$0x7]  ;;  %s1252_s13 = sadd.s32 %s2172_s21, %s1249_s11  ;;  %s1570_s21 = sshra.s32 %s1569_s24, 3 }
 0x2b4   : > { %v951_v39 = vrot.slane %v930_v10, %v3265_v40  ;;  %v955_v2 = vrot.slane %v930_v10, %v3270_v43  ;;  %s1560_s11 = sshra.s32 %s3666_s17, 3  ;;  %s2182_s22 = smul.u32 24, %s1570_s21 }
 0x2b5   : > { %2539 = vtanh.f32 %v901_v34  ;;  %s1879_s24 = scalar_lea.vmem %s3306_s16, %s3688_s30 [#allocation11]  ;;  %s2192_s21 = sshll.u32 (%p3776_p11), %s2924_s28, 3 }
 0x2b6   : > { %v963_v58 = vsel %vm623_vm2, %v935_v51, %v951_v39  ;;  %v964_v19 = vsel %vm623_vm2, %v939_v16, %v955_v2 }
 0x2c2   : > { %v2540_v46 = vpop.eup %2539 }
 0x2c3   : > { %v904_v47 = vmul.f32 %v2540_v46, %v903_v42  ;;  %v959_v42 = vrot.slane %v930_v10, %v3267_v41 }
 0x2c5   : > { %v3373_v50 = vadd.f32 %v905_v49, %v904_v47  ;;  %v943_v49 = vrot.slane %v920_v28, %v3267_v41  ;;  %v1082_v28 = vld [vmem:[%s1081_s6] ss:$8 sm:$0x7] }
 0x2c6   : > { %v1097_v2 = vrot.slane %v1082_v28, %v3265_v40 }
 0x2c7   : > { %908 = vst [vmem:[%s907_s10] sm:$0x1] %v3373_v50  ;;  %2160 = vst [vmem:[%s907_s10 + $0x7] sm:$0x2] %v3373_v50  ;;  %v966_v27 = vpack.c.bf16 %v3373_v50, %v3373_v50  ;;  %v965_v39 = vsel %vm623_vm2, %v943_v49, %v959_v42  ;;  %s1091_s10 = scalar_lea.vmem [#allocation2], %s1090_s27  ;;  %s2176_s27 = smul.u32 24, %s1398_s12 }
 0x2c8   : > { %s1731_s12 = sadd.s32 8, %s3688_s30 }
 0x2c9   : > { %1000 = vmatmul.mubr.bf16.vlgmr.msra.gmra.mxu0 %v966_v27  ;;  %2335 = vmatmul.mubr.bf16.vlgmr.msra.gmra.mxu1 %v966_v27  ;;  %s1404_s6 = sadd.s32 %s2176_s27, %s1401_s18  ;;  %s1735_s18 = sand.u32 7, %s1731_s12 }
 0x2ca   : > { %1130 = vmatpush1.bf16.msra.mxu0 %v3103_v30  ;;  %2339 = vmatpush3.bf16.msra.mxu1 %v3131_v45  ;;  %s1405_s23 = scalar_lea.vmem [#allocation2], %s1404_s6  ;;  %s1725_s6 = sand.u32 7, %s3688_s30 }
 0x2cb   : > { %1131 = vmatprep.subr.bf16.mxu0 %v3106_v31  ;;  %2340 = vmatprep.subr.bf16.mxu1 %v2792_v0 }
 0x2cc   : > { %1161 = vmatprep.mubr.bf16.mxu0 %v2793_v1  ;;  %2354 = vmatprep.mubr.msk.bf16.mxu1 %vm2794_vm0, %v2792_v0 }
 0x2ce   : > { %1132 = vmatpush1.bf16.msra.mxu0 %v3114_v36  ;;  %2341 = vmatpush3.bf16.msra.mxu1 %v3143_v53 }
 0x2cf   : > { %1133 = vmatprep.subr.bf16.mxu0 %v3118_v37  ;;  %2342 = vmatprep.subr.bf16.mxu1 %v2792_v0 }
 0x2d2   : > { %1134 = vmatpush1.bf16.msra.mxu0 %v3129_v44  ;;  %2343 = vmatpush3.bf16.msra.mxu1 %v3159_v62 }
 0x2d3   : > { %1135 = vmatprep.subr.bf16.mxu0 %v3136_v48  ;;  %2344 = vmatprep.subr.bf16.mxu1 %v2792_v0 }
 0x2d6   : > { %1136 = vmatpush1.bf16.msra.mxu0 %v3149_v56  ;;  %2345 = vmatpush3.bf16.msra.mxu1 %v3175_v9 }
 0x2d7   : > { %1137 = vmatprep.subr.bf16.mxu0 %v3152_v57  ;;  %2346 = vmatprep.subr.bf16.mxu1 %v2792_v0 }
 0x2da   : > { %1138 = vmatpush1.bf16.msra.mxu0 %v3165_v3  ;;  %2347 = vmatpush3.bf16.msra.mxu1 %v3191_v18 }
 0x2db   : > { %1139 = vmatprep.subr.bf16.mxu0 %v3168_v4  ;;  %2348 = vmatprep.subr.bf16.mxu1 %v2792_v0 }
 0x2de   : > { %1140 = vmatpush1.bf16.msra.mxu0 %v3181_v12  ;;  %2349 = vmatpush3.bf16.msra.mxu1 %v3205_v25 }
 0x2df   : > { %1141 = vmatprep.subr.bf16.mxu0 %v3184_v13  ;;  %2350 = vmatprep.subr.bf16.mxu1 %v2792_v0 }
 0x2e2   : > { %1142 = vmatpush1.bf16.msra.mxu0 %v3197_v21  ;;  %2351 = vmatpush3.bf16.msra.mxu1 %v3215_v32 }
 0x2e3   : > { %1143 = vmatprep.subr.bf16.mxu0 %v3200_v22  ;;  %2352 = vmatprep.subr.bf16.mxu1 %v2792_v0 }
 0x2e6   : > { %1144 = vmatpush1.bf16.msra.mxu0 %v3211_v29  ;;  %2353 = vmatpush3.bf16.msra.mxu1 %v3223_v35 }
 0x2e7   : > { %1291 = vmatprep.subr.bf16.mxu0 %v3099_v26  ;;  %2358 = vmatprep.subr.bf16.mxu1 %v2792_v0 }
 0x389   : > { %v1001_v52 = vpop.f32.mrf.mxu0  ;;  %v1042_v54 = vpop.f32.mrf.mxu1 }
 0x38a   : > { %v1002_v55 = vadd.f32 %v1001_v52, %v3285_v14  ;;  %v1043_v46 = vadd.f32 %v1042_v54, %v3299_v59 }
 0x38b   : > { %v1003_v60 = vpop.f32.mrf.mxu0  ;;  %v2336_v61 = vpop.f32.mrf.mxu1 }
 0x38c   : > { %v1048_v63 = vadd.f32 %v1002_v55, %v963_v58  ;;  %v1004_v15 = vadd.f32 %v1003_v60, %v3291_v20 }
 0x38d   : > { %v1005_v5 = vpop.f32.mrf.mxu0  ;;  %v1045_v6 = vpop.f32.mrf.mxu1 }
 0x38e   : > { %v2163_v7 = vmul.f32 -1.442695, %v1048_v63  ;;  %v1055_v23 = vadd.f32 %v1004_v15, %v964_v19 }
 0x38f   : > { %v1006_v17 = vpop.f32.mrf.mxu0  ;;  %v2337_v8 = vpop.f32.mrf.mxu1 }
 0x390   : > { %2541 = vpow2.f32 %v2163_v7  ;;  %v2164_v24 = vmul.f32 -1.442695, %v1055_v23 }
 0x392   : > { %2543 = vpow2.f32 %v2164_v24 }
 0x39d   : > { %v2542_v11 = vpop.eup %2541 }
 0x39e   : > { %v1052_v33 = vadd.f32 1.0, %v2542_v11 }
 0x39f   : > { %v2544_v34 = vpop.eup %2543 }
 0x3a0   : > { %2545 = vrcp.f32 %v1052_v33  ;;  %v1059_v38 = vadd.f32 1.0, %v2544_v34  ;;  %v1101_v34 = vrot.slane %v1082_v28, %v3270_v43 }
 0x3a2   : > { %2547 = vrcp.f32 %v1059_v38 }
 0x3ad   : > { %v2546_v47 = vpop.eup %2545 }
 0x3ae   : > { %v1062_v27 = vmul.f32 %v2546_v47, %v1043_v46 }
 0x3af   : > { %v2548_v52 = vpop.eup %2547 }
 0x3b0   : > { %v1063_v51 = vadd.f32 %v1062_v27, %v965_v39  ;;  %v1065_v55 = vsub.f32 1.0, %v2548_v52  ;;  %v1067_v61 = vmul.f32 %v2548_v52, %v3373_v50  ;;  %v1092_v50 = vld [vmem:[%s1091_s10] ss:$8 sm:$0x7]  ;;  %s1414_s10 = sadd.s32 %s2177_s20, %s1411_s7  ;;  %s1732_s20 = sshra.s32 %s1731_s12, 3 }
 0x3b1   : > { %v1113_v54 = vrot.slane %v1092_v50, %v3265_v40  ;;  %v1117_v19 = vrot.slane %v1092_v50, %v3270_v43  ;;  %s1722_s7 = sshra.s32 %s3688_s30, 3  ;;  %s2187_s27 = smul.u32 24, %s1732_s20 }
 0x3b2   : > { %2549 = vtanh.f32 %v1063_v51 }
 0x3b3   : > { %v1125_v15 = vsel %vm623_vm2, %v1097_v2, %v1113_v54  ;;  %v1126_v46 = vsel %vm623_vm2, %v1101_v34, %v1117_v19 }
 0x3bf   : > { %v2550_v58 = vpop.eup %2549 }
 0x3c0   : > { %v1066_v60 = vmul.f32 %v2550_v58, %v1065_v55  ;;  %v1121_v55 = vrot.slane %v1092_v50, %v3267_v41 }
 0x3c2   : > { %v3436_v63 = vadd.f32 %v1067_v61, %v1066_v60  ;;  %v1105_v61 = vrot.slane %v1082_v28, %v3267_v41  ;;  %v1244_v28 = vld [vmem:[%s1243_s1] ss:$8 sm:$0x7] }
 0x3c3   : > { %v1259_v19 = vrot.slane %v1244_v28, %v3265_v40 }
 0x3c4   : > { %1070 = vst [vmem:[%s1069_s29] sm:$0x1] %v3436_v63  ;;  %2165 = vst [vmem:[%s1069_s29 + $0x7] sm:$0x2] %v3436_v63  ;;  %v1128_v10 = vpack.c.bf16 %v3436_v63, %v3436_v63  ;;  %v1127_v54 = vsel %vm623_vm2, %v1105_v61, %v1121_v55  ;;  %s1253_s29 = scalar_lea.vmem [#allocation2], %s1252_s13  ;;  %s2181_s13 = smul.u32 24, %s1560_s11 }
 0x3c6   : > { %1162 = vmatmul.mubr.bf16.vlgmr.msra.gmra.mxu0 %v1128_v10  ;;  %2355 = vmatmul.mubr.bf16.vlgmr.msra.gmra.mxu1 %v1128_v10  ;;  %s1566_s1 = sadd.s32 %s2181_s13, %s1563_s26 }
 0x3c7   : > { %1292 = vmatpush1.bf16.msra.mxu0 %v3103_v30  ;;  %2359 = vmatpush3.bf16.msra.mxu1 %v3131_v45  ;;  %s1567_s5 = scalar_lea.vmem [#allocation2], %s1566_s1 }
 0x3c8   : > { %1293 = vmatprep.subr.bf16.mxu0 %v3106_v31  ;;  %2360 = vmatprep.subr.bf16.mxu1 %v2792_v0 }
 0x3c9   : > { %1323 = vmatprep.mubr.bf16.mxu0 %v2793_v1  ;;  %2374 = vmatprep.mubr.msk.bf16.mxu1 %vm2794_vm0, %v2792_v0 }
 0x3cb   : > { %1294 = vmatpush1.bf16.msra.mxu0 %v3114_v36  ;;  %2361 = vmatpush3.bf16.msra.mxu1 %v3143_v53 }
 0x3cc   : > { %1295 = vmatprep.subr.bf16.mxu0 %v3118_v37  ;;  %2362 = vmatprep.subr.bf16.mxu1 %v2792_v0 }
 0x3cf   : > { %1296 = vmatpush1.bf16.msra.mxu0 %v3129_v44  ;;  %2363 = vmatpush3.bf16.msra.mxu1 %v3159_v62 }
 0x3d0   : > { %1297 = vmatprep.subr.bf16.mxu0 %v3136_v48  ;;  %2364 = vmatprep.subr.bf16.mxu1 %v2792_v0 }
 0x3d3   : > { %1298 = vmatpush1.bf16.msra.mxu0 %v3149_v56  ;;  %2365 = vmatpush3.bf16.msra.mxu1 %v3175_v9 }
 0x3d4   : > { %1299 = vmatprep.subr.bf16.mxu0 %v3152_v57  ;;  %2366 = vmatprep.subr.bf16.mxu1 %v2792_v0 }
 0x3d7   : > { %1300 = vmatpush1.bf16.msra.mxu0 %v3165_v3  ;;  %2367 = vmatpush3.bf16.msra.mxu1 %v3191_v18 }
 0x3d8   : > { %1301 = vmatprep.subr.bf16.mxu0 %v3168_v4  ;;  %2368 = vmatprep.subr.bf16.mxu1 %v2792_v0 }
 0x3db   : > { %1302 = vmatpush1.bf16.msra.mxu0 %v3181_v12  ;;  %2369 = vmatpush3.bf16.msra.mxu1 %v3205_v25 }
 0x3dc   : > { %1303 = vmatprep.subr.bf16.mxu0 %v3184_v13  ;;  %2370 = vmatprep.subr.bf16.mxu1 %v2792_v0 }
 0x3df   : > { %1304 = vmatpush1.bf16.msra.mxu0 %v3197_v21  ;;  %2371 = vmatpush3.bf16.msra.mxu1 %v3215_v32 }
 0x3e0   : > { %1305 = vmatprep.subr.bf16.mxu0 %v3200_v22  ;;  %2372 = vmatprep.subr.bf16.mxu1 %v2792_v0 }
 0x3e3   : > { %1306 = vmatpush1.bf16.msra.mxu0 %v3211_v29  ;;  %2373 = vmatpush3.bf16.msra.mxu1 %v3223_v35 }
 0x3e4   : > { %1453 = vmatprep.subr.bf16.mxu0 %v3099_v26  ;;  %2378 = vmatprep.subr.bf16.mxu1 %v2792_v0 }
 0x486   : > { %v1163_v5 = vpop.f32.mrf.mxu0  ;;  %v1204_v6 = vpop.f32.mrf.mxu1 }
 0x487   : > { %v1164_v7 = vadd.f32 %v1163_v5, %v3285_v14  ;;  %v1205_v58 = vadd.f32 %v1204_v6, %v3299_v59 }
 0x488   : > { %v1165_v16 = vpop.f32.mrf.mxu0  ;;  %v2356_v17 = vpop.f32.mrf.mxu1 }
 0x489   : > { %v1210_v8 = vadd.f32 %v1164_v7, %v1125_v15  ;;  %v1166_v33 = vadd.f32 %v1165_v16, %v3291_v20 }
 0x48a   : > { %v1167_v23 = vpop.f32.mrf.mxu0  ;;  %v1207_v24 = vpop.f32.mrf.mxu1 }
 0x48b   : > { %v2168_v11 = vmul.f32 -1.442695, %v1210_v8  ;;  %v1217_v47 = vadd.f32 %v1166_v33, %v1126_v46 }
 0x48c   : > { %v1168_v38 = vpop.f32.mrf.mxu0  ;;  %v2357_v42 = vpop.f32.mrf.mxu1 }
 0x48d   : > { %2551 = vpow2.f32 %v2168_v11  ;;  %v2169_v49 = vmul.f32 -1.442695, %v1217_v47 }
 0x48f   : > { %2553 = vpow2.f32 %v2169_v49 }
 0x49a   : > { %v2552_v27 = vpop.eup %2551 }
 0x49b   : > { %v1214_v39 = vadd.f32 1.0, %v2552_v27 }
 0x49c   : > { %v2554_v51 = vpop.eup %2553 }
 0x49d   : > { %2555 = vrcp.f32 %v1214_v39  ;;  %v1221_v52 = vadd.f32 1.0, %v2554_v51  ;;  %v1263_v51 = vrot.slane %v1244_v28, %v3270_v43 }
 0x49f   : > { %2557 = vrcp.f32 %v1221_v52 }
 0x4aa   : > { %v2556_v60 = vpop.eup %2555 }
 0x4ab   : > { %v1224_v10 = vmul.f32 %v2556_v60, %v1205_v58 }
 0x4ac   : > { %v2558_v5 = vpop.eup %2557 }
 0x4ad   : > { %v1225_v2 = vadd.f32 %v1224_v10, %v1127_v54  ;;  %v1227_v7 = vsub.f32 1.0, %v2558_v5  ;;  %v1229_v17 = vmul.f32 %v2558_v5, %v3436_v63  ;;  %v1254_v63 = vld [vmem:[%s1253_s29] ss:$8 sm:$0x7]  ;;  %s1576_s29 = sadd.s32 %s2182_s22, %s1573_s14  ;;  %s3777_s14 = sld [smem:[#allocation20_spill]] (%p3776_p11) }
 0x4ae   : > { %v1275_v6 = vrot.slane %v1254_v63, %v3265_v40  ;;  %v1279_v46 = vrot.slane %v1254_v63, %v3270_v43 }
 0x4af   : > { %2559 = vtanh.f32 %v1225_v2 }
 0x4b0   : > { %v1287_v33 = vsel %vm623_vm2, %v1259_v19, %v1275_v6  ;;  %v1288_v58 = vsel %vm623_vm2, %v1263_v51, %v1279_v46 }
 0x4b3   : > { %s1891_s13 = scalar_lea.vmem (%p3776_p11), %s3777_s14, %s2192_s21 }
 0x4bc   : > { %v2560_v15 = vpop.eup %2559 }
 0x4bd   : > { %v1228_v16 = vmul.f32 %v2560_v15, %v1227_v7  ;;  %v1283_v7 = vrot.slane %v1254_v63, %v3267_v41 }
 0x4bf   : > { %v3499_v8 = vadd.f32 %v1229_v17, %v1228_v16  ;;  %v1267_v17 = vrot.slane %v1244_v28, %v3267_v41 }
 0x4c1   : > { %1232 = vst [vmem:[%s1231_s15] sm:$0x1] %v3499_v8  ;;  %2170 = vst [vmem:[%s1231_s15 + $0x7] sm:$0x2] %v3499_v8  ;;  %v1290_v50 = vpack.c.bf16 %v3499_v8, %v3499_v8  ;;  %v1289_v6 = vsel %vm623_vm2, %v1267_v17, %v1283_v7  ;;  %s1415_s15 = scalar_lea.vmem [#allocation2], %s1414_s10  ;;  %s2186_s10 = smul.u32 24, %s1722_s7 }
 0x4c3   : > { %1324 = vmatmul.mubr.bf16.vlgmr.msra.gmra.mxu0 %v1290_v50  ;;  %2375 = vmatmul.mubr.bf16.vlgmr.msra.gmra.mxu1 %v1290_v50 }
 0x4c4   : > { %1454 = vmatpush1.bf16.msra.mxu0 %v3103_v30  ;;  %2379 = vmatpush3.bf16.msra.mxu1 %v3131_v45 }
 0x4c5   : > { %1455 = vmatprep.subr.bf16.mxu0 %v3106_v31  ;;  %2380 = vmatprep.subr.bf16.mxu1 %v2792_v0 }
 0x4c6   : > { %1485 = vmatprep.mubr.bf16.mxu0 %v2793_v1  ;;  %2394 = vmatprep.mubr.msk.bf16.mxu1 %vm2794_vm0, %v2792_v0 }
 0x4c8   : > { %1456 = vmatpush1.bf16.msra.mxu0 %v3114_v36  ;;  %2381 = vmatpush3.bf16.msra.mxu1 %v3143_v53 }
 0x4c9   : > { %1457 = vmatprep.subr.bf16.mxu0 %v3118_v37  ;;  %2382 = vmatprep.subr.bf16.mxu1 %v2792_v0 }
 0x4cc   : > { %1458 = vmatpush1.bf16.msra.mxu0 %v3129_v44  ;;  %2383 = vmatpush3.bf16.msra.mxu1 %v3159_v62 }
 0x4cd   : > { %1459 = vmatprep.subr.bf16.mxu0 %v3136_v48  ;;  %2384 = vmatprep.subr.bf16.mxu1 %v2792_v0 }
 0x4d0   : > { %1460 = vmatpush1.bf16.msra.mxu0 %v3149_v56  ;;  %2385 = vmatpush3.bf16.msra.mxu1 %v3175_v9 }
 0x4d1   : > { %1461 = vmatprep.subr.bf16.mxu0 %v3152_v57  ;;  %2386 = vmatprep.subr.bf16.mxu1 %v2792_v0 }
 0x4d4   : > { %1462 = vmatpush1.bf16.msra.mxu0 %v3165_v3  ;;  %2387 = vmatpush3.bf16.msra.mxu1 %v3191_v18 }
 0x4d5   : > { %1463 = vmatprep.subr.bf16.mxu0 %v3168_v4  ;;  %2388 = vmatprep.subr.bf16.mxu1 %v2792_v0 }
 0x4d8   : > { %1464 = vmatpush1.bf16.msra.mxu0 %v3181_v12  ;;  %2389 = vmatpush3.bf16.msra.mxu1 %v3205_v25 }
 0x4d9   : > { %1465 = vmatprep.subr.bf16.mxu0 %v3184_v13  ;;  %2390 = vmatprep.subr.bf16.mxu1 %v2792_v0 }
 0x4dc   : > { %1466 = vmatpush1.bf16.msra.mxu0 %v3197_v21  ;;  %2391 = vmatpush3.bf16.msra.mxu1 %v3215_v32 }
 0x4dd   : > { %1467 = vmatprep.subr.bf16.mxu0 %v3200_v22  ;;  %2392 = vmatprep.subr.bf16.mxu1 %v2792_v0 }
 0x4e0   : > { %1468 = vmatpush1.bf16.msra.mxu0 %v3211_v29  ;;  %2393 = vmatpush3.bf16.msra.mxu1 %v3223_v35 }
 0x4e1   : > { %1615 = vmatprep.subr.bf16.mxu0 %v3099_v26  ;;  %2398 = vmatprep.subr.bf16.mxu1 %v2792_v0 }
 0x583   : > { %v1325_v23 = vpop.f32.mrf.mxu0  ;;  %v1366_v24 = vpop.f32.mrf.mxu1 }
 0x584   : > { %v1326_v11 = vadd.f32 %v1325_v23, %v3285_v14  ;;  %v1367_v15 = vadd.f32 %v1366_v24, %v3299_v59 }
 0x585   : > { %v1327_v34 = vpop.f32.mrf.mxu0  ;;  %v2376_v38 = vpop.f32.mrf.mxu1 }
 0x586   : > { %v1372_v42 = vadd.f32 %v1326_v11, %v1287_v33  ;;  %v1328_v39 = vadd.f32 %v1327_v34, %v3291_v20 }
 0x587   : > { %v1329_v47 = vpop.f32.mrf.mxu0  ;;  %v1369_v49 = vpop.f32.mrf.mxu1 }
 0x588   : > { %v2173_v27 = vmul.f32 -1.442695, %v1372_v42  ;;  %v1379_v60 = vadd.f32 %v1328_v39, %v1288_v58 }
 0x589   : > { %v1330_v52 = vpop.f32.mrf.mxu0  ;;  %v2377_v55 = vpop.f32.mrf.mxu1 }
 0x58a   : > { %2561 = vpow2.f32 %v2173_v27  ;;  %v2174_v61 = vmul.f32 -1.442695, %v1379_v60 }
 0x58c   : > { %2563 = vpow2.f32 %v2174_v61 }
 0x597   : > { %v2562_v10 = vpop.eup %2561 }
 0x598   : > { %v1376_v54 = vadd.f32 1.0, %v2562_v10 }
 0x599   : > { %v2564_v2 = vpop.eup %2563 }
 0x59a   : > { %2565 = vrcp.f32 %v1376_v54  ;;  %v1383_v5 = vadd.f32 1.0, %v2564_v2 }
 0x59c   : > { %2567 = vrcp.f32 %v1383_v5 }
 0x5a7   : > { %v2566_v16 = vpop.eup %2565 }
 0x5a8   : > { %v1386_v50 = vmul.f32 %v2566_v16, %v1367_v15 }
 0x5a9   : > { %v2568_v23 = vpop.eup %2567 }
 0x5aa   : > { %v1387_v19 = vadd.f32 %v1386_v50, %v1289_v6  ;;  %v1389_v11 = vsub.f32 1.0, %v2568_v23  ;;  %v1391_v38 = vmul.f32 %v2568_v23, %v3499_v8  ;;  %v1416_v8 = vld [vmem:[%s1415_s15] ss:$8 sm:$0x7]  ;;  %s1738_s15 = sadd.s32 %s2187_s27, %s1735_s18 }
 0x5ab   : > { %v1437_v28 = vrot.slane %v1416_v8, %v3265_v40  ;;  %v1441_v55 = vrot.slane %v1416_v8, %v3270_v43  ;;  %v1445_v23 = vrot.slane %v1416_v8, %v3267_v41 }
 0x5ac   : > { %2569 = vtanh.f32 %v1387_v19 }
 0x5b9   : > { %v2570_v33 = vpop.eup %2569 }
 0x5ba   : > { %v1390_v34 = vmul.f32 %v2570_v33, %v1389_v11 }
 0x5bc   : > { %v3562_v42 = vadd.f32 %v1391_v38, %v1390_v34 }
 0x5be   : > { %1394 = vst [vmem:[%s1393_s3] sm:$0x1] %v3562_v42  ;;  %2175 = vst [vmem:[%s1393_s3 + $0x7] sm:$0x2] %v3562_v42  ;;  %v1452_v63 = vpack.c.bf16 %v3562_v42, %v3562_v42  ;;  %s1577_s3 = scalar_lea.vmem [#allocation2], %s1576_s29 }
 0x5c0   : > { %1486 = vmatmul.mubr.bf16.vlgmr.msra.gmra.mxu0 %v1452_v63  ;;  %2395 = vmatmul.mubr.bf16.vlgmr.msra.gmra.mxu1 %v1452_v63 }
 0x5c1   : > { %1616 = vmatpush1.bf16.msra.mxu0 %v3103_v30  ;;  %2399 = vmatpush3.bf16.msra.mxu1 %v3131_v45 }
 0x5c2   : > { %1617 = vmatprep.subr.bf16.mxu0 %v3106_v31  ;;  %2400 = vmatprep.subr.bf16.mxu1 %v2792_v0 }
 0x5c3   : > { %1647 = vmatprep.mubr.bf16.mxu0 %v2793_v1  ;;  %2414 = vmatprep.mubr.msk.bf16.mxu1 %vm2794_vm0, %v2792_v0 }
 0x5c5   : > { %1618 = vmatpush1.bf16.msra.mxu0 %v3114_v36  ;;  %2401 = vmatpush3.bf16.msra.mxu1 %v3143_v53 }
 0x5c6   : > { %1619 = vmatprep.subr.bf16.mxu0 %v3118_v37  ;;  %2402 = vmatprep.subr.bf16.mxu1 %v2792_v0 }
 0x5c9   : > { %1620 = vmatpush1.bf16.msra.mxu0 %v3129_v44  ;;  %2403 = vmatpush3.bf16.msra.mxu1 %v3159_v62 }
 0x5ca   : > { %1621 = vmatprep.subr.bf16.mxu0 %v3136_v48  ;;  %2404 = vmatprep.subr.bf16.mxu1 %v2792_v0 }
 0x5cd   : > { %1622 = vmatpush1.bf16.msra.mxu0 %v3149_v56  ;;  %2405 = vmatpush3.bf16.msra.mxu1 %v3175_v9 }
 0x5ce   : > { %1623 = vmatprep.subr.bf16.mxu0 %v3152_v57  ;;  %2406 = vmatprep.subr.bf16.mxu1 %v2792_v0 }
 0x5d1   : > { %1624 = vmatpush1.bf16.msra.mxu0 %v3165_v3  ;;  %2407 = vmatpush3.bf16.msra.mxu1 %v3191_v18 }
 0x5d2   : > { %1625 = vmatprep.subr.bf16.mxu0 %v3168_v4  ;;  %2408 = vmatprep.subr.bf16.mxu1 %v2792_v0 }
 0x5d5   : > { %1626 = vmatpush1.bf16.msra.mxu0 %v3181_v12  ;;  %2409 = vmatpush3.bf16.msra.mxu1 %v3205_v25 }
 0x5d6   : > { %1627 = vmatprep.subr.bf16.mxu0 %v3184_v13  ;;  %2410 = vmatprep.subr.bf16.mxu1 %v2792_v0 }
 0x5d9   : > { %1628 = vmatpush1.bf16.msra.mxu0 %v3197_v21  ;;  %2411 = vmatpush3.bf16.msra.mxu1 %v3215_v32 }
 0x5da   : > { %1629 = vmatprep.subr.bf16.mxu0 %v3200_v22  ;;  %2412 = vmatprep.subr.bf16.mxu1 %v2792_v0 }
 0x5dd   : > { %1630 = vmatpush1.bf16.msra.mxu0 %v3211_v29  ;;  %2413 = vmatpush3.bf16.msra.mxu1 %v3223_v35 }
 0x5de   : > { %1777 = vmatprep.subr.bf16.mxu0 %v3099_v26  ;;  %2418 = vmatprep.subr.bf16.mxu1 %v2792_v0  ;;  %v1406_v26 = vld [vmem:[%s1405_s23] ss:$8 sm:$0x7]  ;;  %s1728_s23 = sadd.s32 %s2186_s10, %s1725_s6 }
 0x5df   : > { %v1421_v24 = vrot.slane %v1406_v26, %v3265_v40  ;;  %v1425_v54 = vrot.slane %v1406_v26, %v3270_v43  ;;  %v1429_v34 = vrot.slane %v1406_v26, %v3267_v41  ;;  %s1729_s17 = scalar_lea.vmem [#allocation2], %s1728_s23 }
 0x5e1   : > { %v1449_v27 = vsel %vm623_vm2, %v1421_v24, %v1437_v28  ;;  %v1450_v7 = vsel %vm623_vm2, %v1425_v54, %v1441_v55  ;;  %v1451_v63 = vsel %vm623_vm2, %v1429_v34, %v1445_v23 }
 0x680   : > { %v1487_v46 = vpop.f32.mrf.mxu0  ;;  %v1528_v47 = vpop.f32.mrf.mxu1 }
 0x681   : > { %v1488_v49 = vadd.f32 %v1487_v46, %v3285_v14  ;;  %v1529_v11 = vadd.f32 %v1528_v47, %v3299_v59 }
 0x682   : > { %v1489_v39 = vpop.f32.mrf.mxu0  ;;  %v2396_v51 = vpop.f32.mrf.mxu1 }
 0x683   : > { %v1534_v52 = vadd.f32 %v1488_v49, %v1449_v27  ;;  %v1490_v10 = vadd.f32 %v1489_v39, %v3291_v20 }
 0x684   : > { %v1491_v58 = vpop.f32.mrf.mxu0  ;;  %v1531_v60 = vpop.f32.mrf.mxu1 }
 0x685   : > { %v2178_v61 = vmul.f32 -1.442695, %v1534_v52  ;;  %v1541_v15 = vadd.f32 %v1490_v10, %v1450_v7 }
 0x686   : > { %v1492_v2 = vpop.f32.mrf.mxu0  ;;  %v2397_v5 = vpop.f32.mrf.mxu1 }
 0x687   : > { %2571 = vpow2.f32 %v2178_v61  ;;  %v2179_v16 = vmul.f32 -1.442695, %v1541_v15 }
 0x689   : > { %2573 = vpow2.f32 %v2179_v16 }
 0x694   : > { %v2572_v17 = vpop.eup %2571 }
 0x695   : > { %v1538_v50 = vadd.f32 1.0, %v2572_v17 }
 0x696   : > { %v2574_v6 = vpop.eup %2573 }
 0x697   : > { %2575 = vrcp.f32 %v1538_v50  ;;  %v1545_v19 = vadd.f32 1.0, %v2574_v6  ;;  %v1730_v50 = vld [vmem:[%s1729_s17] ss:$8 sm:$0x7] }
 0x699   : > { %2577 = vrcp.f32 %v1545_v19  ;;  %v1745_v19 = vrot.slane %v1730_v50, %v3265_v40 }
 0x6a4   : > { %v2576_v33 = vpop.eup %2575 }
 0x6a5   : > { %v1548_v38 = vmul.f32 %v2576_v33, %v1529_v11 }
 0x6a6   : > { %v2578_v24 = vpop.eup %2577 }
 0x6a7   : > { %v1549_v28 = vadd.f32 %v1548_v38, %v1451_v63  ;;  %v1551_v46 = vsub.f32 1.0, %v2578_v24  ;;  %v1553_v39 = vmul.f32 %v2578_v24, %v3562_v42 }
 0x6a9   : > { %2579 = vtanh.f32 %v1549_v28 }
 0x6b6   : > { %v2580_v49 = vpop.eup %2579 }
 0x6b7   : > { %v1552_v27 = vmul.f32 %v2580_v49, %v1551_v46 }
 0x6b9   : > { %v3625_v51 = vadd.f32 %v1553_v39, %v1552_v27 }
 0x6bb   : > { %1556 = vst [vmem:[%s1555_s8] sm:$0x1] %v3625_v51  ;;  %2180 = vst [vmem:[%s1555_s8 + $0x7] sm:$0x2] %v3625_v51  ;;  %v1614_v8 = vpack.c.bf16 %v3625_v51, %v3625_v51  ;;  %s1739_s8 = scalar_lea.vmem [#allocation2], %s1738_s15 }
 0x6bc   : > { %v1740_v17 = vld [vmem:[%s1739_s8] ss:$8 sm:$0x7] }
 0x6bd   : > { %1648 = vmatmul.mubr.bf16.vlgmr.msra.gmra.mxu0 %v1614_v8  ;;  %2415 = vmatmul.mubr.bf16.vlgmr.msra.gmra.mxu1 %v1614_v8  ;;  %v1761_v6 = vrot.slane %v1740_v17, %v3265_v40  ;;  %v1765_v24 = vrot.slane %v1740_v17, %v3270_v43 }
 0x6be   : > { %1778 = vmatpush1.bf16.msra.mxu0 %v3103_v30  ;;  %2419 = vmatpush3.bf16.msra.mxu1 %v3131_v45 }
 0x6bf   : > { %1779 = vmatprep.subr.bf16.mxu0 %v3106_v31  ;;  %2420 = vmatprep.subr.bf16.mxu1 %v2792_v0  ;;  %v1773_v34 = vsel %vm623_vm2, %v1745_v19, %v1761_v6 }
 0x6c0   : > { %1809 = vmatprep.mubr.bf16.mxu0 %v2793_v1  ;;  %2434 = vmatprep.mubr.msk.bf16.mxu1 %vm2794_vm0, %v2792_v0  ;;  %v1568_v1 = vld [vmem:[%s1567_s5] ss:$8 sm:$0x7] }
 0x6c1   : > { %v1583_v31 = vrot.slane %v1568_v1, %v3265_v40  ;;  %v1591_v55 = vrot.slane %v1568_v1, %v3267_v41 }
 0x6c2   : > { %1780 = vmatpush1.bf16.msra.mxu0 %v3114_v36  ;;  %2421 = vmatpush3.bf16.msra.mxu1 %v3143_v53 }
 0x6c3   : > { %1781 = vmatprep.subr.bf16.mxu0 %v3118_v37  ;;  %2422 = vmatprep.subr.bf16.mxu1 %v2792_v0 }
 0x6c6   : > { %1782 = vmatpush1.bf16.msra.mxu0 %v3129_v44  ;;  %2423 = vmatpush3.bf16.msra.mxu1 %v3159_v62 }
 0x6c7   : > { %1783 = vmatprep.subr.bf16.mxu0 %v3136_v48  ;;  %2424 = vmatprep.subr.bf16.mxu1 %v2792_v0 }
 0x6ca   : > { %1784 = vmatpush1.bf16.msra.mxu0 %v3149_v56  ;;  %2425 = vmatpush3.bf16.msra.mxu1 %v3175_v9 }
 0x6cb   : > { %1785 = vmatprep.subr.bf16.mxu0 %v3152_v57  ;;  %2426 = vmatprep.subr.bf16.mxu1 %v2792_v0 }
 0x6ce   : > { %1786 = vmatpush1.bf16.msra.mxu0 %v3165_v3  ;;  %2427 = vmatpush3.bf16.msra.mxu1 %v3191_v18 }
 0x6cf   : > { %1787 = vmatprep.subr.bf16.mxu0 %v3168_v4  ;;  %2428 = vmatprep.subr.bf16.mxu1 %v2792_v0 }
 0x6d2   : > { %1788 = vmatpush1.bf16.msra.mxu0 %v3181_v12  ;;  %2429 = vmatpush3.bf16.msra.mxu1 %v3205_v25  ;;  %v1587_v12 = vrot.slane %v1568_v1, %v3270_v43 }
 0x6d3   : > { %1789 = vmatprep.subr.bf16.mxu0 %v3184_v13  ;;  %2430 = vmatprep.subr.bf16.mxu1 %v2792_v0 }
 0x6d6   : > { %1790 = vmatpush1.bf16.msra.mxu0 %v3197_v21  ;;  %2431 = vmatpush3.bf16.msra.mxu1 %v3215_v32 }
 0x6d7   : > { %1791 = vmatprep.subr.bf16.mxu0 %v3200_v22  ;;  %2432 = vmatprep.subr.bf16.mxu1 %v2792_v0  ;;  %v1578_v0 = vld [vmem:[%s1577_s3] ss:$8 sm:$0x7] }
 0x6d8   : > { %v1599_v30 = vrot.slane %v1578_v0, %v3265_v40  ;;  %v1603_v57 = vrot.slane %v1578_v0, %v3270_v43  ;;  %v1607_v26 = vrot.slane %v1578_v0, %v3267_v41 }
 0x6da   : > { %1792 = vmatpush1.bf16.msra.mxu0 %v3211_v29  ;;  %2433 = vmatpush3.bf16.msra.mxu1 %v3223_v35  ;;  %v1611_v45 = vsel %vm623_vm2, %v1583_v31, %v1599_v30  ;;  %v1612_v21 = vsel %vm623_vm2, %v1587_v12, %v1603_v57  ;;  %v1613_v60 = vsel %vm623_vm2, %v1591_v55, %v1607_v26 }
 0x77d   : > { %v1649_v36 = vpop.f32.mrf.mxu0  ;;  %v1690_v37 = vpop.f32.mrf.mxu1 }
 0x77e   : > { %v1650_v44 = vadd.f32 %v1649_v36, %v3285_v14  ;;  %v1691_v47 = vadd.f32 %v1690_v37, %v3299_v59 }
 0x77f   : > { %v1651_v48 = vpop.f32.mrf.mxu0  ;;  %v2416_v53 = vpop.f32.mrf.mxu1 }
 0x780   : > { %v1696_v56 = vadd.f32 %v1650_v44, %v1611_v45  ;;  %v1652_v9 = vadd.f32 %v1651_v48, %v3291_v20  ;;  %v1769_v44 = vrot.slane %v1740_v17, %v3267_v41  ;;  %v1753_v45 = vrot.slane %v1730_v50, %v3267_v41 }
 0x781   : > { %v1653_v62 = vpop.f32.mrf.mxu0  ;;  %v1693_v3 = vpop.f32.mrf.mxu1 }
 0x782   : > { %v2183_v4 = vmul.f32 -1.442695, %v1696_v56  ;;  %v1703_v22 = vadd.f32 %v1652_v9, %v1612_v21  ;;  %v1775_v53 = vsel %vm623_vm2, %v1753_v45, %v1769_v44 }
 0x783   : > { %v1654_v13 = vpop.f32.mrf.mxu0  ;;  %v2417_v18 = vpop.f32.mrf.mxu1 }
 0x784   : > { %2581 = vpow2.f32 %v2183_v4  ;;  %v2184_v25 = vmul.f32 -1.442695, %v1703_v22 }
 0x786   : > { %2583 = vpow2.f32 %v2184_v25 }
 0x791   : > { %v2582_v29 = vpop.eup %2581 }
 0x792   : > { %v1700_v32 = vadd.f32 1.0, %v2582_v29 }
 0x793   : > { %v2584_v35 = vpop.eup %2583 }
 0x794   : > { %2585 = vrcp.f32 %v1700_v32  ;;  %v1707_v42 = vadd.f32 1.0, %v2584_v35 }
 0x796   : > { %2587 = vrcp.f32 %v1707_v42 }
 0x7a1   : > { %v2586_v52 = vpop.eup %2585 }
 0x7a2   : > { %v1710_v58 = vmul.f32 %v2586_v52, %v1691_v47 }
 0x7a3   : > { %v2588_v10 = vpop.eup %2587 }
 0x7a4   : > { %v1711_v61 = vadd.f32 %v1710_v58, %v1613_v60  ;;  %v1713_v54 = vsub.f32 1.0, %v2588_v10  ;;  %v1715_v7 = vmul.f32 %v2588_v10, %v3625_v51  ;;  %v1749_v51 = vrot.slane %v1730_v50, %v3270_v43 }
 0x7a6   : > { %2589 = vtanh.f32 %v1711_v61  ;;  %v1774_v0 = vsel %vm623_vm2, %v1749_v51, %v1765_v24 }
 0x7b3   : > { %v2590_v2 = vpop.eup %2589 }
 0x7b4   : > { %v1714_v5 = vmul.f32 %v2590_v2, %v1713_v54 }
 0x7b6   : > { %v1716_v15 = vadd.f32 %v1715_v7, %v1714_v5 }
 0x7b8   : > { %1718 = vst [vmem:[%s1717_s25] sm:$0x1] %v1716_v15  ;;  %2185 = vst [vmem:[%s1717_s25 + $0x7] sm:$0x2] %v1716_v15  ;;  %v1776_v16 = vpack.c.bf16 %v1716_v15, %v1716_v15 }
 0x7ba   : > { %1810 = vmatmul.mubr.bf16.vlgmr.msra.gmra.mxu0 %v1776_v16  ;;  %2435 = vmatmul.mubr.bf16.vlgmr.msra.gmra.mxu1 %v1776_v16 }
 0x87a   : > { %v1811_v23 = vpop.f32.mrf.mxu0  ;;  %v1852_v11 = vpop.f32.mrf.mxu1 }
 0x87b   : > { %v1812_v33 = vadd.f32 %v1811_v23, %v3285_v14 }
 0x87c   : > { %v1813_v38 = vpop.f32.mrf.mxu0  ;;  %v2436_v63 = vpop.f32.mrf.mxu1 }
 0x87d   : > { %v1858_v28 = vadd.f32 %v1812_v33, %v1773_v34  ;;  %v1814_v39 = vadd.f32 %v1813_v38, %v3291_v20  ;;  %v1853_v20 = vadd.f32 %v1852_v11, %v3299_v59 }
 0x87e   : > { %v1815_v46 = vpop.f32.mrf.mxu0  ;;  %v1855_v49 = vpop.f32.mrf.mxu1 }
 0x87f   : > { %v2188_v27 = vmul.f32 -1.442695, %v1858_v28  ;;  %v1865_v14 = vadd.f32 %v1814_v39, %v1774_v0 }
 0x880   : > { %v1816_v8 = vpop.f32.mrf.mxu0  ;;  %v2437_v40 = vpop.f32.mrf.mxu1 }
 0x881   : > { %2591 = vpow2.f32 %v2188_v27  ;;  %v2189_v1 = vmul.f32 -1.442695, %v1865_v14 }
 0x883   : > { %2593 = vpow2.f32 %v2189_v1 }
 0x88e   : > { %v2592_v30 = vpop.eup %2591 }
 0x88f   : > { %v1862_v31 = vadd.f32 1.0, %v2592_v30 }
 0x890   : > { %v2594_v36 = vpop.eup %2593 }
 0x891   : > { %2595 = vrcp.f32 %v1862_v31  ;;  %v1869_v37 = vadd.f32 1.0, %v2594_v36 }
 0x893   : > { %2597 = vrcp.f32 %v1869_v37 }
 0x89e   : > { %v2596_v43 = vpop.eup %2595 }
 0x89f   : > { %v1872_v48 = vmul.f32 %v2596_v43, %v1853_v20 }
 0x8a0   : > { %v2598_v57 = vpop.eup %2597 }
 0x8a1   : > { %v1873_v56 = vadd.f32 %v1872_v48, %v1775_v53  ;;  %v1875_v62 = vsub.f32 1.0, %v2598_v57  ;;  %v1877_v9 = vmul.f32 %v2598_v57, %v1716_v15 }
 0x8a3   : > { %2599 = vtanh.f32 %v1873_v56 }
 0x8b0   : > { %v2600_v3 = vpop.eup %2599 }
 0x8b1   : > { %v1876_v4 = vmul.f32 %v2600_v3, %v1875_v62  ;;  %1889 = sbr.rel (!%p3776_p11) target bundleno = 2238 (0x8be), region = 64 }
 0x8b3   : > { %v1878_v12 = vadd.f32 %v1877_v9, %v1876_v4 }
 0x8b5   : > { %1880 = vst [vmem:[%s1879_s24] sm:$0x1] %v1878_v12  ;;  %2190 = vst [vmem:[%s1879_s24 + $0x7] sm:$0x2] %v1878_v12 }
 0x8bc   : > { %v1922_v41 = vld [vmem:[%s3306_s16] sm:$0xff]  ;;  %v1924_v59 = vld [vmem:[%s3306_s16 + $0x8] sm:$0xff] }
 0x8bd   : > { %1923 = vst [vmem:[%s1891_s13] sm:$0xff] %v1922_v41  ;;  %1925 = vst [vmem:[%s1891_s13 + $0x10] sm:$0xff] %v1924_v59 }
 0x8be PF: > { %s3778_s21 = sld [smem:[#allocation16_spill]]  ;;  %s3781_s18 = smov %s2773_s19 }
 0x8bf   : > { %s3779_s26 = sld [smem:[#allocation15_spill]] }
 0x8c0   : > { %s3780_s20 = sld [smem:[#allocation17_spill]] }
 0x8c4   : > { %p19_p1 = scmp.ge.s32.totalorder %s3778_s21, 4  }
 0x8c5   : > { %s3782_s19 = smov %s3779_s26 }
 0x8c6   :  { %21 = sbr.rel (!%p19_p1) target bundleno = 10 (0xa), region = 190 }
 0x8cb   :  { %1941 = vsyncpa [#allocation4], 1 }
 0x8cc   :  { %1943 = vsyncpa [#allocation4 + $0x1], 1 }
 0x8cd   :  { %1944 = vsyncpa [#allocation6], 1 }
 0x8ce   :  { %1946 = vsyncpa [#allocation6 + $0x1], 1 }
 0x8cf   :  { %1947 = vsyncpa [#allocation9], 1 }
 0x8d0   :  { %1949 = vsyncpa [#allocation9 + $0x1], 1 }

// kernel: adaptive_conv1d_forward.4
= control target key start
LH: loop header
LB: loop body
LE: loop exit
PB: predicated region body
PF: predicated region fallthrough
CT: control target
= control target key end

     0   :  { %8 = vsyncpa [#allocation3], 0  ;;  %s1788_s0 = inlined_call_operand.vmem [shape: f32[2,8,256], index: 0, kind: input, shape index: {}]   ;;  %s1789_s1 = inlined_call_operand.hbm [shape: f32[1,256], index: 1, kind: input, shape index: {}]   ;;  %s1790_s2 = inlined_call_operand.hbm [shape: f32[256,2048], index: 2, kind: input, shape index: {}]   ;;  %s1791_s3 = inlined_call_operand.vmem [shape: f32[2,1,2048], index: 3, kind: output, shape index: {}]  }
   0x1   :  { %9 = vsyncpa [#allocation5], 0  ;;  %s1682_s12 = smov 0  }
   0x2 LB: > { %s1688_s13 = sadd.s32 4294967295, %s1655_s12   ;;  %p1540_p0 = scmp.ge.s32.totalorder %s1655_s12, 1  ;;  %s1655_s12 = sphi %s1682_s12, %s15_s12  }
   0x3   : > { %p114_p1 = scmp.lt.s32.totalorder %s1655_s12, 3  ;;  %p1792_p2 = scmp.eq.s32.totalorder %s1688_s13, 0 }
   0x4   : > { %s1657_s14 = smov [#allocation2]   ;;  %s1658_s17 = smov [#allocation4]  }
   0x5   : > { %s127_s15 = sshll.u32 %s1657_s14, 4  ;;  %p1693_p3 = pnand %p1540_p0, %p114_p1  ;;  %s128_s15 = int_to_ptr.vmem [resolvable:$true] %s127_s15 }
   0x6   : > { %s137_s18 = sshll.u32 %s1658_s17, 4  ;;  %s1600_s20 = scalar_lea.vmem %s128_s15, 32  ;;  %s138_s18 = int_to_ptr.vmem [resolvable:$true] %s137_s18 }
   0x7   : > { %s1794_s16 = scalar_select %p1693_p3, 1, 0 }
   0x8   : > { %p1561_p4 = pneg %p1693_p3  ;;  %p1601_p7 = scmp.ne.s32.totalorder %s128_s15, %s1600_s20 }
   0x9   : > { %p1608_p10 = scmp.lt.s32.totalorder %s128_s15, %s128_s15  ;;  %p1609_p11 = scmp.lt.s32.totalorder %s1600_s20, %s1600_s20 }
   0xa   : > { %p1701_p5 = pnand %p1792_p2, %p1561_p4 }
   0xb   : > { %p1610_p12 = por %p1609_p11, %p1608_p10 }
   0xc   : > { %p1591_p6 = pneg %p1701_p5 }
   0xe   : > { %p1603_p8 = pnand %p1601_p7, %p1591_p6 }
  0x10   : > { %p1604_p9 = pneg %p1603_p8 }
  0x12   : > { %p1611_p13 = pnand %p1610_p12, %p1604_p9 }
  0x14   : > { %1614 = shalt.err (!%p1611_p13)
}
  0x15   : > { %1564 = dma.hbm_to_vmem [thread:$0]  (!%p1701_p5), %s1789_s1, 32, %s128_s15, [#allocation3]  }
  0x16   : > { %s1626_s23 = scalar_lea.vmem %s138_s18, 65536  ;;  %p1634_p7 = scmp.lt.s32.totalorder %s138_s18, %s138_s18 }
  0x17   : > { %p1627_p0 = scmp.ne.s32.totalorder %s138_s18, %s1626_s23  ;;  %p1635_p8 = scmp.lt.s32.totalorder %s1626_s23, %s1626_s23 }
  0x19   : > { %p1629_p1 = pnand %p1627_p0, %p1591_p6  ;;  %p1636_p2 = por %p1635_p8, %p1634_p7 }
  0x1b   : > { %p1630_p4 = pneg %p1629_p1 }
  0x1d   : > { %p1637_p3 = pnand %p1636_p2, %p1630_p4 }
  0x1f   : > { %1640 = shalt.err (!%p1637_p3)
}
  0x20   : > { %s1659_s24 = smov 2048   ;;  %s1660_s25 = smov 128  }
  0x21   : > { %1567 = dma.hbm_to_vmem [thread:$0]  (!%p1701_p5), %s1790_s2, 65536, %s138_s18, [#allocation5], %s1659_s24, %s1659_s24, %s1660_s25  }
  0x22   : > { %p1796_p9 = scmp.ne.s32.totalorder %s1794_s16, 0 }
  0x23   : > { %p1797_p10 = scmp.eq.s32.totalorder (!%p1796_p9), %s1688_s13, 0 }
  0x24   : > { %161 = sbr.rel (%p1796_p9) target bundleno = 670 (0x29e), region = 32 }
  0x29   : > { %1646 = dma.done.wait (%p1797_p10), [#allocation3], 32   ;;  %p1798_p6 = pmov %p1797_p10 }
  0x2b   : > { %1648 = vsyncadd (%p1798_p6), [#allocation3], 4294967264  ;;  %p1799_p2 = pmov %p1798_p6 }
  0x2d   : > { %1650 = dma.done.wait (%p1799_p2), [#allocation5], 65536   ;;  %p1800_p3 = pmov %p1799_p2 }
  0x2e   : > { %p188_p11 = scmp.lt.s32.totalorder %s1688_s13, 1  ;;  %v201_v0 = vlaneseq  ;;  %v199_v6 = vld [vmem:[#allocation2] sm:$0x3]  ;;  %v474_v12 = vld [vmem:[#allocation4 + $0x708] sm:$0xff]  ;;  %v473_v17 = vld [vmem:[#allocation4 + $0x700] sm:$0xff] }
  0x2f   : > { %1652 = vsyncadd (%p1800_p3), [#allocation5], 4294901760  ;;  %v490_v13 = vld [vmem:[#allocation4 + $0x788] sm:$0xff]  ;;  %v476_v14 = vld [vmem:[#allocation4 + $0x718] sm:$0xff] }
  0x30   : > { %s1802_s13 = smov (!%p188_p11, %s1688_s13), 1  ;;  %v1737_v1 = vshrl.u32 %v201_v0, 7  ;;  %v874_v15 = vpack.c.bf16 %v490_v13, %v474_v12  ;;  %v492_v16 = vld [vmem:[#allocation4 + $0x798] sm:$0xff]  ;;  %v489_v18 = vld [vmem:[#allocation4 + $0x780] sm:$0xff]  ;;  %v475_v21 = vld [vmem:[#allocation4 + $0x710] sm:$0xff] }
  0x31   : > { %s1552_s28 = sshll.u32 %s1802_s13, 4  ;;  %v876_v19 = vpack.c.bf16 %v492_v16, %v476_v14  ;;  %v873_v20 = vpack.c.bf16 %v489_v18, %v473_v17  ;;  %v491_v22 = vld [vmem:[#allocation4 + $0x790] sm:$0xff]  ;;  %v442_v24 = vld [vmem:[#allocation4 + $0x608] sm:$0xff]  ;;  %v444_v26 = vld [vmem:[#allocation4 + $0x618] sm:$0xff] }
  0x32   : > { %v203_v2 = vsub.s32 0, %v1737_v1  ;;  %v207_v3 = vsub.s32 1, %v1737_v1  ;;  %s192_s4 = scalar_lea.vmem %s1788_s0, %s1552_s28  ;;  %1017 = vmatprep.subr.bf16.mxu0 %v874_v15  ;;  %v875_v23 = vpack.c.bf16 %v491_v22, %v475_v21  ;;  %v458_v25 = vld [vmem:[#allocation4 + $0x688] sm:$0xff]  ;;  %v460_v28 = vld [vmem:[#allocation4 + $0x698] sm:$0xff]  ;;  %v441_v29 = vld [vmem:[#allocation4 + $0x600] sm:$0xff]  ;;  %s1781_s7 = scalar_lea.vmem %s1791_s3, %s1552_s28 }
  0x33   : > { %v1747_v4 = vld [vmem:[%s192_s4] sm:$0xff]  ;;  %v1749_v5 = vld [vmem:[%s192_s4 + $0x8] sm:$0xff]  ;;  %1058 = vmatprep.subr.bf16.mxu1 %v876_v19  ;;  %1018 = vmatpush1.bf16.msra.mxu0 %v873_v20  ;;  %v858_v27 = vpack.c.bf16 %v458_v25, %v442_v24  ;;  %v860_v31 = vpack.c.bf16 %v460_v28, %v444_v26  ;;  %v443_v33 = vld [vmem:[#allocation4 + $0x610] sm:$0xff] }
  0x34   : > { %v204_v7 = vrot.slane %v199_v6, %v203_v2  ;;  %v208_v8 = vrot.slane %v199_v6, %v207_v3  ;;  %1059 = vmatpush1.bf16.msra.mxu1 %v875_v23  ;;  %v457_v30 = vld [vmem:[#allocation4 + $0x680] sm:$0xff]  ;;  %v459_v34 = vld [vmem:[#allocation4 + $0x690] sm:$0xff]  ;;  %v410_v36 = vld [vmem:[#allocation4 + $0x508] sm:$0xff] }
  0x35   : > { %v857_v32 = vpack.c.bf16 %v457_v30, %v441_v29  ;;  %1019 = vmatprep.subr.bf16.mxu0 %v858_v27  ;;  %v859_v35 = vpack.c.bf16 %v459_v34, %v443_v33  ;;  %1060 = vmatprep.subr.bf16.mxu1 %v860_v31  ;;  %v426_v37 = vld [vmem:[#allocation4 + $0x588] sm:$0xff]  ;;  %v412_v38 = vld [vmem:[#allocation4 + $0x518] sm:$0xff]  ;;  %v409_v41 = vld [vmem:[#allocation4 + $0x500] sm:$0xff] }
  0x36   : > { %v211_v9 = vmul.f32 %v204_v7, %v1747_v4  ;;  %v212_v10 = vmul.f32 %v208_v8, %v1749_v5  ;;  %v842_v39 = vpack.c.bf16 %v426_v37, %v410_v36  ;;  %v428_v40 = vld [vmem:[#allocation4 + $0x598] sm:$0xff]  ;;  %v425_v42 = vld [vmem:[#allocation4 + $0x580] sm:$0xff]  ;;  %v411_v45 = vld [vmem:[#allocation4 + $0x510] sm:$0xff] }
  0x37   : > { %1020 = vmatpush1.bf16.msra.mxu0 %v857_v32  ;;  %v844_v43 = vpack.c.bf16 %v428_v40, %v412_v38  ;;  %v841_v44 = vpack.c.bf16 %v425_v42, %v409_v41  ;;  %v427_v46 = vld [vmem:[#allocation4 + $0x590] sm:$0xff]  ;;  %v378_v48 = vld [vmem:[#allocation4 + $0x408] sm:$0xff]  ;;  %v380_v50 = vld [vmem:[#allocation4 + $0x418] sm:$0xff] }
  0x38   : > { %v213_v11 = vadd.f32 %v212_v10, %v211_v9  ;;  %1061 = vmatpush1.bf16.msra.mxu1 %v859_v35  ;;  %1021 = vmatprep.subr.bf16.mxu0 %v842_v39  ;;  %v843_v47 = vpack.c.bf16 %v427_v46, %v411_v45  ;;  %v394_v49 = vld [vmem:[#allocation4 + $0x488] sm:$0xff]  ;;  %v396_v52 = vld [vmem:[#allocation4 + $0x498] sm:$0xff]  ;;  %v377_v53 = vld [vmem:[#allocation4 + $0x400] sm:$0xff] }
  0x39   : > { %1062 = vmatprep.subr.bf16.mxu1 %v844_v43  ;;  %v826_v51 = vpack.c.bf16 %v394_v49, %v378_v48  ;;  %v393_v54 = vld [vmem:[#allocation4 + $0x480] sm:$0xff]  ;;  %v828_v55 = vpack.c.bf16 %v396_v52, %v380_v50  ;;  %v379_v57 = vld [vmem:[#allocation4 + $0x410] sm:$0xff]  ;;  %v346_v60 = vld [vmem:[#allocation4 + $0x308] sm:$0xff] }
  0x3a   : > { %214 = vadd.xlane.f32.xlu0 %v213_v11  ;;  %v825_v56 = vpack.c.bf16 %v393_v54, %v377_v53  ;;  %v395_v58 = vld [vmem:[#allocation4 + $0x490] sm:$0xff]  ;;  %v362_v61 = vld [vmem:[#allocation4 + $0x388] sm:$0xff]  ;;  %v348_v62 = vld [vmem:[#allocation4 + $0x318] sm:$0xff] }
  0x3b   : > { %1022 = vmatpush1.bf16.msra.mxu0 %v841_v44  ;;  %v827_v59 = vpack.c.bf16 %v395_v58, %v379_v57  ;;  %v810_v63 = vpack.c.bf16 %v362_v61, %v346_v60  ;;  %v364_v0 = vld [vmem:[#allocation4 + $0x398] sm:$0xff]  ;;  %v345_v2 = vld [vmem:[#allocation4 + $0x300] sm:$0xff]  ;;  %v347_v8 = vld [vmem:[#allocation4 + $0x310] sm:$0xff] }
  0x3c   : > { %1063 = vmatpush1.bf16.msra.mxu1 %v843_v47  ;;  %1023 = vmatprep.subr.bf16.mxu0 %v826_v51  ;;  %v361_v3 = vld [vmem:[#allocation4 + $0x380] sm:$0xff]  ;;  %v812_v6 = vpack.c.bf16 %v364_v0, %v348_v62  ;;  %v363_v9 = vld [vmem:[#allocation4 + $0x390] sm:$0xff]  ;;  %v314_v11 = vld [vmem:[#allocation4 + $0x208] sm:$0xff] }
  0x3d   : > { %1064 = vmatprep.subr.bf16.mxu1 %v828_v55  ;;  %v809_v7 = vpack.c.bf16 %v361_v3, %v345_v2  ;;  %v811_v10 = vpack.c.bf16 %v363_v9, %v347_v8  ;;  %v330_v12 = vld [vmem:[#allocation4 + $0x288] sm:$0xff]  ;;  %v316_v13 = vld [vmem:[#allocation4 + $0x218] sm:$0xff]  ;;  %v313_v16 = vld [vmem:[#allocation4 + $0x200] sm:$0xff] }
  0x3e   : > { %v794_v14 = vpack.c.bf16 %v330_v12, %v314_v11  ;;  %v332_v15 = vld [vmem:[#allocation4 + $0x298] sm:$0xff]  ;;  %v329_v17 = vld [vmem:[#allocation4 + $0x280] sm:$0xff]  ;;  %v315_v20 = vld [vmem:[#allocation4 + $0x210] sm:$0xff] }
  0x3f   : > { %1024 = vmatpush1.bf16.msra.mxu0 %v825_v56  ;;  %v796_v18 = vpack.c.bf16 %v332_v15, %v316_v13  ;;  %v793_v19 = vpack.c.bf16 %v329_v17, %v313_v16  ;;  %v331_v21 = vld [vmem:[#allocation4 + $0x290] sm:$0xff]  ;;  %v282_v23 = vld [vmem:[#allocation4 + $0x108] sm:$0xff]  ;;  %v284_v25 = vld [vmem:[#allocation4 + $0x118] sm:$0xff] }
  0x40   : > { %1065 = vmatpush1.bf16.msra.mxu1 %v827_v59  ;;  %1025 = vmatprep.subr.bf16.mxu0 %v810_v63  ;;  %v795_v22 = vpack.c.bf16 %v331_v21, %v315_v20  ;;  %v298_v24 = vld [vmem:[#allocation4 + $0x188] sm:$0xff]  ;;  %v300_v27 = vld [vmem:[#allocation4 + $0x198] sm:$0xff]  ;;  %v281_v28 = vld [vmem:[#allocation4 + $0x100] sm:$0xff] }
  0x41   : > { %1066 = vmatprep.subr.bf16.mxu1 %v812_v6  ;;  %v778_v26 = vpack.c.bf16 %v298_v24, %v282_v23  ;;  %v297_v29 = vld [vmem:[#allocation4 + $0x180] sm:$0xff]  ;;  %v780_v30 = vpack.c.bf16 %v300_v27, %v284_v25  ;;  %v283_v32 = vld [vmem:[#allocation4 + $0x110] sm:$0xff]  ;;  %v250_v35 = vld [vmem:[#allocation4 + $0x8] sm:$0xff] }
  0x42   : > { %v777_v31 = vpack.c.bf16 %v297_v29, %v281_v28  ;;  %v299_v33 = vld [vmem:[#allocation4 + $0x190] sm:$0xff]  ;;  %v266_v36 = vld [vmem:[#allocation4 + $0x88] sm:$0xff]  ;;  %v252_v37 = vld [vmem:[#allocation4 + $0x18] sm:$0xff] }
  0x43   : > { %1026 = vmatpush1.bf16.msra.mxu0 %v809_v7  ;;  %v779_v34 = vpack.c.bf16 %v299_v33, %v283_v32  ;;  %v762_v38 = vpack.c.bf16 %v266_v36, %v250_v35  ;;  %v268_v39 = vld [vmem:[#allocation4 + $0x98] sm:$0xff]  ;;  %v249_v40 = vld [vmem:[#allocation4] sm:$0xff]  ;;  %v251_v44 = vld [vmem:[#allocation4 + $0x10] sm:$0xff] }
  0x44   : > { %1067 = vmatpush1.bf16.msra.mxu1 %v811_v10  ;;  %1027 = vmatprep.subr.bf16.mxu0 %v794_v14  ;;  %v265_v41 = vld [vmem:[#allocation4 + $0x80] sm:$0xff]  ;;  %v764_v42 = vpack.c.bf16 %v268_v39, %v252_v37  ;;  %v267_v45 = vld [vmem:[#allocation4 + $0x90] sm:$0xff]  ;;  %v730_v47 = vld [vmem:[#allocation4 + $0xf08] sm:$0xff] }
  0x45   : > { %1068 = vmatprep.subr.bf16.mxu1 %v796_v18  ;;  %v761_v43 = vpack.c.bf16 %v265_v41, %v249_v40  ;;  %v763_v46 = vpack.c.bf16 %v267_v45, %v251_v44  ;;  %v746_v48 = vld [vmem:[#allocation4 + $0xf88] sm:$0xff]  ;;  %v732_v49 = vld [vmem:[#allocation4 + $0xf18] sm:$0xff]  ;;  %v729_v52 = vld [vmem:[#allocation4 + $0xf00] sm:$0xff] }
  0x46   : > { %v1002_v50 = vpack.c.bf16 %v746_v48, %v730_v47  ;;  %v748_v51 = vld [vmem:[#allocation4 + $0xf98] sm:$0xff]  ;;  %v745_v53 = vld [vmem:[#allocation4 + $0xf80] sm:$0xff]  ;;  %v731_v56 = vld [vmem:[#allocation4 + $0xf10] sm:$0xff] }
  0x47   : > { %1028 = vmatpush1.bf16.msra.mxu0 %v793_v19  ;;  %v1004_v54 = vpack.c.bf16 %v748_v51, %v732_v49  ;;  %v1001_v55 = vpack.c.bf16 %v745_v53, %v729_v52  ;;  %v747_v57 = vld [vmem:[#allocation4 + $0xf90] sm:$0xff]  ;;  %v698_v59 = vld [vmem:[#allocation4 + $0xe08] sm:$0xff]  ;;  %v700_v61 = vld [vmem:[#allocation4 + $0xe18] sm:$0xff] }
  0x48   : > { %1069 = vmatpush1.bf16.msra.mxu1 %v795_v22  ;;  %1029 = vmatprep.subr.bf16.mxu0 %v778_v26  ;;  %v1003_v58 = vpack.c.bf16 %v747_v57, %v731_v56  ;;  %v714_v60 = vld [vmem:[#allocation4 + $0xe88] sm:$0xff]  ;;  %v716_v63 = vld [vmem:[#allocation4 + $0xe98] sm:$0xff]  ;;  %v697_v0 = vld [vmem:[#allocation4 + $0xe00] sm:$0xff] }
  0x49   : > { %1070 = vmatprep.subr.bf16.mxu1 %v780_v30  ;;  %v986_v62 = vpack.c.bf16 %v714_v60, %v698_v59  ;;  %v713_v2 = vld [vmem:[#allocation4 + $0xe80] sm:$0xff]  ;;  %v988_v3 = vpack.c.bf16 %v716_v63, %v700_v61  ;;  %v699_v7 = vld [vmem:[#allocation4 + $0xe10] sm:$0xff]  ;;  %v666_v10 = vld [vmem:[#allocation4 + $0xd08] sm:$0xff] }
  0x4a   : > { %v985_v6 = vpack.c.bf16 %v713_v2, %v697_v0  ;;  %v715_v8 = vld [vmem:[#allocation4 + $0xe90] sm:$0xff]  ;;  %v682_v11 = vld [vmem:[#allocation4 + $0xd88] sm:$0xff]  ;;  %v668_v12 = vld [vmem:[#allocation4 + $0xd18] sm:$0xff] }
  0x4b   : > { %1030 = vmatpush1.bf16.msra.mxu0 %v777_v31  ;;  %v987_v9 = vpack.c.bf16 %v715_v8, %v699_v7  ;;  %v970_v13 = vpack.c.bf16 %v682_v11, %v666_v10  ;;  %v684_v14 = vld [vmem:[#allocation4 + $0xd98] sm:$0xff]  ;;  %v665_v15 = vld [vmem:[#allocation4 + $0xd00] sm:$0xff]  ;;  %v667_v19 = vld [vmem:[#allocation4 + $0xd10] sm:$0xff] }
  0x4c   : > { %1071 = vmatpush1.bf16.msra.mxu1 %v779_v34  ;;  %1031 = vmatprep.subr.bf16.mxu0 %v762_v38  ;;  %v681_v16 = vld [vmem:[#allocation4 + $0xd80] sm:$0xff]  ;;  %v972_v17 = vpack.c.bf16 %v684_v14, %v668_v12  ;;  %v683_v20 = vld [vmem:[#allocation4 + $0xd90] sm:$0xff]  ;;  %v634_v22 = vld [vmem:[#allocation4 + $0xc08] sm:$0xff] }
  0x4d   : > { %1072 = vmatprep.subr.bf16.mxu1 %v764_v42  ;;  %v969_v18 = vpack.c.bf16 %v681_v16, %v665_v15  ;;  %v971_v21 = vpack.c.bf16 %v683_v20, %v667_v19  ;;  %v650_v23 = vld [vmem:[#allocation4 + $0xc88] sm:$0xff]  ;;  %v636_v24 = vld [vmem:[#allocation4 + $0xc18] sm:$0xff]  ;;  %v633_v27 = vld [vmem:[#allocation4 + $0xc00] sm:$0xff] }
  0x4e   : > { %v954_v25 = vpack.c.bf16 %v650_v23, %v634_v22  ;;  %v652_v26 = vld [vmem:[#allocation4 + $0xc98] sm:$0xff]  ;;  %v649_v28 = vld [vmem:[#allocation4 + $0xc80] sm:$0xff]  ;;  %v635_v31 = vld [vmem:[#allocation4 + $0xc10] sm:$0xff] }
  0x4f   : > { %1032 = vmatpush1.bf16.msra.mxu0 %v761_v43  ;;  %v956_v29 = vpack.c.bf16 %v652_v26, %v636_v24  ;;  %v953_v30 = vpack.c.bf16 %v649_v28, %v633_v27  ;;  %v651_v32 = vld [vmem:[#allocation4 + $0xc90] sm:$0xff]  ;;  %v602_v34 = vld [vmem:[#allocation4 + $0xb08] sm:$0xff]  ;;  %v604_v36 = vld [vmem:[#allocation4 + $0xb18] sm:$0xff] }
  0x50   : > { %1073 = vmatpush1.bf16.msra.mxu1 %v763_v46  ;;  %1033 = vmatprep.subr.bf16.mxu0 %v1002_v50  ;;  %v955_v33 = vpack.c.bf16 %v651_v32, %v635_v31  ;;  %v618_v35 = vld [vmem:[#allocation4 + $0xb88] sm:$0xff]  ;;  %v620_v38 = vld [vmem:[#allocation4 + $0xb98] sm:$0xff]  ;;  %v601_v39 = vld [vmem:[#allocation4 + $0xb00] sm:$0xff] }
  0x51   : > { %1074 = vmatprep.subr.bf16.mxu1 %v1004_v54  ;;  %v938_v37 = vpack.c.bf16 %v618_v35, %v602_v34  ;;  %v617_v40 = vld [vmem:[#allocation4 + $0xb80] sm:$0xff]  ;;  %v940_v41 = vpack.c.bf16 %v620_v38, %v604_v36  ;;  %v603_v43 = vld [vmem:[#allocation4 + $0xb10] sm:$0xff]  ;;  %v570_v46 = vld [vmem:[#allocation4 + $0xa08] sm:$0xff] }
  0x52   : > { %v937_v42 = vpack.c.bf16 %v617_v40, %v601_v39  ;;  %v619_v44 = vld [vmem:[#allocation4 + $0xb90] sm:$0xff]  ;;  %v586_v47 = vld [vmem:[#allocation4 + $0xa88] sm:$0xff]  ;;  %v572_v48 = vld [vmem:[#allocation4 + $0xa18] sm:$0xff] }
  0x53   : > { %1034 = vmatpush2.bf16.msra.mxu0 %v1001_v55  ;;  %v939_v45 = vpack.c.bf16 %v619_v44, %v603_v43  ;;  %v922_v49 = vpack.c.bf16 %v586_v47, %v570_v46  ;;  %v588_v50 = vld [vmem:[#allocation4 + $0xa98] sm:$0xff]  ;;  %v569_v51 = vld [vmem:[#allocation4 + $0xa00] sm:$0xff]  ;;  %v571_v55 = vld [vmem:[#allocation4 + $0xa10] sm:$0xff] }
  0x54   : > { %1075 = vmatpush2.bf16.msra.mxu1 %v1003_v58  ;;  %1035 = vmatprep.subr.bf16.mxu0 %v986_v62  ;;  %v585_v52 = vld [vmem:[#allocation4 + $0xa80] sm:$0xff]  ;;  %v924_v53 = vpack.c.bf16 %v588_v50, %v572_v48  ;;  %v587_v56 = vld [vmem:[#allocation4 + $0xa90] sm:$0xff]  ;;  %v538_v57 = vld [vmem:[#allocation4 + $0x908] sm:$0xff] }
  0x55   : > { %1076 = vmatprep.subr.bf16.mxu1 %v988_v3  ;;  %v921_v54 = vpack.c.bf16 %v585_v52, %v569_v51  ;;  %v923_v58 = vpack.c.bf16 %v587_v56, %v571_v55  ;;  %v554_v59 = vld [vmem:[#allocation4 + $0x988] sm:$0xff]  ;;  %v540_v60 = vld [vmem:[#allocation4 + $0x918] sm:$0xff]  ;;  %v537_v0 = vld [vmem:[#allocation4 + $0x900] sm:$0xff] }
  0x56   : > { %v556_v61 = vld [vmem:[#allocation4 + $0x998] sm:$0xff]  ;;  %v906_v62 = vpack.c.bf16 %v554_v59, %v538_v57  ;;  %v553_v2 = vld [vmem:[#allocation4 + $0x980] sm:$0xff]  ;;  %v539_v3 = vld [vmem:[#allocation4 + $0x910] sm:$0xff] }
  0x57   : > { %1036 = vmatpush2.bf16.msra.mxu0 %v985_v6  ;;  %v908_v63 = vpack.c.bf16 %v556_v61, %v540_v60  ;;  %v905_v6 = vpack.c.bf16 %v553_v2, %v537_v0  ;;  %v555_v7 = vld [vmem:[#allocation4 + $0x990] sm:$0xff]  ;;  %v506_v8 = vld [vmem:[#allocation4 + $0x808] sm:$0xff]  ;;  %v508_v12 = vld [vmem:[#allocation4 + $0x818] sm:$0xff] }
  0x58   : > { %1077 = vmatpush2.bf16.msra.mxu1 %v987_v9  ;;  %1037 = vmatprep.subr.bf16.mxu0 %v970_v13  ;;  %v522_v9 = vld [vmem:[#allocation4 + $0x888] sm:$0xff]  ;;  %v907_v10 = vpack.c.bf16 %v555_v7, %v539_v3  ;;  %v524_v13 = vld [vmem:[#allocation4 + $0x898] sm:$0xff]  ;;  %v505_v14 = vld [vmem:[#allocation4 + $0x800] sm:$0xff] }
  0x59   : > { %1078 = vmatprep.subr.bf16.mxu1 %v972_v17  ;;  %v890_v11 = vpack.c.bf16 %v522_v9, %v506_v8  ;;  %v892_v15 = vpack.c.bf16 %v524_v13, %v508_v12  ;;  %v521_v16 = vld [vmem:[#allocation4 + $0x880] sm:$0xff]  ;;  %v507_v17 = vld [vmem:[#allocation4 + $0x810] sm:$0xff]  ;;  %v494_v22 = vld [vmem:[#allocation4 + $0x7a8] sm:$0xff] }
  0x5a   : > { %v889_v19 = vpack.c.bf16 %v521_v16, %v505_v14  ;;  %v480_v23 = vld [vmem:[#allocation4 + $0x738] sm:$0xff]  ;;  %v477_v57 = vld [vmem:[#allocation4 + $0x720] sm:$0xff]  ;;  %v479_v59 = vld [vmem:[#allocation4 + $0x730] sm:$0xff] }
  0x5b   : > { %1038 = vmatpush2.bf16.msra.mxu0 %v969_v18  ;;  %v523_v18 = vld [vmem:[#allocation4 + $0x890] sm:$0xff]  ;;  %v448_v0 = vld [vmem:[#allocation4 + $0x638] sm:$0xff]  ;;  %v445_v8 = vld [vmem:[#allocation4 + $0x620] sm:$0xff] }
  0x5c   : > { %1079 = vmatpush2.bf16.msra.mxu1 %v971_v21  ;;  %1039 = vmatprep.subr.bf16.mxu0 %v954_v25  ;;  %v891_v20 = vpack.c.bf16 %v523_v18, %v507_v17  ;;  %v478_v21 = vld [vmem:[#allocation4 + $0x728] sm:$0xff]  ;;  %v496_v25 = vld [vmem:[#allocation4 + $0x7b8] sm:$0xff]  ;;  %v495_v60 = vld [vmem:[#allocation4 + $0x7b0] sm:$0xff] }
  0x5d   : > { %1080 = vmatprep.subr.bf16.mxu1 %v956_v29  ;;  %v878_v24 = vpack.c.bf16 %v494_v22, %v478_v21  ;;  %v880_v26 = vpack.c.bf16 %v496_v25, %v480_v23  ;;  %v879_v7 = vpack.c.bf16 %v495_v60, %v479_v59  ;;  %v461_v9 = vld [vmem:[#allocation4 + $0x6a0] sm:$0xff]  ;;  %v414_v12 = vld [vmem:[#allocation4 + $0x528] sm:$0xff]  ;;  %v416_v16 = vld [vmem:[#allocation4 + $0x538] sm:$0xff] }
  0x5e   : > { %v432_v17 = vld [vmem:[#allocation4 + $0x5b8] sm:$0xff]  ;;  %v861_v18 = vpack.c.bf16 %v461_v9, %v445_v8  ;;  %v429_v21 = vld [vmem:[#allocation4 + $0x5a0] sm:$0xff]  ;;  %v431_v25 = vld [vmem:[#allocation4 + $0x5b0] sm:$0xff] }
  0x5f   : > { %1040 = vmatpush2.bf16.msra.mxu0 %v953_v30  ;;  %v848_v23 = vpack.c.bf16 %v432_v17, %v416_v16  ;;  %v319_v60 = vld [vmem:[#allocation4 + $0x230] sm:$0xff]  ;;  %v301_v8 = vld [vmem:[#allocation4 + $0x1a0] sm:$0xff]  ;;  %v272_v16 = vld [vmem:[#allocation4 + $0xb8] sm:$0xff] }
  0x60   : > { %1081 = vmatpush2.bf16.msra.mxu1 %v955_v33  ;;  %1041 = vmatprep.subr.bf16.mxu0 %v938_v37 }
  0x61   : > { %1082 = vmatprep.subr.bf16.mxu1 %v940_v41 }
  0x63   : > { %1042 = vmatpush2.bf16.msra.mxu0 %v937_v42 }
  0x64   : > { %1083 = vmatpush2.bf16.msra.mxu1 %v939_v45  ;;  %1043 = vmatprep.subr.bf16.mxu0 %v922_v49 }
  0x65   : > { %1084 = vmatprep.subr.bf16.mxu1 %v924_v53 }
  0x67   : > { %1044 = vmatpush2.bf16.msra.mxu0 %v921_v54 }
  0x68   : > { %1085 = vmatpush2.bf16.msra.mxu1 %v923_v58  ;;  %1045 = vmatprep.subr.bf16.mxu0 %v906_v62  ;;  %v493_v58 = vld [vmem:[#allocation4 + $0x7a0] sm:$0xff] }
  0x69   : > { %1086 = vmatprep.subr.bf16.mxu1 %v908_v63  ;;  %v446_v63 = vld [vmem:[#allocation4 + $0x628] sm:$0xff] }
  0x6b   : > { %1046 = vmatpush2.bf16.msra.mxu0 %v905_v6  ;;  %v877_v6 = vpack.c.bf16 %v493_v58, %v477_v57  ;;  %v333_v57 = vld [vmem:[#allocation4 + $0x2a0] sm:$0xff] }
  0x6c   : > { %1087 = vmatpush2.bf16.msra.mxu1 %v907_v10  ;;  %1047 = vmatprep.subr.bf16.mxu0 %v890_v11  ;;  %v447_v10 = vld [vmem:[#allocation4 + $0x630] sm:$0xff] }
  0x6d   : > { %1088 = vmatprep.subr.bf16.mxu1 %v892_v15  ;;  %v463_v11 = vld [vmem:[#allocation4 + $0x6b0] sm:$0xff]  ;;  %v430_v15 = vld [vmem:[#allocation4 + $0x5a8] sm:$0xff] }
  0x6e   : > { %v846_v22 = vpack.c.bf16 %v430_v15, %v414_v12  ;;  %v303_v12 = vld [vmem:[#allocation4 + $0x1b0] sm:$0xff]  ;;  %v256_v15 = vld [vmem:[#allocation4 + $0x38] sm:$0xff] }
  0x6f   : > { %1048 = vmatpush2.bf16.msra.mxu0 %v889_v19  ;;  %v863_v19 = vpack.c.bf16 %v463_v11, %v447_v10  ;;  %v287_v11 = vld [vmem:[#allocation4 + $0x130] sm:$0xff] }
  0x70   : > { %1089 = vmatpush2.bf16.msra.mxu1 %v891_v20  ;;  %1099 = vmatprep.subr.bf16.mxu0 %v878_v24  ;;  %v413_v20 = vld [vmem:[#allocation4 + $0x520] sm:$0xff]  ;;  %v415_v24 = vld [vmem:[#allocation4 + $0x530] sm:$0xff] }
  0x71   : > { %1140 = vmatprep.subr.bf16.mxu1 %v880_v26  ;;  %v382_v26 = vld [vmem:[#allocation4 + $0x428] sm:$0xff] }
  0xc3   : > { %v215_v27 = vpop.xlane.xlu0 %214 }
  0xc4   : > { %v216_v28 = vrot.slane %v215_v27, 4 }
  0xc6   : > { %v217_v29 = vmax.f32 %v215_v27, %v216_v28  ;;  %v384_v28 = vld [vmem:[#allocation4 + $0x438] sm:$0xff] }
  0xc8   : > { %v218_v30 = vrot.slane %v217_v29, 2 }
  0xca   : > { %v219_v31 = vmax.f32 %v217_v29, %v218_v30  ;;  %v400_v29 = vld [vmem:[#allocation4 + $0x4b8] sm:$0xff]  ;;  %v845_v30 = vpack.c.bf16 %v429_v21, %v413_v20  ;;  %v269_v20 = vld [vmem:[#allocation4 + $0xa0] sm:$0xff] }
  0xcc   : > { %v220_v32 = vrot.slane %v219_v31, 1 }
  0xce   : > { %v221_v33 = vmax.f32 %v219_v31, %v220_v32  ;;  %v847_v31 = vpack.c.bf16 %v431_v25, %v415_v24  ;;  %v381_v32 = vld [vmem:[#allocation4 + $0x420] sm:$0xff]  ;;  %v271_v24 = vld [vmem:[#allocation4 + $0xb0] sm:$0xff]  ;;  %v734_v25 = vld [vmem:[#allocation4 + $0xf28] sm:$0xff] }
  0xd0   : > { %v222_v34 = vsub.f32 %v215_v27, %v221_v33  ;;  %v398_v27 = vld [vmem:[#allocation4 + $0x4a8] sm:$0xff]  ;;  %v397_v33 = vld [vmem:[#allocation4 + $0x4a0] sm:$0xff] }
  0xd2   : > { %v223_v35 = vmul.f32 1.442695, %v222_v34  ;;  %v830_v34 = vpack.c.bf16 %v398_v27, %v382_v26  ;;  %v750_v26 = vld [vmem:[#allocation4 + $0xfa8] sm:$0xff]  ;;  %v736_v27 = vld [vmem:[#allocation4 + $0xf38] sm:$0xff] }
  0xd4   : > { %1585 = vpow2.f32 %v223_v35  ;;  %v832_v35 = vpack.c.bf16 %v400_v29, %v384_v28  ;;  %v752_v28 = vld [vmem:[#allocation4 + $0xfb8] sm:$0xff] }
  0xe1   : > { %v1586_v36 = vpop.eup %1585 }
  0xe2   : > { %v225_v37 = vrot.slane %v1586_v36, 4 }
  0xe4   : > { %v226_v38 = vadd.f32 %v1586_v36, %v225_v37  ;;  %v399_v37 = vld [vmem:[#allocation4 + $0x4b0] sm:$0xff] }
  0xe6   : > { %v227_v39 = vrot.slane %v226_v38, 2 }
  0xe8   : > { %v228_v40 = vadd.f32 %v227_v39, %v226_v38  ;;  %v350_v38 = vld [vmem:[#allocation4 + $0x328] sm:$0xff] }
  0xe9   : > { %v366_v39 = vld [vmem:[#allocation4 + $0x3a8] sm:$0xff] }
  0xea   : > { %v229_v41 = vrot.slane %v228_v40, 1 }
  0xec   : > { %v230_v42 = vadd.f32 %v229_v41, %v228_v40  ;;  %v352_v40 = vld [vmem:[#allocation4 + $0x338] sm:$0xff] }
  0xed   : > { %v368_v41 = vld [vmem:[#allocation4 + $0x3b8] sm:$0xff] }
  0xee   : > { %1587 = vrcp.f32 %v230_v42  ;;  %v829_v42 = vpack.c.bf16 %v397_v33, %v381_v32  ;;  %v749_v32 = vld [vmem:[#allocation4 + $0xfa0] sm:$0xff]  ;;  %v1006_v33 = vpack.c.bf16 %v750_v26, %v734_v25  ;;  %v590_v25 = vld [vmem:[#allocation4 + $0xaa8] sm:$0xff]  ;;  %v576_v26 = vld [vmem:[#allocation4 + $0xa38] sm:$0xff] }
  0xfb   : > { %v1588_v43 = vpop.eup %1587 }
  0xfc   : > { %v232_v44 = vmul.f32 %v1588_v43, %v1586_v36  ;;  %v383_v36 = vld [vmem:[#allocation4 + $0x430] sm:$0xff] }
  0xfd   : > { %v831_v43 = vpack.c.bf16 %v399_v37, %v383_v36  ;;  %v751_v36 = vld [vmem:[#allocation4 + $0xfb0] sm:$0xff]  ;;  %v702_v37 = vld [vmem:[#allocation4 + $0xe28] sm:$0xff] }
  0xfe   : > { %v233_v45 = vmul.f32 %v232_v44, %v1747_v4  ;;  %v234_v46 = vmul.f32 %v232_v44, %v1749_v5  ;;  %v462_v4 = vld [vmem:[#allocation4 + $0x6a8] sm:$0xff]  ;;  %v464_v5 = vld [vmem:[#allocation4 + $0x6b8] sm:$0xff]  ;;  %v349_v44 = vld [vmem:[#allocation4 + $0x320] sm:$0xff] }
  0xff   : > { %v862_v13 = vpack.c.bf16 %v462_v4, %v446_v63  ;;  %v864_v14 = vpack.c.bf16 %v464_v5, %v448_v0  ;;  %v302_v63 = vld [vmem:[#allocation4 + $0x1a8] sm:$0xff]  ;;  %v288_v4 = vld [vmem:[#allocation4 + $0x138] sm:$0xff] }
 0x100   : > { %v241_v47 = vrot.slane %v234_v46, 4  ;;  %v235_v48 = vrot.slane %v233_v45, 4  ;;  %v304_v0 = vld [vmem:[#allocation4 + $0x1b8] sm:$0xff] }
 0x101   : > { %v784_v10 = vpack.c.bf16 %v304_v0, %v288_v4  ;;  %v656_v4 = vld [vmem:[#allocation4 + $0xcb8] sm:$0xff] }
 0x102   : > { %v242_v49 = vadd.f32 %v241_v47, %v234_v46  ;;  %v236_v50 = vadd.f32 %v235_v48, %v233_v45  ;;  %v365_v45 = vld [vmem:[#allocation4 + $0x3a0] sm:$0xff]  ;;  %v814_v46 = vpack.c.bf16 %v366_v39, %v350_v38  ;;  %v816_v47 = vpack.c.bf16 %v368_v41, %v352_v40  ;;  %v351_v48 = vld [vmem:[#allocation4 + $0x330] sm:$0xff]  ;;  %v718_v38 = vld [vmem:[#allocation4 + $0xea8] sm:$0xff] }
 0x103   : > { %v704_v39 = vld [vmem:[#allocation4 + $0xe38] sm:$0xff] }
 0x104   : > { %v243_v51 = vrot.slane %v242_v49, 2  ;;  %v237_v52 = vrot.slane %v236_v50, 2  ;;  %v720_v40 = vld [vmem:[#allocation4 + $0xeb8] sm:$0xff] }
 0x106   : > { %v244_v53 = vadd.f32 %v243_v51, %v242_v49  ;;  %v238_v54 = vadd.f32 %v237_v52, %v236_v50  ;;  %v367_v49 = vld [vmem:[#allocation4 + $0x3b0] sm:$0xff]  ;;  %v318_v50 = vld [vmem:[#allocation4 + $0x228] sm:$0xff]  ;;  %v320_v52 = vld [vmem:[#allocation4 + $0x238] sm:$0xff] }
 0x107   : > { %v334_v51 = vld [vmem:[#allocation4 + $0x2a8] sm:$0xff] }
 0x108   : > { %v245_v55 = vrot.slane %v244_v53, 1  ;;  %v239_v56 = vrot.slane %v238_v54, 1  ;;  %v798_v58 = vpack.c.bf16 %v334_v51, %v318_v50  ;;  %v686_v50 = vld [vmem:[#allocation4 + $0xda8] sm:$0xff]  ;;  %v672_v51 = vld [vmem:[#allocation4 + $0xd38] sm:$0xff] }
 0x10a   : > { %v246_v61 = vadd.f32 %v245_v55, %v244_v53  ;;  %v240_v62 = vadd.f32 %v239_v56, %v238_v54  ;;  %v336_v53 = vld [vmem:[#allocation4 + $0x2b8] sm:$0xff]  ;;  %v813_v54 = vpack.c.bf16 %v365_v45, %v349_v44  ;;  %v815_v55 = vpack.c.bf16 %v367_v49, %v351_v48  ;;  %v317_v56 = vld [vmem:[#allocation4 + $0x220] sm:$0xff]  ;;  %v719_v48 = vld [vmem:[#allocation4 + $0xeb0] sm:$0xff] }
 0x10b   : > { %v800_v59 = vpack.c.bf16 %v336_v53, %v320_v52  ;;  %v797_v5 = vpack.c.bf16 %v333_v57, %v317_v56  ;;  %v717_v44 = vld [vmem:[#allocation4 + $0xea0] sm:$0xff]  ;;  %v990_v45 = vpack.c.bf16 %v718_v38, %v702_v37  ;;  %v670_v49 = vld [vmem:[#allocation4 + $0xd28] sm:$0xff]  ;;  %v688_v52 = vld [vmem:[#allocation4 + $0xdb8] sm:$0xff] }
 0x10c   : > { %v1755_v2 = vpack.c.bf16 %v246_v61, %v246_v61  ;;  %v1757_v3 = vpack.c.bf16 %v240_v62, %v240_v62  ;;  %v335_v61 = vld [vmem:[#allocation4 + $0x2b0] sm:$0xff]  ;;  %v286_v62 = vld [vmem:[#allocation4 + $0x128] sm:$0xff]  ;;  %v685_v56 = vld [vmem:[#allocation4 + $0xda0] sm:$0xff]  ;;  %v974_v57 = vpack.c.bf16 %v686_v50, %v670_v49 }
 0x10d   : > { %v782_v9 = vpack.c.bf16 %v302_v63, %v286_v62  ;;  %v654_v62 = vld [vmem:[#allocation4 + $0xca8] sm:$0xff]  ;;  %v640_v63 = vld [vmem:[#allocation4 + $0xc38] sm:$0xff] }
 0x10e   : > { %1049 = vmatprep.mubr.bf16.mxu0 %v1755_v2  ;;  %1090 = vmatprep.mubr.bf16.mxu1 %v1755_v2  ;;  %v558_v37 = vld [vmem:[#allocation4 + $0x9a8] sm:$0xff]  ;;  %v544_v38 = vld [vmem:[#allocation4 + $0x938] sm:$0xff] }
 0x10f   : > { %1050 = vmatmul.mubr.bf16.vlgmr.msra.gmra.mxu0 %v1757_v3  ;;  %1091 = vmatmul.mubr.bf16.vlgmr.msra.gmra.mxu1 %v1757_v3  ;;  %v526_v49 = vld [vmem:[#allocation4 + $0x8a8] sm:$0xff]  ;;  %v512_v50 = vld [vmem:[#allocation4 + $0x838] sm:$0xff] }
 0x110   : > { %1100 = vmatpush1.bf16.msra.mxu0 %v877_v6  ;;  %1141 = vmatpush1.bf16.msra.mxu1 %v879_v7  ;;  %v799_v6 = vpack.c.bf16 %v335_v61, %v319_v60  ;;  %v285_v7 = vld [vmem:[#allocation4 + $0x120] sm:$0xff]  ;;  %v687_v60 = vld [vmem:[#allocation4 + $0xdb0] sm:$0xff]  ;;  %v638_v61 = vld [vmem:[#allocation4 + $0xc28] sm:$0xff] }
 0x111   : > { %1131 = vmatprep.mubr.bf16.mxu0 %v1755_v2  ;;  %1172 = vmatprep.mubr.bf16.mxu1 %v1755_v2  ;;  %v781_v17 = vpack.c.bf16 %v301_v8, %v285_v7  ;;  %v653_v7 = vld [vmem:[#allocation4 + $0xca0] sm:$0xff]  ;;  %v958_v8 = vpack.c.bf16 %v654_v62, %v638_v61  ;;  %v498_v61 = vld [vmem:[#allocation4 + $0x7c8] sm:$0xff]  ;;  %v484_v62 = vld [vmem:[#allocation4 + $0x758] sm:$0xff] }
 0x112   : > { %1101 = vmatprep.subr.bf16.mxu0 %v862_v13  ;;  %1142 = vmatprep.subr.bf16.mxu1 %v864_v14  ;;  %v254_v13 = vld [vmem:[#allocation4 + $0x28] sm:$0xff] }
 0x113   : > { %v270_v14 = vld [vmem:[#allocation4 + $0xa8] sm:$0xff] }
 0x114   : > { %1102 = vmatpush1.bf16.msra.mxu0 %v861_v18  ;;  %1143 = vmatpush1.bf16.msra.mxu1 %v863_v19  ;;  %v783_v18 = vpack.c.bf16 %v303_v12, %v287_v11  ;;  %v253_v19 = vld [vmem:[#allocation4 + $0x20] sm:$0xff]  ;;  %v766_v21 = vpack.c.bf16 %v270_v14, %v254_v13  ;;  %v655_v11 = vld [vmem:[#allocation4 + $0xcb0] sm:$0xff]  ;;  %v606_v12 = vld [vmem:[#allocation4 + $0xb28] sm:$0xff] }
 0x115   : > { %1103 = vmatprep.subr.bf16.mxu0 %v846_v22  ;;  %1144 = vmatprep.subr.bf16.mxu1 %v848_v23  ;;  %v768_v22 = vpack.c.bf16 %v272_v16, %v256_v15  ;;  %v255_v23 = vld [vmem:[#allocation4 + $0x30] sm:$0xff]  ;;  %v765_v29 = vpack.c.bf16 %v269_v20, %v253_v19  ;;  %v622_v13 = vld [vmem:[#allocation4 + $0xba8] sm:$0xff]  ;;  %v608_v14 = vld [vmem:[#allocation4 + $0xb38] sm:$0xff] }
 0x116   : > { %v624_v15 = vld [vmem:[#allocation4 + $0xbb8] sm:$0xff]  ;;  %v621_v19 = vld [vmem:[#allocation4 + $0xba0] sm:$0xff]  ;;  %v942_v20 = vpack.c.bf16 %v622_v13, %v606_v12  ;;  %v466_v12 = vld [vmem:[#allocation4 + $0x6c8] sm:$0xff] }
 0x117   : > { %v452_v13 = vld [vmem:[#allocation4 + $0x658] sm:$0xff] }
 0x118   : > { %1104 = vmatpush1.bf16.msra.mxu0 %v845_v30  ;;  %1145 = vmatpush1.bf16.msra.mxu1 %v847_v31  ;;  %v767_v30 = vpack.c.bf16 %v271_v24, %v255_v23  ;;  %v733_v31 = vld [vmem:[#allocation4 + $0xf20] sm:$0xff]  ;;  %v623_v23 = vld [vmem:[#allocation4 + $0xbb0] sm:$0xff]  ;;  %v574_v24 = vld [vmem:[#allocation4 + $0xa28] sm:$0xff] }
 0x119   : > { %1105 = vmatprep.subr.bf16.mxu0 %v830_v34  ;;  %1146 = vmatprep.subr.bf16.mxu1 %v832_v35  ;;  %v1008_v34 = vpack.c.bf16 %v752_v28, %v736_v27  ;;  %v735_v35 = vld [vmem:[#allocation4 + $0xf30] sm:$0xff]  ;;  %v1005_v41 = vpack.c.bf16 %v749_v32, %v733_v31  ;;  %v592_v27 = vld [vmem:[#allocation4 + $0xab8] sm:$0xff]  ;;  %v589_v31 = vld [vmem:[#allocation4 + $0xaa0] sm:$0xff]  ;;  %v926_v32 = vpack.c.bf16 %v590_v25, %v574_v24 }
 0x11a   : > { %v434_v24 = vld [vmem:[#allocation4 + $0x5c8] sm:$0xff]  ;;  %v420_v25 = vld [vmem:[#allocation4 + $0x558] sm:$0xff] }
 0x11c   : > { %1106 = vmatpush1.bf16.msra.mxu0 %v829_v42  ;;  %1147 = vmatpush1.bf16.msra.mxu1 %v831_v43  ;;  %v1007_v42 = vpack.c.bf16 %v751_v36, %v735_v35  ;;  %v701_v43 = vld [vmem:[#allocation4 + $0xe20] sm:$0xff]  ;;  %v591_v35 = vld [vmem:[#allocation4 + $0xab0] sm:$0xff]  ;;  %v542_v36 = vld [vmem:[#allocation4 + $0x928] sm:$0xff] }
 0x11d   : > { %1107 = vmatprep.subr.bf16.mxu0 %v814_v46  ;;  %1148 = vmatprep.subr.bf16.mxu1 %v816_v47  ;;  %v992_v46 = vpack.c.bf16 %v720_v40, %v704_v39  ;;  %v703_v47 = vld [vmem:[#allocation4 + $0xe30] sm:$0xff]  ;;  %v989_v53 = vpack.c.bf16 %v717_v44, %v701_v43  ;;  %v560_v39 = vld [vmem:[#allocation4 + $0x9b8] sm:$0xff]  ;;  %v557_v43 = vld [vmem:[#allocation4 + $0x9a0] sm:$0xff]  ;;  %v910_v44 = vpack.c.bf16 %v558_v37, %v542_v36 }
 0x11e   : > { %v402_v36 = vld [vmem:[#allocation4 + $0x4c8] sm:$0xff]  ;;  %v388_v37 = vld [vmem:[#allocation4 + $0x458] sm:$0xff] }
 0x120   : > { %1108 = vmatpush1.bf16.msra.mxu0 %v813_v54  ;;  %1149 = vmatpush1.bf16.msra.mxu1 %v815_v55  ;;  %v991_v54 = vpack.c.bf16 %v719_v48, %v703_v47  ;;  %v669_v55 = vld [vmem:[#allocation4 + $0xd20] sm:$0xff]  ;;  %v559_v47 = vld [vmem:[#allocation4 + $0x9b0] sm:$0xff]  ;;  %v510_v48 = vld [vmem:[#allocation4 + $0x828] sm:$0xff] }
 0x121   : > { %1109 = vmatprep.subr.bf16.mxu0 %v798_v58  ;;  %1150 = vmatprep.subr.bf16.mxu1 %v800_v59  ;;  %v976_v58 = vpack.c.bf16 %v688_v52, %v672_v51  ;;  %v671_v59 = vld [vmem:[#allocation4 + $0xd30] sm:$0xff]  ;;  %v973_v0 = vpack.c.bf16 %v685_v56, %v669_v55  ;;  %v528_v51 = vld [vmem:[#allocation4 + $0x8b8] sm:$0xff]  ;;  %v525_v55 = vld [vmem:[#allocation4 + $0x8a0] sm:$0xff]  ;;  %v894_v56 = vpack.c.bf16 %v526_v49, %v510_v48 }
 0x122   : > { %v370_v48 = vld [vmem:[#allocation4 + $0x3c8] sm:$0xff]  ;;  %v356_v49 = vld [vmem:[#allocation4 + $0x358] sm:$0xff] }
 0x124   : > { %1110 = vmatpush1.bf16.msra.mxu0 %v797_v5  ;;  %1151 = vmatpush1.bf16.msra.mxu1 %v799_v6  ;;  %v975_v5 = vpack.c.bf16 %v687_v60, %v671_v59  ;;  %v637_v6 = vld [vmem:[#allocation4 + $0xc20] sm:$0xff]  ;;  %v527_v59 = vld [vmem:[#allocation4 + $0x8b0] sm:$0xff]  ;;  %v482_v60 = vld [vmem:[#allocation4 + $0x748] sm:$0xff] }
 0x125   : > { %1111 = vmatprep.subr.bf16.mxu0 %v782_v9  ;;  %1152 = vmatprep.subr.bf16.mxu1 %v784_v10  ;;  %v960_v9 = vpack.c.bf16 %v656_v4, %v640_v63  ;;  %v639_v10 = vld [vmem:[#allocation4 + $0xc30] sm:$0xff]  ;;  %v957_v16 = vpack.c.bf16 %v653_v7, %v637_v6  ;;  %v500_v63 = vld [vmem:[#allocation4 + $0x7d8] sm:$0xff]  ;;  %v481_v7 = vld [vmem:[#allocation4 + $0x740] sm:$0xff] }
 0x126   : > { %v884_v6 = vpack.c.bf16 %v500_v63, %v484_v62  ;;  %v340_v62 = vld [vmem:[#allocation4 + $0x2d8] sm:$0xff] }
 0x128   : > { %1112 = vmatpush1.bf16.msra.mxu0 %v781_v17  ;;  %1153 = vmatpush1.bf16.msra.mxu1 %v783_v18  ;;  %v959_v17 = vpack.c.bf16 %v655_v11, %v639_v10  ;;  %v605_v18 = vld [vmem:[#allocation4 + $0xb20] sm:$0xff]  ;;  %v499_v10 = vld [vmem:[#allocation4 + $0x7d0] sm:$0xff]  ;;  %v450_v11 = vld [vmem:[#allocation4 + $0x648] sm:$0xff] }
 0x129   : > { %1113 = vmatprep.subr.bf16.mxu0 %v766_v21  ;;  %1154 = vmatprep.subr.bf16.mxu1 %v768_v22  ;;  %v944_v21 = vpack.c.bf16 %v624_v15, %v608_v14  ;;  %v607_v22 = vld [vmem:[#allocation4 + $0xb30] sm:$0xff]  ;;  %v941_v28 = vpack.c.bf16 %v621_v19, %v605_v18  ;;  %v468_v14 = vld [vmem:[#allocation4 + $0x6d8] sm:$0xff]  ;;  %v465_v18 = vld [vmem:[#allocation4 + $0x6c0] sm:$0xff] }
 0x12a   : > { %v451_v19 = vld [vmem:[#allocation4 + $0x650] sm:$0xff] }
 0x12c   : > { %1114 = vmatpush1.bf16.msra.mxu0 %v765_v29  ;;  %1155 = vmatpush1.bf16.msra.mxu1 %v767_v30  ;;  %v943_v29 = vpack.c.bf16 %v623_v23, %v607_v22  ;;  %v573_v30 = vld [vmem:[#allocation4 + $0xa20] sm:$0xff]  ;;  %v467_v22 = vld [vmem:[#allocation4 + $0x6d0] sm:$0xff]  ;;  %v418_v23 = vld [vmem:[#allocation4 + $0x548] sm:$0xff] }
 0x12d   : > { %1115 = vmatprep.subr.bf16.mxu0 %v1006_v33  ;;  %1156 = vmatprep.subr.bf16.mxu1 %v1008_v34  ;;  %v928_v33 = vpack.c.bf16 %v592_v27, %v576_v26  ;;  %v575_v34 = vld [vmem:[#allocation4 + $0xa30] sm:$0xff]  ;;  %v925_v40 = vpack.c.bf16 %v589_v31, %v573_v30  ;;  %v436_v26 = vld [vmem:[#allocation4 + $0x5d8] sm:$0xff]  ;;  %v417_v30 = vld [vmem:[#allocation4 + $0x540] sm:$0xff] }
 0x12e   : > { %v433_v31 = vld [vmem:[#allocation4 + $0x5c0] sm:$0xff] }
 0x130   : > { %1116 = vmatpush2.bf16.msra.mxu0 %v1005_v41  ;;  %1157 = vmatpush2.bf16.msra.mxu1 %v1007_v42  ;;  %v927_v41 = vpack.c.bf16 %v591_v35, %v575_v34  ;;  %v541_v42 = vld [vmem:[#allocation4 + $0x920] sm:$0xff]  ;;  %v435_v34 = vld [vmem:[#allocation4 + $0x5d0] sm:$0xff]  ;;  %v386_v35 = vld [vmem:[#allocation4 + $0x448] sm:$0xff] }
 0x131   : > { %1117 = vmatprep.subr.bf16.mxu0 %v990_v45  ;;  %1158 = vmatprep.subr.bf16.mxu1 %v992_v46  ;;  %v912_v45 = vpack.c.bf16 %v560_v39, %v544_v38  ;;  %v543_v46 = vld [vmem:[#allocation4 + $0x930] sm:$0xff]  ;;  %v909_v52 = vpack.c.bf16 %v557_v43, %v541_v42  ;;  %v404_v38 = vld [vmem:[#allocation4 + $0x4d8] sm:$0xff]  ;;  %v849_v39 = vpack.c.bf16 %v433_v31, %v417_v30  ;;  %v385_v42 = vld [vmem:[#allocation4 + $0x440] sm:$0xff] }
 0x132   : > { %v401_v43 = vld [vmem:[#allocation4 + $0x4c0] sm:$0xff]  ;;  %v259_v31 = vld [vmem:[#allocation4 + $0x50] sm:$0xff] }
 0x133   : > { %v273_v30 = vld [vmem:[#allocation4 + $0xc0] sm:$0xff] }
 0x134   : > { %1118 = vmatpush2.bf16.msra.mxu0 %v989_v53  ;;  %1159 = vmatpush2.bf16.msra.mxu1 %v991_v54  ;;  %v911_v53 = vpack.c.bf16 %v559_v47, %v543_v46  ;;  %v509_v54 = vld [vmem:[#allocation4 + $0x820] sm:$0xff]  ;;  %v403_v46 = vld [vmem:[#allocation4 + $0x4d0] sm:$0xff]  ;;  %v354_v47 = vld [vmem:[#allocation4 + $0x348] sm:$0xff] }
 0x135   : > { %1119 = vmatprep.subr.bf16.mxu0 %v974_v57  ;;  %1160 = vmatprep.subr.bf16.mxu1 %v976_v58  ;;  %v896_v57 = vpack.c.bf16 %v528_v51, %v512_v50  ;;  %v511_v58 = vld [vmem:[#allocation4 + $0x830] sm:$0xff]  ;;  %v893_v4 = vpack.c.bf16 %v525_v55, %v509_v54  ;;  %v372_v50 = vld [vmem:[#allocation4 + $0x3d8] sm:$0xff]  ;;  %v833_v51 = vpack.c.bf16 %v401_v43, %v385_v42  ;;  %v353_v54 = vld [vmem:[#allocation4 + $0x340] sm:$0xff] }
 0x136   : > { %v369_v55 = vld [vmem:[#allocation4 + $0x3c0] sm:$0xff]  ;;  %v739_v43 = vld [vmem:[#allocation4 + $0xf50] sm:$0xff] }
 0x137   : > { %v817_v63 = vpack.c.bf16 %v369_v55, %v353_v54  ;;  %v753_v42 = vld [vmem:[#allocation4 + $0xfc0] sm:$0xff]  ;;  %v707_v55 = vld [vmem:[#allocation4 + $0xe50] sm:$0xff] }
 0x138   : > { %1120 = vmatpush2.bf16.msra.mxu0 %v973_v0  ;;  %1161 = vmatpush2.bf16.msra.mxu1 %v975_v5  ;;  %v895_v0 = vpack.c.bf16 %v527_v59, %v511_v58  ;;  %v882_v5 = vpack.c.bf16 %v498_v61, %v482_v60  ;;  %v371_v58 = vld [vmem:[#allocation4 + $0x3d0] sm:$0xff]  ;;  %v322_v59 = vld [vmem:[#allocation4 + $0x248] sm:$0xff]  ;;  %v324_v61 = vld [vmem:[#allocation4 + $0x258] sm:$0xff] }
 0x139   : > { %1121 = vmatprep.subr.bf16.mxu0 %v958_v8  ;;  %1162 = vmatprep.subr.bf16.mxu1 %v960_v9  ;;  %v497_v8 = vld [vmem:[#allocation4 + $0x7c0] sm:$0xff]  ;;  %v483_v9 = vld [vmem:[#allocation4 + $0x750] sm:$0xff]  ;;  %v338_v60 = vld [vmem:[#allocation4 + $0x2c8] sm:$0xff] }
 0x13a   : > { %v881_v15 = vpack.c.bf16 %v497_v8, %v481_v7  ;;  %v323_v7 = vld [vmem:[#allocation4 + $0x250] sm:$0xff]  ;;  %v804_v8 = vpack.c.bf16 %v340_v62, %v324_v61  ;;  %v721_v54 = vld [vmem:[#allocation4 + $0xec0] sm:$0xff]  ;;  %v692_v61 = vld [vmem:[#allocation4 + $0xdd8] sm:$0xff] }
 0x13c   : > { %1122 = vmatpush2.bf16.msra.mxu0 %v957_v16  ;;  %1163 = vmatpush2.bf16.msra.mxu1 %v959_v17  ;;  %v883_v16 = vpack.c.bf16 %v499_v10, %v483_v9  ;;  %v449_v17 = vld [vmem:[#allocation4 + $0x640] sm:$0xff]  ;;  %v339_v9 = vld [vmem:[#allocation4 + $0x2d0] sm:$0xff]  ;;  %v290_v10 = vld [vmem:[#allocation4 + $0x148] sm:$0xff] }
 0x13d   : > { %1123 = vmatprep.subr.bf16.mxu0 %v942_v20  ;;  %1164 = vmatprep.subr.bf16.mxu1 %v944_v21  ;;  %v866_v20 = vpack.c.bf16 %v466_v12, %v450_v11  ;;  %v868_v21 = vpack.c.bf16 %v468_v14, %v452_v13  ;;  %v865_v27 = vpack.c.bf16 %v465_v18, %v449_v17  ;;  %v306_v11 = vld [vmem:[#allocation4 + $0x1c8] sm:$0xff]  ;;  %v292_v12 = vld [vmem:[#allocation4 + $0x158] sm:$0xff]  ;;  %v289_v17 = vld [vmem:[#allocation4 + $0x140] sm:$0xff] }
 0x13e   : > { %v308_v13 = vld [vmem:[#allocation4 + $0x1d8] sm:$0xff]  ;;  %v305_v18 = vld [vmem:[#allocation4 + $0x1c0] sm:$0xff] }
 0x140   : > { %1124 = vmatpush2.bf16.msra.mxu0 %v941_v28  ;;  %1165 = vmatpush2.bf16.msra.mxu1 %v943_v29  ;;  %v867_v28 = vpack.c.bf16 %v467_v22, %v451_v19  ;;  %v850_v29 = vpack.c.bf16 %v434_v24, %v418_v23  ;;  %v291_v19 = vld [vmem:[#allocation4 + $0x150] sm:$0xff]  ;;  %v258_v22 = vld [vmem:[#allocation4 + $0x48] sm:$0xff]  ;;  %v260_v24 = vld [vmem:[#allocation4 + $0x58] sm:$0xff] }
 0x141   : > { %1125 = vmatprep.subr.bf16.mxu0 %v926_v32  ;;  %1166 = vmatprep.subr.bf16.mxu1 %v928_v33  ;;  %v419_v32 = vld [vmem:[#allocation4 + $0x550] sm:$0xff]  ;;  %v852_v33 = vpack.c.bf16 %v436_v26, %v420_v25  ;;  %v274_v23 = vld [vmem:[#allocation4 + $0xc8] sm:$0xff]  ;;  %v276_v25 = vld [vmem:[#allocation4 + $0xd8] sm:$0xff]  ;;  %v785_v26 = vpack.c.bf16 %v305_v18, %v289_v17 }
 0x142   : > { %v657_v17 = vld [vmem:[#allocation4 + $0xcc0] sm:$0xff]  ;;  %v643_v18 = vld [vmem:[#allocation4 + $0xc50] sm:$0xff] }
 0x144   : > { %1126 = vmatpush2.bf16.msra.mxu0 %v925_v40  ;;  %1167 = vmatpush2.bf16.msra.mxu1 %v927_v41  ;;  %v851_v40 = vpack.c.bf16 %v435_v34, %v419_v32  ;;  %v834_v41 = vpack.c.bf16 %v402_v36, %v386_v35  ;;  %v772_v32 = vpack.c.bf16 %v276_v25, %v260_v24  ;;  %v738_v34 = vld [vmem:[#allocation4 + $0xf48] sm:$0xff]  ;;  %v740_v36 = vld [vmem:[#allocation4 + $0xf58] sm:$0xff] }
 0x145   : > { %1127 = vmatprep.subr.bf16.mxu0 %v910_v44  ;;  %1168 = vmatprep.subr.bf16.mxu1 %v912_v45  ;;  %v387_v44 = vld [vmem:[#allocation4 + $0x450] sm:$0xff]  ;;  %v836_v45 = vpack.c.bf16 %v404_v38, %v388_v37  ;;  %v754_v35 = vld [vmem:[#allocation4 + $0xfc8] sm:$0xff]  ;;  %v756_v37 = vld [vmem:[#allocation4 + $0xfd8] sm:$0xff] }
 0x146   : > { %v628_v24 = vld [vmem:[#allocation4 + $0xbd8] sm:$0xff] }
 0x148   : > { %1128 = vmatpush2.bf16.msra.mxu0 %v909_v52  ;;  %1169 = vmatpush2.bf16.msra.mxu1 %v911_v53  ;;  %v835_v52 = vpack.c.bf16 %v403_v46, %v387_v44  ;;  %v818_v53 = vpack.c.bf16 %v370_v48, %v354_v47  ;;  %v1012_v44 = vpack.c.bf16 %v756_v37, %v740_v36  ;;  %v706_v46 = vld [vmem:[#allocation4 + $0xe48] sm:$0xff]  ;;  %v708_v48 = vld [vmem:[#allocation4 + $0xe58] sm:$0xff] }
 0x149   : > { %1129 = vmatprep.subr.bf16.mxu0 %v894_v56  ;;  %1170 = vmatprep.subr.bf16.mxu1 %v896_v57  ;;  %v355_v56 = vld [vmem:[#allocation4 + $0x350] sm:$0xff]  ;;  %v820_v57 = vpack.c.bf16 %v372_v50, %v356_v49  ;;  %v722_v47 = vld [vmem:[#allocation4 + $0xec8] sm:$0xff]  ;;  %v724_v49 = vld [vmem:[#allocation4 + $0xed8] sm:$0xff] }
 0x14a   : > { %v596_v36 = vld [vmem:[#allocation4 + $0xad8] sm:$0xff] }
 0x14c   : > { %1130 = vmatpush2.bf16.msra.mxu0 %v893_v4  ;;  %1171 = vmatpush2.bf16.msra.mxu1 %v895_v0  ;;  %v819_v4 = vpack.c.bf16 %v371_v58, %v355_v56  ;;  %v802_v0 = vpack.c.bf16 %v338_v60, %v322_v59  ;;  %v996_v56 = vpack.c.bf16 %v724_v49, %v708_v48  ;;  %v674_v58 = vld [vmem:[#allocation4 + $0xd48] sm:$0xff]  ;;  %v676_v60 = vld [vmem:[#allocation4 + $0xd58] sm:$0xff] }
 0x14d   : > { %1181 = vmatprep.subr.bf16.mxu0 %v882_v5  ;;  %1222 = vmatprep.subr.bf16.mxu1 %v884_v6  ;;  %v321_v5 = vld [vmem:[#allocation4 + $0x240] sm:$0xff]  ;;  %v690_v59 = vld [vmem:[#allocation4 + $0xdc8] sm:$0xff]  ;;  %v564_v48 = vld [vmem:[#allocation4 + $0x9d8] sm:$0xff] }
 0x14e   : > { %v337_v6 = vld [vmem:[#allocation4 + $0x2c0] sm:$0xff] }
 0x14f   : > { %1132 = vmatmul.mubr.bf16.vlgmr.msra.gmra.mxu0 %v1757_v3  ;;  %1173 = vmatmul.mubr.bf16.vlgmr.msra.gmra.mxu1 %v1757_v3  ;;  %v801_v14 = vpack.c.bf16 %v337_v6, %v321_v5  ;;  %v689_v5 = vld [vmem:[#allocation4 + $0xdc0] sm:$0xff]  ;;  %v675_v6 = vld [vmem:[#allocation4 + $0xd50] sm:$0xff] }
 0x150   : > { %1182 = vmatpush1.bf16.msra.mxu0 %v881_v15  ;;  %1213 = vmatprep.mubr.bf16.mxu0 %v1755_v2  ;;  %v803_v15 = vpack.c.bf16 %v339_v9, %v323_v7  ;;  %v980_v7 = vpack.c.bf16 %v692_v61, %v676_v60  ;;  %v642_v9 = vld [vmem:[#allocation4 + $0xc48] sm:$0xff]  ;;  %v532_v60 = vld [vmem:[#allocation4 + $0x8d8] sm:$0xff] }
 0x151   : > { %1223 = vmatpush1.bf16.msra.mxu1 %v883_v16  ;;  %1254 = vmatprep.mubr.bf16.mxu1 %v1755_v2  ;;  %v786_v16 = vpack.c.bf16 %v306_v11, %v290_v10  ;;  %v658_v10 = vld [vmem:[#allocation4 + $0xcc8] sm:$0xff]  ;;  %v644_v11 = vld [vmem:[#allocation4 + $0xc58] sm:$0xff] }
 0x152   : > { %1183 = vmatprep.subr.bf16.mxu0 %v866_v20  ;;  %1224 = vmatprep.subr.bf16.mxu1 %v868_v21  ;;  %v788_v20 = vpack.c.bf16 %v308_v13, %v292_v12  ;;  %v307_v21 = vld [vmem:[#allocation4 + $0x1d0] sm:$0xff]  ;;  %v660_v12 = vld [vmem:[#allocation4 + $0xcd8] sm:$0xff] }
 0x154   : > { %1184 = vmatpush1.bf16.msra.mxu0 %v865_v27  ;;  %v787_v27 = vpack.c.bf16 %v307_v21, %v291_v19  ;;  %v964_v19 = vpack.c.bf16 %v660_v12, %v644_v11  ;;  %v610_v21 = vld [vmem:[#allocation4 + $0xb48] sm:$0xff]  ;;  %v504_v11 = vld [vmem:[#allocation4 + $0x7f8] sm:$0xff] }
 0x155   : > { %1225 = vmatpush1.bf16.msra.mxu1 %v867_v28  ;;  %1185 = vmatprep.subr.bf16.mxu0 %v850_v29  ;;  %v770_v28 = vpack.c.bf16 %v274_v23, %v258_v22  ;;  %v257_v29 = vld [vmem:[#allocation4 + $0x40] sm:$0xff]  ;;  %v626_v22 = vld [vmem:[#allocation4 + $0xbc8] sm:$0xff]  ;;  %v612_v23 = vld [vmem:[#allocation4 + $0xb58] sm:$0xff] }
 0x156   : > { %1226 = vmatprep.subr.bf16.mxu1 %v852_v33  ;;  %v275_v33 = vld [vmem:[#allocation4 + $0xd0] sm:$0xff]  ;;  %v769_v38 = vpack.c.bf16 %v273_v30, %v257_v29  ;;  %v625_v29 = vld [vmem:[#allocation4 + $0xbc0] sm:$0xff] }
 0x157   : > { %v611_v30 = vld [vmem:[#allocation4 + $0xb50] sm:$0xff] }
 0x158   : > { %1186 = vmatpush1.bf16.msra.mxu0 %v849_v39  ;;  %v771_v39 = vpack.c.bf16 %v275_v33, %v259_v31  ;;  %v948_v31 = vpack.c.bf16 %v628_v24, %v612_v23  ;;  %v578_v33 = vld [vmem:[#allocation4 + $0xa48] sm:$0xff]  ;;  %v456_v23 = vld [vmem:[#allocation4 + $0x678] sm:$0xff] }
 0x159   : > { %1227 = vmatpush1.bf16.msra.mxu1 %v851_v40  ;;  %1187 = vmatprep.subr.bf16.mxu0 %v834_v41  ;;  %v1010_v40 = vpack.c.bf16 %v754_v35, %v738_v34  ;;  %v737_v41 = vld [vmem:[#allocation4 + $0xf40] sm:$0xff]  ;;  %v594_v34 = vld [vmem:[#allocation4 + $0xac8] sm:$0xff]  ;;  %v580_v35 = vld [vmem:[#allocation4 + $0xa58] sm:$0xff] }
 0x15a   : > { %1228 = vmatprep.subr.bf16.mxu1 %v836_v45  ;;  %v755_v45 = vld [vmem:[#allocation4 + $0xfd0] sm:$0xff]  ;;  %v1009_v50 = vpack.c.bf16 %v753_v42, %v737_v41  ;;  %v593_v41 = vld [vmem:[#allocation4 + $0xac0] sm:$0xff]  ;;  %v472_v24 = vld [vmem:[#allocation4 + $0x6f8] sm:$0xff] }
 0x15b   : > { %v579_v42 = vld [vmem:[#allocation4 + $0xa50] sm:$0xff] }
 0x15c   : > { %1188 = vmatpush1.bf16.msra.mxu0 %v833_v51  ;;  %v1011_v51 = vpack.c.bf16 %v755_v45, %v739_v43  ;;  %v932_v43 = vpack.c.bf16 %v596_v36, %v580_v35  ;;  %v546_v45 = vld [vmem:[#allocation4 + $0x948] sm:$0xff]  ;;  %v440_v35 = vld [vmem:[#allocation4 + $0x5f8] sm:$0xff] }
 0x15d   : > { %1229 = vmatpush1.bf16.msra.mxu1 %v835_v52  ;;  %1189 = vmatprep.subr.bf16.mxu0 %v818_v53  ;;  %v994_v52 = vpack.c.bf16 %v722_v47, %v706_v46  ;;  %v705_v53 = vld [vmem:[#allocation4 + $0xe40] sm:$0xff]  ;;  %v562_v46 = vld [vmem:[#allocation4 + $0x9c8] sm:$0xff]  ;;  %v548_v47 = vld [vmem:[#allocation4 + $0x958] sm:$0xff] }
 0x15e   : > { %1230 = vmatprep.subr.bf16.mxu1 %v820_v57  ;;  %v723_v57 = vld [vmem:[#allocation4 + $0xed0] sm:$0xff]  ;;  %v993_v62 = vpack.c.bf16 %v721_v54, %v705_v53  ;;  %v561_v53 = vld [vmem:[#allocation4 + $0x9c0] sm:$0xff] }
 0x15f   : > { %v547_v54 = vld [vmem:[#allocation4 + $0x950] sm:$0xff] }
 0x160   : > { %1190 = vmatpush1.bf16.msra.mxu0 %v817_v63  ;;  %v995_v63 = vpack.c.bf16 %v723_v57, %v707_v55  ;;  %v916_v55 = vpack.c.bf16 %v564_v48, %v548_v47  ;;  %v514_v57 = vld [vmem:[#allocation4 + $0x848] sm:$0xff]  ;;  %v408_v47 = vld [vmem:[#allocation4 + $0x4f8] sm:$0xff] }
 0x161   : > { %1231 = vmatpush1.bf16.msra.mxu1 %v819_v4  ;;  %1191 = vmatprep.subr.bf16.mxu0 %v802_v0  ;;  %v978_v4 = vpack.c.bf16 %v690_v59, %v674_v58  ;;  %v673_v0 = vld [vmem:[#allocation4 + $0xd40] sm:$0xff]  ;;  %v530_v58 = vld [vmem:[#allocation4 + $0x8c8] sm:$0xff]  ;;  %v516_v59 = vld [vmem:[#allocation4 + $0x858] sm:$0xff] }
 0x162   : > { %1232 = vmatprep.subr.bf16.mxu1 %v804_v8  ;;  %v691_v8 = vld [vmem:[#allocation4 + $0xdd0] sm:$0xff]  ;;  %v977_v13 = vpack.c.bf16 %v689_v5, %v673_v0  ;;  %v529_v0 = vld [vmem:[#allocation4 + $0x8c0] sm:$0xff] }
 0x163   : > { %v515_v5 = vld [vmem:[#allocation4 + $0x850] sm:$0xff] }
 0x164   : > { %1192 = vmatpush1.bf16.msra.mxu0 %v801_v14  ;;  %v979_v14 = vpack.c.bf16 %v691_v8, %v675_v6  ;;  %v900_v6 = vpack.c.bf16 %v532_v60, %v516_v59  ;;  %v486_v8 = vld [vmem:[#allocation4 + $0x768] sm:$0xff] }
 0x165   : > { %1233 = vmatpush1.bf16.msra.mxu1 %v803_v15  ;;  %1193 = vmatprep.subr.bf16.mxu0 %v786_v16  ;;  %v962_v15 = vpack.c.bf16 %v658_v10, %v642_v9  ;;  %v641_v16 = vld [vmem:[#allocation4 + $0xc40] sm:$0xff]  ;;  %v502_v9 = vld [vmem:[#allocation4 + $0x7e8] sm:$0xff]  ;;  %v488_v10 = vld [vmem:[#allocation4 + $0x778] sm:$0xff] }
 0x166   : > { %1234 = vmatprep.subr.bf16.mxu1 %v788_v20  ;;  %v659_v20 = vld [vmem:[#allocation4 + $0xcd0] sm:$0xff]  ;;  %v961_v25 = vpack.c.bf16 %v657_v17, %v641_v16  ;;  %v501_v16 = vld [vmem:[#allocation4 + $0x7e0] sm:$0xff]  ;;  %v888_v17 = vpack.c.bf16 %v504_v11, %v488_v10 }
 0x168   : > { %1194 = vmatpush1.bf16.msra.mxu0 %v785_v26  ;;  %v963_v26 = vpack.c.bf16 %v659_v20, %v643_v18  ;;  %v487_v18 = vld [vmem:[#allocation4 + $0x770] sm:$0xff]  ;;  %v454_v20 = vld [vmem:[#allocation4 + $0x668] sm:$0xff] }
 0x169   : > { %1235 = vmatpush1.bf16.msra.mxu1 %v787_v27  ;;  %1195 = vmatprep.subr.bf16.mxu0 %v770_v28  ;;  %v946_v27 = vpack.c.bf16 %v626_v22, %v610_v21  ;;  %v609_v28 = vld [vmem:[#allocation4 + $0xb40] sm:$0xff]  ;;  %v470_v21 = vld [vmem:[#allocation4 + $0x6e8] sm:$0xff] }
 0x16a   : > { %1236 = vmatprep.subr.bf16.mxu1 %v772_v32  ;;  %v627_v32 = vld [vmem:[#allocation4 + $0xbd0] sm:$0xff]  ;;  %v945_v37 = vpack.c.bf16 %v625_v29, %v609_v28  ;;  %v870_v29 = vpack.c.bf16 %v470_v21, %v454_v20  ;;  %v296_v20 = vld [vmem:[#allocation4 + $0x178] sm:$0xff] }
 0x16b   : > { %v455_v28 = vld [vmem:[#allocation4 + $0x670] sm:$0xff]  ;;  %v312_v21 = vld [vmem:[#allocation4 + $0x1f8] sm:$0xff] }
 0x16c   : > { %1196 = vmatpush1.bf16.msra.mxu0 %v769_v38  ;;  %v947_v38 = vpack.c.bf16 %v627_v32, %v611_v30  ;;  %v471_v30 = vld [vmem:[#allocation4 + $0x6f0] sm:$0xff]  ;;  %v438_v32 = vld [vmem:[#allocation4 + $0x5e8] sm:$0xff] }
 0x16d   : > { %1237 = vmatpush1.bf16.msra.mxu1 %v771_v39  ;;  %1197 = vmatprep.subr.bf16.mxu0 %v1010_v40  ;;  %v930_v39 = vpack.c.bf16 %v594_v34, %v578_v33  ;;  %v577_v40 = vld [vmem:[#allocation4 + $0xa40] sm:$0xff]  ;;  %v872_v33 = vpack.c.bf16 %v472_v24, %v456_v23  ;;  %v424_v34 = vld [vmem:[#allocation4 + $0x578] sm:$0xff] }
 0x16e   : > { %1238 = vmatprep.subr.bf16.mxu1 %v1012_v44  ;;  %v595_v44 = vld [vmem:[#allocation4 + $0xad0] sm:$0xff]  ;;  %v929_v49 = vpack.c.bf16 %v593_v41, %v577_v40  ;;  %v437_v40 = vld [vmem:[#allocation4 + $0x5e0] sm:$0xff] }
 0x16f   : > { %v423_v41 = vld [vmem:[#allocation4 + $0x570] sm:$0xff] }
 0x170   : > { %1198 = vmatpush2.bf16.msra.mxu0 %v1009_v50  ;;  %v931_v50 = vpack.c.bf16 %v595_v44, %v579_v42  ;;  %v856_v42 = vpack.c.bf16 %v440_v35, %v424_v34  ;;  %v390_v44 = vld [vmem:[#allocation4 + $0x468] sm:$0xff] }
 0x171   : > { %1239 = vmatpush2.bf16.msra.mxu1 %v1011_v51  ;;  %1199 = vmatprep.subr.bf16.mxu0 %v994_v52  ;;  %v914_v51 = vpack.c.bf16 %v562_v46, %v546_v45  ;;  %v545_v52 = vld [vmem:[#allocation4 + $0x940] sm:$0xff]  ;;  %v406_v45 = vld [vmem:[#allocation4 + $0x4e8] sm:$0xff]  ;;  %v392_v46 = vld [vmem:[#allocation4 + $0x478] sm:$0xff] }
 0x172   : > { %1240 = vmatprep.subr.bf16.mxu1 %v996_v56  ;;  %v563_v56 = vld [vmem:[#allocation4 + $0x9d0] sm:$0xff]  ;;  %v913_v61 = vpack.c.bf16 %v561_v53, %v545_v52  ;;  %v405_v52 = vld [vmem:[#allocation4 + $0x4e0] sm:$0xff] }
 0x173   : > { %v391_v53 = vld [vmem:[#allocation4 + $0x470] sm:$0xff] }
 0x174   : > { %1200 = vmatpush2.bf16.msra.mxu0 %v993_v62  ;;  %v915_v62 = vpack.c.bf16 %v563_v56, %v547_v54  ;;  %v840_v54 = vpack.c.bf16 %v408_v47, %v392_v46  ;;  %v374_v56 = vld [vmem:[#allocation4 + $0x3e8] sm:$0xff] }
 0x175   : > { %1241 = vmatpush2.bf16.msra.mxu1 %v995_v63  ;;  %1201 = vmatprep.subr.bf16.mxu0 %v978_v4  ;;  %v898_v63 = vpack.c.bf16 %v530_v58, %v514_v57  ;;  %v513_v4 = vld [vmem:[#allocation4 + $0x840] sm:$0xff]  ;;  %v360_v57 = vld [vmem:[#allocation4 + $0x378] sm:$0xff] }
 0x176   : > { %1242 = vmatprep.subr.bf16.mxu1 %v980_v7  ;;  %v531_v7 = vld [vmem:[#allocation4 + $0x8d0] sm:$0xff]  ;;  %v897_v12 = vpack.c.bf16 %v529_v0, %v513_v4  ;;  %v376_v58 = vld [vmem:[#allocation4 + $0x3f8] sm:$0xff] }
 0x177   : > { %v359_v4 = vld [vmem:[#allocation4 + $0x370] sm:$0xff]  ;;  %v824_v0 = vpack.c.bf16 %v376_v58, %v360_v57 }
 0x178   : > { %1202 = vmatpush2.bf16.msra.mxu0 %v977_v13  ;;  %v899_v13 = vpack.c.bf16 %v531_v7, %v515_v5  ;;  %v375_v5 = vld [vmem:[#allocation4 + $0x3f0] sm:$0xff]  ;;  %v342_v7 = vld [vmem:[#allocation4 + $0x2e8] sm:$0xff] }
 0x179   : > { %1243 = vmatpush2.bf16.msra.mxu1 %v979_v14  ;;  %1203 = vmatprep.subr.bf16.mxu0 %v962_v15  ;;  %v886_v14 = vpack.c.bf16 %v502_v9, %v486_v8  ;;  %v485_v15 = vld [vmem:[#allocation4 + $0x760] sm:$0xff]  ;;  %v328_v8 = vld [vmem:[#allocation4 + $0x278] sm:$0xff]  ;;  %v823_v11 = vpack.c.bf16 %v375_v5, %v359_v4  ;;  %v727_v4 = vld [vmem:[#allocation4 + $0xef0] sm:$0xff] }
 0x17a   : > { %1244 = vmatprep.subr.bf16.mxu1 %v964_v19  ;;  %v503_v19 = vld [vmem:[#allocation4 + $0x7f0] sm:$0xff]  ;;  %v885_v22 = vpack.c.bf16 %v501_v16, %v485_v15  ;;  %v344_v9 = vld [vmem:[#allocation4 + $0x2f8] sm:$0xff]  ;;  %v694_v5 = vld [vmem:[#allocation4 + $0xde8] sm:$0xff] }
 0x17b   : > { %v327_v15 = vld [vmem:[#allocation4 + $0x270] sm:$0xff]  ;;  %v808_v16 = vpack.c.bf16 %v344_v9, %v328_v8 }
 0x17c   : > { %1204 = vmatpush2.bf16.msra.mxu0 %v961_v25  ;;  %v887_v25 = vpack.c.bf16 %v503_v19, %v487_v18  ;;  %v294_v18 = vld [vmem:[#allocation4 + $0x168] sm:$0xff] }
 0x17d   : > { %1245 = vmatpush2.bf16.msra.mxu1 %v963_v26  ;;  %1205 = vmatprep.subr.bf16.mxu0 %v946_v27  ;;  %v453_v26 = vld [vmem:[#allocation4 + $0x660] sm:$0xff]  ;;  %v310_v19 = vld [vmem:[#allocation4 + $0x1e8] sm:$0xff] }
 0x17e   : > { %1246 = vmatprep.subr.bf16.mxu1 %v948_v31  ;;  %v469_v27 = vld [vmem:[#allocation4 + $0x6e0] sm:$0xff]  ;;  %v422_v31 = vld [vmem:[#allocation4 + $0x568] sm:$0xff]  ;;  %v790_v24 = vpack.c.bf16 %v310_v19, %v294_v18  ;;  %v648_v18 = vld [vmem:[#allocation4 + $0xc78] sm:$0xff] }
 0x17f   : > { %v869_v36 = vpack.c.bf16 %v469_v27, %v453_v26  ;;  %v309_v26 = vld [vmem:[#allocation4 + $0x1e0] sm:$0xff]  ;;  %v295_v27 = vld [vmem:[#allocation4 + $0x170] sm:$0xff]  ;;  %v664_v19 = vld [vmem:[#allocation4 + $0xcf8] sm:$0xff] }
 0x180   : > { %1206 = vmatpush2.bf16.msra.mxu0 %v945_v37  ;;  %v871_v37 = vpack.c.bf16 %v471_v30, %v455_v28  ;;  %v792_v28 = vpack.c.bf16 %v312_v21, %v296_v20  ;;  %v262_v30 = vld [vmem:[#allocation4 + $0x68] sm:$0xff] }
 0x181   : > { %1247 = vmatpush2.bf16.msra.mxu1 %v947_v38  ;;  %1207 = vmatprep.subr.bf16.mxu0 %v930_v39  ;;  %v854_v38 = vpack.c.bf16 %v438_v32, %v422_v31  ;;  %v421_v39 = vld [vmem:[#allocation4 + $0x560] sm:$0xff]  ;;  %v278_v31 = vld [vmem:[#allocation4 + $0xe8] sm:$0xff]  ;;  %v264_v32 = vld [vmem:[#allocation4 + $0x78] sm:$0xff] }
 0x182   : > { %1248 = vmatprep.subr.bf16.mxu1 %v932_v43  ;;  %v439_v43 = vld [vmem:[#allocation4 + $0x5f0] sm:$0xff]  ;;  %v853_v48 = vpack.c.bf16 %v437_v40, %v421_v39 }
 0x183   : > { %v263_v39 = vld [vmem:[#allocation4 + $0x70] sm:$0xff] }
 0x184   : > { %1208 = vmatpush2.bf16.msra.mxu0 %v929_v49  ;;  %v855_v49 = vpack.c.bf16 %v439_v43, %v423_v41  ;;  %v279_v41 = vld [vmem:[#allocation4 + $0xf0] sm:$0xff]  ;;  %v758_v43 = vld [vmem:[#allocation4 + $0xfe8] sm:$0xff] }
 0x185   : > { %1249 = vmatpush2.bf16.msra.mxu1 %v931_v50  ;;  %1209 = vmatprep.subr.bf16.mxu0 %v914_v51  ;;  %v838_v50 = vpack.c.bf16 %v406_v45, %v390_v44  ;;  %v389_v51 = vld [vmem:[#allocation4 + $0x460] sm:$0xff]  ;;  %v744_v44 = vld [vmem:[#allocation4 + $0xf78] sm:$0xff]  ;;  %v775_v47 = vpack.c.bf16 %v279_v41, %v263_v39  ;;  %v631_v39 = vld [vmem:[#allocation4 + $0xbf0] sm:$0xff] }
 0x186   : > { %1250 = vmatprep.subr.bf16.mxu1 %v916_v55  ;;  %v358_v55 = vld [vmem:[#allocation4 + $0x368] sm:$0xff]  ;;  %v837_v59 = vpack.c.bf16 %v405_v52, %v389_v51  ;;  %v760_v45 = vld [vmem:[#allocation4 + $0xff8] sm:$0xff]  ;;  %v743_v51 = vld [vmem:[#allocation4 + $0xf70] sm:$0xff] }
 0x187   : > { %v1016_v52 = vpack.c.bf16 %v760_v45, %v744_v44  ;;  %v598_v41 = vld [vmem:[#allocation4 + $0xae8] sm:$0xff] }
 0x188   : > { %1210 = vmatpush2.bf16.msra.mxu0 %v913_v61  ;;  %v822_v61 = vpack.c.bf16 %v374_v56, %v358_v55  ;;  %v712_v55 = vld [vmem:[#allocation4 + $0xe78] sm:$0xff] }
 0x189   : > { %1251 = vmatpush2.bf16.msra.mxu1 %v915_v62  ;;  %1211 = vmatprep.subr.bf16.mxu0 %v898_v63  ;;  %v357_v62 = vld [vmem:[#allocation4 + $0x360] sm:$0xff]  ;;  %v728_v56 = vld [vmem:[#allocation4 + $0xef8] sm:$0xff] }
 0x18a   : > { %1252 = vmatprep.subr.bf16.mxu1 %v900_v6  ;;  %v373_v63 = vld [vmem:[#allocation4 + $0x3e0] sm:$0xff]  ;;  %v326_v6 = vld [vmem:[#allocation4 + $0x268] sm:$0xff] }
 0x18b   : > { %v821_v10 = vpack.c.bf16 %v373_v63, %v357_v62  ;;  %v711_v62 = vld [vmem:[#allocation4 + $0xe70] sm:$0xff]  ;;  %v1000_v63 = vpack.c.bf16 %v728_v56, %v712_v55 }
 0x18c   : > { %1212 = vmatpush2.bf16.msra.mxu0 %v897_v12  ;;  %v806_v12 = vpack.c.bf16 %v342_v7, %v326_v6  ;;  %v680_v6 = vld [vmem:[#allocation4 + $0xd78] sm:$0xff]  ;;  %v999_v9 = vpack.c.bf16 %v727_v4, %v711_v62  ;;  %v567_v62 = vld [vmem:[#allocation4 + $0x9f0] sm:$0xff]  ;;  %v534_v4 = vld [vmem:[#allocation4 + $0x8e8] sm:$0xff] }
 0x18d   : > { %1253 = vmatpush2.bf16.msra.mxu1 %v899_v13  ;;  %1263 = vmatprep.subr.bf16.mxu0 %v886_v14  ;;  %v325_v13 = vld [vmem:[#allocation4 + $0x260] sm:$0xff]  ;;  %v696_v7 = vld [vmem:[#allocation4 + $0xdf8] sm:$0xff] }
 0x18e   : > { %1304 = vmatprep.subr.bf16.mxu1 %v888_v17  ;;  %v341_v14 = vld [vmem:[#allocation4 + $0x2e0] sm:$0xff]  ;;  %v343_v17 = vld [vmem:[#allocation4 + $0x2f0] sm:$0xff] }
 0x18f   : > { %1214 = vmatmul.mubr.bf16.vlgmr.msra.gmra.mxu0 %v1757_v3  ;;  %v807_v23 = vpack.c.bf16 %v343_v17, %v327_v15  ;;  %v695_v15 = vld [vmem:[#allocation4 + $0xdf0] sm:$0xff]  ;;  %v662_v17 = vld [vmem:[#allocation4 + $0xce8] sm:$0xff] }
 0x190   : > { %1255 = vmatmul.mubr.bf16.vlgmr.msra.gmra.mxu1 %v1757_v3  ;;  %1264 = vmatpush1.bf16.msra.mxu0 %v885_v22  ;;  %v805_v22 = vpack.c.bf16 %v341_v14, %v325_v13  ;;  %v679_v13 = vld [vmem:[#allocation4 + $0xd70] sm:$0xff]  ;;  %v984_v14 = vpack.c.bf16 %v696_v7, %v680_v6 }
 0x191   : > { %1295 = vmatprep.mubr.bf16.mxu0 %v1755_v2  ;;  %1305 = vmatpush1.bf16.msra.mxu1 %v887_v25  ;;  %v293_v25 = vld [vmem:[#allocation4 + $0x160] sm:$0xff]  ;;  %v983_v21 = vpack.c.bf16 %v695_v15, %v679_v13  ;;  %v535_v13 = vld [vmem:[#allocation4 + $0x8f0] sm:$0xff] }
 0x192   : > { %1336 = vmatprep.mubr.bf16.mxu1 %v1755_v2  ;;  %1265 = vmatprep.subr.bf16.mxu0 %v870_v29  ;;  %v407_v2 = vld [vmem:[#allocation4 + $0x4f0] sm:$0xff]  ;;  %v789_v34 = vpack.c.bf16 %v309_v26, %v293_v25  ;;  %v968_v26 = vpack.c.bf16 %v664_v19, %v648_v18 }
 0x193   : > { %1306 = vmatprep.subr.bf16.mxu1 %v872_v33  ;;  %v839_v60 = vpack.c.bf16 %v407_v2, %v391_v53  ;;  %v311_v29 = vld [vmem:[#allocation4 + $0x1f0] sm:$0xff]  ;;  %v280_v33 = vld [vmem:[#allocation4 + $0xf8] sm:$0xff]  ;;  %v726_v2 = vld [vmem:[#allocation4 + $0xee8] sm:$0xff] }
 0x194   : > { %1266 = vmatpush1.bf16.msra.mxu0 %v869_v36  ;;  %v791_v35 = vpack.c.bf16 %v311_v29, %v295_v27  ;;  %v774_v36 = vpack.c.bf16 %v278_v31, %v262_v30  ;;  %v776_v40 = vpack.c.bf16 %v280_v33, %v264_v32  ;;  %v759_v53 = vld [vmem:[#allocation4 + $0xff0] sm:$0xff]  ;;  %v630_v29 = vld [vmem:[#allocation4 + $0xbe8] sm:$0xff]  ;;  %v616_v30 = vld [vmem:[#allocation4 + $0xb78] sm:$0xff] }
 0x195   : > { %1307 = vmatpush1.bf16.msra.mxu1 %v871_v37  ;;  %1267 = vmatprep.subr.bf16.mxu0 %v854_v38  ;;  %v261_v37 = vld [vmem:[#allocation4 + $0x60] sm:$0xff]  ;;  %v1015_v58 = vpack.c.bf16 %v759_v53, %v743_v51  ;;  %v647_v25 = vld [vmem:[#allocation4 + $0xc70] sm:$0xff]  ;;  %v632_v31 = vld [vmem:[#allocation4 + $0xbf8] sm:$0xff] }
 0x196   : > { %1308 = vmatprep.subr.bf16.mxu1 %v856_v42  ;;  %v277_v38 = vld [vmem:[#allocation4 + $0xe0] sm:$0xff]  ;;  %v742_v42 = vld [vmem:[#allocation4 + $0xf68] sm:$0xff]  ;;  %v663_v27 = vld [vmem:[#allocation4 + $0xcf0] sm:$0xff] }
 0x197   : > { %v773_v46 = vpack.c.bf16 %v277_v38, %v261_v37  ;;  %v967_v33 = vpack.c.bf16 %v663_v27, %v647_v25  ;;  %v615_v37 = vld [vmem:[#allocation4 + $0xb70] sm:$0xff]  ;;  %v952_v38 = vpack.c.bf16 %v632_v31, %v616_v30  ;;  %v566_v53 = vld [vmem:[#allocation4 + $0x9e8] sm:$0xff] }
 0x198   : > { %1268 = vmatpush1.bf16.msra.mxu0 %v853_v48  ;;  %v1014_v48 = vpack.c.bf16 %v758_v43, %v742_v42  ;;  %v584_v42 = vld [vmem:[#allocation4 + $0xa78] sm:$0xff]  ;;  %v951_v45 = vpack.c.bf16 %v631_v39, %v615_v37  ;;  %v599_v51 = vld [vmem:[#allocation4 + $0xaf0] sm:$0xff] }
 0x199   : > { %1309 = vmatpush1.bf16.msra.mxu1 %v855_v49  ;;  %1269 = vmatprep.subr.bf16.mxu0 %v838_v50  ;;  %v741_v49 = vld [vmem:[#allocation4 + $0xf60] sm:$0xff]  ;;  %v600_v43 = vld [vmem:[#allocation4 + $0xaf8] sm:$0xff] }
 0x19a   : > { %1310 = vmatprep.subr.bf16.mxu1 %v840_v54  ;;  %v757_v50 = vld [vmem:[#allocation4 + $0xfe0] sm:$0xff]  ;;  %v710_v54 = vld [vmem:[#allocation4 + $0xe68] sm:$0xff] }
 0x19b   : > { %v1013_v57 = vpack.c.bf16 %v757_v50, %v741_v49  ;;  %v583_v49 = vld [vmem:[#allocation4 + $0xa70] sm:$0xff]  ;;  %v936_v50 = vpack.c.bf16 %v600_v43, %v584_v42 }
 0x19c   : > { %1270 = vmatpush1.bf16.msra.mxu0 %v837_v59  ;;  %v998_v59 = vpack.c.bf16 %v726_v2, %v710_v54  ;;  %v552_v54 = vld [vmem:[#allocation4 + $0x978] sm:$0xff]  ;;  %v935_v56 = vpack.c.bf16 %v599_v51, %v583_v49 }
 0x19d   : > { %1311 = vmatpush1.bf16.msra.mxu1 %v839_v60  ;;  %1271 = vmatprep.subr.bf16.mxu0 %v822_v61  ;;  %v709_v60 = vld [vmem:[#allocation4 + $0xe60] sm:$0xff]  ;;  %v568_v2 = vld [vmem:[#allocation4 + $0x9f8] sm:$0xff] }
 0x19e   : > { %1312 = vmatprep.subr.bf16.mxu1 %v824_v0  ;;  %v725_v61 = vld [vmem:[#allocation4 + $0xee0] sm:$0xff]  ;;  %v678_v0 = vld [vmem:[#allocation4 + $0xd68] sm:$0xff] }
 0x19f   : > { %v997_v8 = vpack.c.bf16 %v725_v61, %v709_v60  ;;  %v551_v60 = vld [vmem:[#allocation4 + $0x970] sm:$0xff]  ;;  %v920_v61 = vpack.c.bf16 %v568_v2, %v552_v54 }
 0x1a0   : > { %1272 = vmatpush1.bf16.msra.mxu0 %v821_v10  ;;  %v982_v10 = vpack.c.bf16 %v694_v5, %v678_v0  ;;  %v520_v0 = vld [vmem:[#allocation4 + $0x878] sm:$0xff]  ;;  %v919_v7 = vpack.c.bf16 %v567_v62, %v551_v60 }
 0x1a1   : > { %1313 = vmatpush1.bf16.msra.mxu1 %v823_v11  ;;  %1273 = vmatprep.subr.bf16.mxu0 %v806_v12  ;;  %v677_v11 = vld [vmem:[#allocation4 + $0xd60] sm:$0xff]  ;;  %v536_v5 = vld [vmem:[#allocation4 + $0x8f8] sm:$0xff] }
 0x1a2   : > { %1314 = vmatprep.subr.bf16.mxu1 %v808_v16  ;;  %v693_v12 = vld [vmem:[#allocation4 + $0xde0] sm:$0xff]  ;;  %v646_v16 = vld [vmem:[#allocation4 + $0xc68] sm:$0xff] }
 0x1a3   : > { %v981_v20 = vpack.c.bf16 %v693_v12, %v677_v11  ;;  %v904_v11 = vpack.c.bf16 %v536_v5, %v520_v0  ;;  %v519_v12 = vld [vmem:[#allocation4 + $0x870] sm:$0xff] }
 0x1a4   : > { %1274 = vmatpush1.bf16.msra.mxu0 %v805_v22  ;;  %v966_v22 = vpack.c.bf16 %v662_v17, %v646_v16  ;;  %v903_v17 = vpack.c.bf16 %v535_v13, %v519_v12 }
 0x1a5   : > { %1315 = vmatpush1.bf16.msra.mxu1 %v807_v23  ;;  %1275 = vmatprep.subr.bf16.mxu0 %v790_v24  ;;  %v645_v23 = vld [vmem:[#allocation4 + $0xc60] sm:$0xff] }
 0x1a6   : > { %1316 = vmatprep.subr.bf16.mxu1 %v792_v28  ;;  %v661_v24 = vld [vmem:[#allocation4 + $0xce0] sm:$0xff]  ;;  %v614_v28 = vld [vmem:[#allocation4 + $0xb68] sm:$0xff] }
 0x1a7   : > { %v965_v32 = vpack.c.bf16 %v661_v24, %v645_v23 }
 0x1a8   : > { %1276 = vmatpush1.bf16.msra.mxu0 %v789_v34  ;;  %v950_v34 = vpack.c.bf16 %v630_v29, %v614_v28 }
 0x1a9   : > { %1317 = vmatpush1.bf16.msra.mxu1 %v791_v35  ;;  %1277 = vmatprep.subr.bf16.mxu0 %v774_v36  ;;  %v613_v35 = vld [vmem:[#allocation4 + $0xb60] sm:$0xff] }
 0x1aa   : > { %1318 = vmatprep.subr.bf16.mxu1 %v776_v40  ;;  %v629_v36 = vld [vmem:[#allocation4 + $0xbe0] sm:$0xff]  ;;  %v582_v40 = vld [vmem:[#allocation4 + $0xa68] sm:$0xff] }
 0x1ab   : > { %v949_v44 = vpack.c.bf16 %v629_v36, %v613_v35 }
 0x1ac   : > { %1278 = vmatpush1.bf16.msra.mxu0 %v773_v46  ;;  %v934_v46 = vpack.c.bf16 %v598_v41, %v582_v40 }
 0x1ad   : > { %1319 = vmatpush1.bf16.msra.mxu1 %v775_v47  ;;  %1279 = vmatprep.subr.bf16.mxu0 %v1014_v48  ;;  %v581_v47 = vld [vmem:[#allocation4 + $0xa60] sm:$0xff] }
 0x1ae   : > { %1320 = vmatprep.subr.bf16.mxu1 %v1016_v52  ;;  %v597_v48 = vld [vmem:[#allocation4 + $0xae0] sm:$0xff]  ;;  %v550_v52 = vld [vmem:[#allocation4 + $0x968] sm:$0xff] }
 0x1af   : > { %v933_v55 = vpack.c.bf16 %v597_v48, %v581_v47 }
 0x1b0   : > { %1280 = vmatpush2.bf16.msra.mxu0 %v1013_v57  ;;  %v918_v57 = vpack.c.bf16 %v566_v53, %v550_v52 }
 0x1b1   : > { %1321 = vmatpush2.bf16.msra.mxu1 %v1015_v58  ;;  %1281 = vmatprep.subr.bf16.mxu0 %v998_v59  ;;  %v549_v58 = vld [vmem:[#allocation4 + $0x960] sm:$0xff] }
 0x1b2   : > { %1322 = vmatprep.subr.bf16.mxu1 %v1000_v63  ;;  %v565_v59 = vld [vmem:[#allocation4 + $0x9e0] sm:$0xff]  ;;  %v518_v63 = vld [vmem:[#allocation4 + $0x868] sm:$0xff] }
 0x1b3   : > { %v917_v6 = vpack.c.bf16 %v565_v59, %v549_v58 }
 0x1b4   : > { %1282 = vmatpush2.bf16.msra.mxu0 %v997_v8  ;;  %v902_v8 = vpack.c.bf16 %v534_v4, %v518_v63 }
 0x1b5   : > { %1323 = vmatpush2.bf16.msra.mxu1 %v999_v9  ;;  %1283 = vmatprep.subr.bf16.mxu0 %v982_v10  ;;  %v517_v9 = vld [vmem:[#allocation4 + $0x860] sm:$0xff] }
 0x1b6   : > { %1324 = vmatprep.subr.bf16.mxu1 %v984_v14  ;;  %v533_v10 = vld [vmem:[#allocation4 + $0x8e0] sm:$0xff]  ;;  %v1661_v14 = vmov 1966171168  }
 0x1b7   : > { %v1366_v15 = vunpack.c.l.s4 %v1661_v14  ;;  %v901_v16 = vpack.c.bf16 %v533_v10, %v517_v9 }
 0x1b8   : > { %1284 = vmatpush2.bf16.msra.mxu0 %v981_v20 }
 0x1b9   : > { %1325 = vmatpush2.bf16.msra.mxu1 %v983_v21  ;;  %1285 = vmatprep.subr.bf16.mxu0 %v966_v22  ;;  %v1367_v18 = vunpack.c.0.s8 %v1366_v15 }
 0x1ba   : > { %1326 = vmatprep.subr.bf16.mxu1 %v968_v26 }
 0x1bb   : > { %v1370_v21 = vsub.s32 %v1367_v18, %v1737_v1 }
 0x1bc   : > { %1286 = vmatpush2.bf16.msra.mxu0 %v965_v32 }
 0x1bd   : > { %1327 = vmatpush2.bf16.msra.mxu1 %v967_v33  ;;  %1287 = vmatprep.subr.bf16.mxu0 %v950_v34 }
 0x1be   : > { %1328 = vmatprep.subr.bf16.mxu1 %v952_v38 }
 0x1c0   : > { %1288 = vmatpush2.bf16.msra.mxu0 %v949_v44 }
 0x1c1   : > { %1329 = vmatpush2.bf16.msra.mxu1 %v951_v45  ;;  %1289 = vmatprep.subr.bf16.mxu0 %v934_v46 }
 0x1c2   : > { %1330 = vmatprep.subr.bf16.mxu1 %v936_v50 }
 0x1c4   : > { %1290 = vmatpush2.bf16.msra.mxu0 %v933_v55 }
 0x1c5   : > { %1331 = vmatpush2.bf16.msra.mxu1 %v935_v56  ;;  %1291 = vmatprep.subr.bf16.mxu0 %v918_v57 }
 0x1c6   : > { %1332 = vmatprep.subr.bf16.mxu1 %v920_v61 }
 0x1c8   : > { %1292 = vmatpush2.bf16.msra.mxu0 %v917_v6 }
 0x1c9   : > { %1333 = vmatpush2.bf16.msra.mxu1 %v919_v7  ;;  %1293 = vmatprep.subr.bf16.mxu0 %v902_v8 }
 0x1ca   : > { %1334 = vmatprep.subr.bf16.mxu1 %v904_v11 }
 0x1cc   : > { %1294 = vmatpush2.bf16.msra.mxu0 %v901_v16 }
 0x1cd   : > { %1335 = vmatpush2.bf16.msra.mxu1 %v903_v17 }
 0x1cf   : > { %1296 = vmatmul.mubr.bf16.vlgmr.msra.gmra.mxu0 %v1757_v3  ;;  %v1051_v19 = vpop.f32.mrf.mxu0  ;;  %v1092_v20 = vpop.f32.mrf.mxu1 }
 0x1d0   : > { %1337 = vmatmul.mubr.bf16.vlgmr.msra.gmra.mxu1 %v1757_v3 }
 0x1d1   : > { %v1053_v22 = vpop.f32.mrf.mxu0  ;;  %v1094_v23 = vpop.f32.mrf.mxu1 }
 0x1d2   : > { %v1361_v24 = vcombine.low %v1051_v19, %v1053_v22  ;;  %v1362_v25 = vcombine.low %v1092_v20, %v1094_v23 }
 0x1d3   : > { %v1055_v26 = vpop.f32.mrf.mxu0  ;;  %v1096_v27 = vpop.f32.mrf.mxu1 }
 0x1d4   : > { %v1371_v28 = vrot.slane %v1361_v24, %v1370_v21  ;;  %v1378_v29 = vrot.slane %v1362_v25, %v1370_v21 }
 0x1d5   : > { %v1056_v30 = vpop.f32.mrf.mxu0  ;;  %v1097_v31 = vpop.f32.mrf.mxu1 }
 0x1d6   : > { %v1393_v32 = vcombine.low %v1371_v28, %v1378_v29 }
 0x1d8   : > { %v1401_v44 = vrot.slane %v1393_v32, %v1370_v21 }
 0x20f   : > { %v1133_v33 = vpop.f32.mrf.mxu0  ;;  %v1174_v34 = vpop.f32.mrf.mxu1 }
 0x211   : > { %v1135_v35 = vpop.f32.mrf.mxu0  ;;  %v1176_v36 = vpop.f32.mrf.mxu1 }
 0x212   : > { %v1363_v37 = vcombine.low %v1133_v33, %v1135_v35  ;;  %v1364_v1 = vcombine.low %v1174_v34, %v1176_v36 }
 0x213   : > { %v1137_v38 = vpop.f32.mrf.mxu0  ;;  %v1178_v3 = vpop.f32.mrf.mxu1 }
 0x214   : > { %v1385_v39 = vrot.slane %v1363_v37, %v1370_v21  ;;  %v1392_v40 = vrot.slane %v1364_v1, %v1370_v21 }
 0x215   : > { %v1138_v41 = vpop.f32.mrf.mxu0  ;;  %v1179_v42 = vpop.f32.mrf.mxu1 }
 0x216   : > { %v1394_v43 = vcombine.low %v1385_v39, %v1392_v40 }
 0x218   : > { %v1408_v45 = vrot.slane %v1394_v43, %v1370_v21 }
 0x21a   : > { %v1409_v46 = vcombine.low %v1401_v44, %v1408_v45 }
 0x21c   : > { %1461 = vst [vmem:[%s1781_s7] sm:$0xff] %v1409_v46 }
 0x24f   : > { %v1215_v47 = vpop.f32.mrf.mxu0 }
 0x250   : > { %v1256_v48 = vpop.f32.mrf.mxu1 }
 0x251   : > { %v1217_v49 = vpop.f32.mrf.mxu0 }
 0x252   : > { %v1410_v50 = vcombine.low %v1215_v47, %v1217_v49  ;;  %v1258_v51 = vpop.f32.mrf.mxu1 }
 0x253   : > { %v1411_v52 = vcombine.low %v1256_v48, %v1258_v51  ;;  %v1219_v53 = vpop.f32.mrf.mxu0 }
 0x254   : > { %v1420_v54 = vrot.slane %v1410_v50, %v1370_v21  ;;  %v1260_v2 = vpop.f32.mrf.mxu1 }
 0x255   : > { %v1427_v55 = vrot.slane %v1411_v52, %v1370_v21  ;;  %v1220_v56 = vpop.f32.mrf.mxu0 }
 0x256   : > { %v1261_v57 = vpop.f32.mrf.mxu1 }
 0x257   : > { %v1442_v58 = vcombine.low %v1420_v54, %v1427_v55 }
 0x259   : > { %v1450_v11 = vrot.slane %v1442_v58, %v1370_v21 }
 0x28f   : > { %v1297_v59 = vpop.f32.mrf.mxu0 }
 0x290   : > { %v1338_v60 = vpop.f32.mrf.mxu1 }
 0x291   : > { %v1299_v61 = vpop.f32.mrf.mxu0 }
 0x292   : > { %v1412_v62 = vcombine.low %v1297_v59, %v1299_v61  ;;  %v1340_v63 = vpop.f32.mrf.mxu1 }
 0x293   : > { %v1413_v4 = vcombine.low %v1338_v60, %v1340_v63  ;;  %v1301_v0 = vpop.f32.mrf.mxu0 }
 0x294   : > { %v1434_v5 = vrot.slane %v1412_v62, %v1370_v21  ;;  %v1342_v6 = vpop.f32.mrf.mxu1 }
 0x295   : > { %v1441_v7 = vrot.slane %v1413_v4, %v1370_v21  ;;  %v1302_v8 = vpop.f32.mrf.mxu0 }
 0x296   : > { %v1343_v9 = vpop.f32.mrf.mxu1 }
 0x297   : > { %v1443_v10 = vcombine.low %v1434_v5, %v1441_v7 }
 0x299   : > { %v1457_v12 = vrot.slane %v1443_v10, %v1370_v21 }
 0x29b   : > { %v1458_v13 = vcombine.low %v1450_v11, %v1457_v12 }
 0x29d   : > { %1462 = vst [vmem:[%s1781_s7 + $0x8] sm:$0xff] %v1458_v13 }
 0x29e PF: > { %s15_s12 = sadd.s32 1, %s1655_s12  }
 0x29f   : > { %p12_p5 = scmp.ge.s32.totalorder %s15_s12, 4  }
 0x2a1   :  { %14 = sbr.rel (!%p12_p5) target bundleno = 2 (0x2), region = 71 }
 0x2a6   :  { %1482 = vsyncpa [#allocation3], 1 }
 0x2a7   :  { %1484 = vsyncpa [#allocation3 + $0x1], 1 }
 0x2a8   :  { %1485 = vsyncpa [#allocation5], 1 }

</bundles_post_ra>
